<compile_context>
chip_gen: v6e
topology: v6e:2x2x1
jax: 0.10.0
libtpu: 0.0.40
codegen_flags: <defaults>
</compile_context>

<pallas_src>
import functools

import jax
import jax.numpy as jnp
import numpy as np
from jax.experimental import pallas as pl
from jax.experimental.pallas import tpu as pltpu

EPS = 1e-5
NEG_SLOPE = 0.2
LANES = 128
TM_MAX = 512  # ~85% of HBM roofline per measured Pallas tiling data


# ----------------------------- Pallas kernel ------------------------------- #
def _conv_fused_kernel(a_ref, w_ref, o_ref, *, instance_norm, leaky_relu, inv_m):
    """a_ref: [1, TM, K] bf16 patches, w_ref: [K, Cpad] bf16, o_ref: [1, TM, Cpad]."""
    y = jnp.dot(a_ref[0], w_ref[...], preferred_element_type=jnp.float32)
    if instance_norm:
        # Single-pass stats over the full spatial extent of this sample (f32).
        s1 = jnp.sum(y, axis=0, keepdims=True)
        s2 = jnp.sum(y * y, axis=0, keepdims=True)
        mean = s1 * inv_m
        var = jnp.maximum(s2 * inv_m - mean * mean, 0.0)  # biased var (IN default)
        y = (y - mean) * jax.lax.rsqrt(var + EPS)
    if leaky_relu:
        y = jnp.where(y >= 0, y, NEG_SLOPE * y)
    o_ref[0] = y.astype(o_ref.dtype)


# ------------------------------ JAX glue ----------------------------------- #
def _im2col(x_nhwc, k, stride, pad):
    n, h, w, c = x_nhwc.shape
    xp = jnp.pad(x_nhwc, ((0, 0), (pad, pad), (pad, pad), (0, 0)))
    ho = (h + 2 * pad - k) // stride + 1
    wo = (w + 2 * pad - k) // stride + 1
    cols = []
    for di in range(k):
        for dj in range(k):
            cols.append(xp[:, di:di + stride * (ho - 1) + 1:stride,
                           dj:dj + stride * (wo - 1) + 1:stride, :])
    patches = jnp.stack(cols, axis=3)                    # [N, Ho, Wo, k*k, C]
    patches = patches.reshape(n, ho * wo, k * k * c).astype(jnp.bfloat16)
    return patches, ho, wo


def _choose_tm(nm, kdim, cpad):
    """M-tile: as big as possible while double-buffered tiles + weights stay well
    under the default scoped-VMEM limit on every TPU generation."""
    def vmem_need(t):  # 2x in-tile (bf16) + 2x out-tile (f32) + 2x weights (bf16)
        return 2 * (t * kdim * 2 + t * cpad * 4) + 2 * kdim * cpad * 2

    tm = TM_MAX
    while tm > 64 and vmem_need(tm) > 12 * 1024 * 1024:
        tm //= 2
    if nm <= tm:
        tm = max(8, ((nm + 7) // 8) * 8)
    return tm


def _conv_layer(x_nhwc, w_oihw, *, stride, pad, instance_norm, leaky_relu, out_dtype):
    cout, cin, kh, kw = w_oihw.shape
    patches, ho, wo = _im2col(x_nhwc, kh, stride, pad)   # bf16 [N, M, K]
    n, m, kdim = patches.shape

    # Lane-dense output: pad Cout to a multiple of 128 lanes; slice after the call.
    cpad = max(LANES, ((cout + LANES - 1) // LANES) * LANES)
    # (di, dj, cin) flattening order matches _im2col.
    w_mat = jnp.transpose(w_oihw, (2, 3, 1, 0)).reshape(kdim, cout)
    w_mat = jnp.pad(w_mat, ((0, 0), (0, cpad - cout))).astype(jnp.bfloat16)

    if instance_norm:
        # One grid step per sample: full spatial extent in-block keeps the
        # per-(n, c) IN statistics exact (M is small on these layers).
        a3, g, tm, m_valid = patches, n, m, m
    else:
        # Fold batch into M and tile it -> pipelined, megacore-parallel matmuls.
        nm = n * m
        tm = _choose_tm(nm, kdim, cpad)
        nm_pad = -(-nm // tm) * tm
        a2 = jnp.pad(patches.reshape(nm, kdim), ((0, nm_pad - nm), (0, 0)))
        g = nm_pad // tm
        a3, m_valid = a2.reshape(g, tm, kdim), tm

    kernel = functools.partial(_conv_fused_kernel, instance_norm=instance_norm,
                               leaky_relu=leaky_relu, inv_m=1.0 / float(m_valid))
    out_bytes = g * tm * cpad * jnp.dtype(out_dtype).itemsize

    out = pl.pallas_call(
        kernel,
        grid=(g,),
        in_specs=[
            pl.BlockSpec((1, tm, kdim), lambda i: (i, 0, 0)),  # patch tile (pipelined)
            pl.BlockSpec((kdim, cpad), lambda i: (0, 0)),      # weights stay resident
        ],
        out_specs=pl.BlockSpec((1, tm, cpad), lambda i: (i, 0, 0)),
        out_shape=jax.ShapeDtypeStruct((g, tm, cpad), out_dtype),
        compiler_params=pltpu.CompilerParams(dimension_semantics=("parallel",)),
        cost_estimate=pl.CostEstimate(
            flops=2 * g * tm * kdim * cpad,
            transcendentals=0,
            bytes_accessed=(g * tm * kdim + kdim * cpad) * 2 + out_bytes),
    )(a3, w_mat)

    if instance_norm:
        y = out[:, :, :cout]                               # [N, M, Cout]
    else:
        y = out.reshape(g * tm, cpad)[:n * m, :cout]       # drop row/lane padding
    return y.reshape(n, ho, wo, cout)


def discriminative_forward(x_nchw, params):
    x = jnp.transpose(x_nchw, (0, 2, 3, 1))                # NCHW -> NHWC
    x = _conv_layer(x, params["w1"], stride=2, pad=1, instance_norm=False,
                    leaky_relu=True, out_dtype=jnp.bfloat16)
    x = _conv_layer(x, params["w2"], stride=2, pad=1, instance_norm=True,
                    leaky_relu=True, out_dtype=jnp.bfloat16)
    x = _conv_layer(x, params["w3"], stride=2, pad=1, instance_norm=True,
                    leaky_relu=True, out_dtype=jnp.bfloat16)
    x = _conv_layer(x, params["w4"], stride=2, pad=1, instance_norm=True,
                    leaky_relu=True, out_dtype=jnp.bfloat16)
    # convolution5 is defined in __init__ but never used in forward() -> skipped.
    x = _conv_layer(x, params["w6"], stride=1, pad=1, instance_norm=False,
                    leaky_relu=False, out_dtype=jnp.float32)
    return jnp.transpose(x, (0, 3, 1, 2))                  # NHWC -> NCHW


# -------------------------- Deterministic params ---------------------------- #
def init_params(key, cd=16):
    ks = jax.random.split(key, 5)

    def w(k, cout, cin):
        fan_in = cin * 4 * 4
        return jax.random.normal(k, (cout, cin, 4, 4), jnp.float32) / np.sqrt(fan_in)

    return {
        "w1": w(ks[0], cd, 3),           # conv1: 3   -> cd
        "w2": w(ks[1], cd * 2, cd),      # conv2: cd  -> 2cd  (+ InstanceNorm)
        "w3": w(ks[2], cd * 4, cd * 2),  # conv3: 2cd -> 4cd  (+ InstanceNorm)
        "w4": w(ks[3], cd * 8, cd * 4),  # conv4: 4cd -> 8cd  (+ InstanceNorm)
        "w6": w(ks[4], 1, cd * 8),       # conv6: 8cd -> 1
    }


# --------------------------- Pure-JAX references ----------------------------- #
def _ref_forward(x_nchw, params, *, bf16_operands):
    """bf16_operands=True mirrors the kernel's bf16-MXU / f32-accumulate pipeline;
    bf16_operands=False is the full-f32 (PyTorch-faithful) reference."""
    op_dt = jnp.bfloat16 if bf16_operands else jnp.float32
    kwargs = {} if bf16_operands else {"precision": jax.lax.Precision.HIGHEST}

    def conv(x, w, stride, pad):
        return jax.lax.conv_general_dilated(
            x.astype(op_dt), w.astype(op_dt), (stride, stride),
            [(pad, pad), (pad, pad)],
            dimension_numbers=("NCHW", "OIHW", "NCHW"),
            preferred_element_type=jnp.float32, **kwargs)

    def inorm(x):
        mean = jnp.mean(x, axis=(2, 3), keepdims=True)
        var = jnp.mean((x - mean) ** 2, axis=(2, 3), keepdims=True)
        return (x - mean) * jax.lax.rsqrt(var + EPS)

    def lrelu(x):
        return jnp.where(x >= 0, x, NEG_SLOPE * x)

    x = lrelu(conv(x_nchw, params["w1"], 2, 1))
    x = lrelu(inorm(conv(x, params["w2"], 2, 1)))
    x = lrelu(inorm(conv(x, params["w3"], 2, 1)))
    x = lrelu(inorm(conv(x, params["w4"], 2, 1)))
    x = conv(x, params["w6"], 1, 1)
    return x


if __name__ == "__main__":
    key = jax.random.PRNGKey(0)
    kx, kp = jax.random.split(key)

    cd = 16                                                   # small conv dimension
    x = jax.random.normal(kx, (2, 3, 64, 64), jnp.float32)    # NCHW input
    params = init_params(kp, cd=cd)

    fwd = jax.jit(discriminative_forward)
    out = jax.block_until_ready(fwd(x, params))
    assert out.shape == (2, 1, 3, 3), out.shape

    # Tight check against a reference running the same bf16-operand / f32-accumulate
    # math as the kernel.
    ref_bf16 = jax.block_until_ready(_ref_forward(x, params, bf16_operands=True))
    np.testing.assert_allclose(np.asarray(out), np.asarray(ref_bf16),
                               rtol=3e-3, atol=3e-3)

    # Loose check against the full-f32 reference (difference = bf16 operand rounding).
    ref_f32 = jax.block_until_ready(_ref_forward(x, params, bf16_operands=False))
    np.testing.assert_allclose(np.asarray(out), np.asarray(ref_f32),
                               rtol=8e-2, atol=8e-2)

    print("KERNEL_OK")
</pallas_src>

<mosaic_0001>
module attributes {stable_mosaic.version = 11 : i64} {
  func.func @_conv_fused_kernel(%arg0: i32, %arg1: memref<1x512x48xbf16, #tpu.memory_space<vmem>>, %arg2: memref<48x128xbf16, #tpu.memory_space<vmem>>, %arg3: memref<1x512x128xbf16, #tpu.memory_space<vmem>>) attributes {dimension_semantics = [#tpu.dimension_semantics<parallel>], iteration_bounds = array<i64: 4>, scalar_prefetch = 0 : i64, scratch_operands = 0 : i64, tpu.core_type = #tpu.core_type<tc>, window_params = [{transform_indices = @transform_0, window_bounds = array<i64: 1, 512, 48>}, {pipeline_mode = #tpu.pipeline_mode<synchronous>, transform_indices = @transform_1, window_bounds = array<i64: 48, 128>}, {transform_indices = @transform_2, window_bounds = array<i64: 1, 512, 128>}]} {
    %c0 = arith.constant 0 : index
    %c0_0 = arith.constant 0 : index
    %c0_1 = arith.constant 0 : index
    %0 = vector.load %arg1[%c0, %c0_0, %c0_1] : memref<1x512x48xbf16, #tpu.memory_space<vmem>>, vector<1x512x48xbf16>
    %1 = vector.shape_cast %0 : vector<1x512x48xbf16> to vector<512x48xbf16>
    %c0_2 = arith.constant 0 : index
    %c0_3 = arith.constant 0 : index
    %2 = vector.load %arg2[%c0_2, %c0_3] : memref<48x128xbf16, #tpu.memory_space<vmem>>, vector<48x128xbf16>
    %cst = arith.constant dense<0.000000e+00> : vector<512x128xf32>
    %3 = tpu.matmul %1, %2, %cst {dimension_numbers = #tpu.dot_dimension_numbers<[1], [0], [0], [1], [0, 0, 1, 1], [], []>} : vector<512x48xbf16>, vector<48x128xbf16>, vector<512x128xf32> -> vector<512x128xf32>
    %cst_4 = arith.constant 0.000000e+00 : f32
    %4 = vector.broadcast %cst_4 : f32 to vector<512x128xf32>
    %5 = arith.cmpf oge, %3, %4 : vector<512x128xf32>
    %cst_5 = arith.constant 2.000000e-01 : f32
    %6 = vector.broadcast %cst_5 : f32 to vector<512x128xf32>
    %7 = arith.mulf %6, %3 : vector<512x128xf32>
    %8 = arith.select %5, %3, %7 : vector<512x128xi1>, vector<512x128xf32>
    %9 = arith.truncf %8 : vector<512x128xf32> to vector<512x128xbf16>
    %c0_6 = arith.constant 0 : index
    %c0_7 = arith.constant 0 : index
    %c0_8 = arith.constant 0 : index
    %10 = vector.load %arg3[%c0_6, %c0_7, %c0_8] : memref<1x512x128xbf16, #tpu.memory_space<vmem>>, vector<1x512x128xbf16>
    %11 = vector.shape_cast %10 : vector<1x512x128xbf16> to vector<512x128xbf16>
    %12 = vector.shape_cast %9 : vector<512x128xbf16> to vector<1x512x128xbf16>
    tpu.vector_store %arg3[%c0_6, %c0_7, %c0_8], %12 {strides = array<i32>} : memref<1x512x128xbf16, #tpu.memory_space<vmem>>, vector<1x512x128xbf16>,
    return
  }
  func.func @transform_0(%arg0: i32) -> (i32, i32, i32) {
    %c0_i32 = arith.constant 0 : i32
    %c0_i32_0 = arith.constant 0 : i32
    %c0_i32_1 = arith.constant 0 : i32
    return %arg0, %c0_i32, %c0_i32_0 : i32, i32, i32
  }
  func.func @transform_1(%arg0: i32) -> (i32, i32) {
    %c0_i32 = arith.constant 0 : i32
    %c0_i32_0 = arith.constant 0 : i32
    %c0_i32_1 = arith.constant 0 : i32
    return %c0_i32, %c0_i32_0 : i32, i32
  }
  func.func @transform_2(%arg0: i32) -> (i32, i32, i32) {
    %c0_i32 = arith.constant 0 : i32
    %c0_i32_0 = arith.constant 0 : i32
    %c0_i32_1 = arith.constant 0 : i32
    return %arg0, %c0_i32, %c0_i32_0 : i32, i32, i32
  }
}

module attributes {stable_mosaic.version = 11 : i64} {
  func.func @_conv_fused_kernel(%arg0: i32, %arg1: memref<1x256x256xbf16, #tpu.memory_space<vmem>>, %arg2: memref<256x128xbf16, #tpu.memory_space<vmem>>, %arg3: memref<1x256x128xbf16, #tpu.memory_space<vmem>>) attributes {dimension_semantics = [#tpu.dimension_semantics<parallel>], iteration_bounds = array<i64: 2>, scalar_prefetch = 0 : i64, scratch_operands = 0 : i64, tpu.core_type = #tpu.core_type<tc>, window_params = [{transform_indices = @transform_0, window_bounds = array<i64: 1, 256, 256>}, {pipeline_mode = #tpu.pipeline_mode<synchronous>, transform_indices = @transform_1, window_bounds = array<i64: 256, 128>}, {transform_indices = @transform_2, window_bounds = array<i64: 1, 256, 128>}]} {
    %c0 = arith.constant 0 : index
    %c0_0 = arith.constant 0 : index
    %c0_1 = arith.constant 0 : index
    %0 = vector.load %arg1[%c0, %c0_0, %c0_1] : memref<1x256x256xbf16, #tpu.memory_space<vmem>>, vector<1x256x256xbf16>
    %1 = vector.shape_cast %0 : vector<1x256x256xbf16> to vector<256x256xbf16>
    %c0_2 = arith.constant 0 : index
    %c0_3 = arith.constant 0 : index
    %2 = vector.load %arg2[%c0_2, %c0_3] : memref<256x128xbf16, #tpu.memory_space<vmem>>, vector<256x128xbf16>
    %cst = arith.constant dense<0.000000e+00> : vector<256x128xf32>
    %3 = tpu.matmul %1, %2, %cst {dimension_numbers = #tpu.dot_dimension_numbers<[1], [0], [0], [1], [0, 0, 1, 1], [], []>} : vector<256x256xbf16>, vector<256x128xbf16>, vector<256x128xf32> -> vector<256x128xf32>
    %cst_4 = arith.constant dense<0.000000e+00> : vector<128xf32>
    %4 = vector.multi_reduction <add>, %3, %cst_4 [0] : vector<256x128xf32> to vector<128xf32>
    %5 = vector.shape_cast %4 : vector<128xf32> to vector<1x128xf32>
    %6 = arith.mulf %3, %3 : vector<256x128xf32>
    %cst_5 = arith.constant dense<0.000000e+00> : vector<128xf32>
    %7 = vector.multi_reduction <add>, %6, %cst_5 [0] : vector<256x128xf32> to vector<128xf32>
    %8 = vector.shape_cast %7 : vector<128xf32> to vector<1x128xf32>
    %cst_6 = arith.constant 3.906250e-03 : f32
    %9 = vector.broadcast %cst_6 : f32 to vector<1x128xf32>
    %10 = arith.mulf %5, %9 : vector<1x128xf32>
    %cst_7 = arith.constant 3.906250e-03 : f32
    %11 = vector.broadcast %cst_7 : f32 to vector<1x128xf32>
    %12 = arith.mulf %8, %11 : vector<1x128xf32>
    %13 = arith.mulf %10, %10 : vector<1x128xf32>
    %14 = arith.subf %12, %13 : vector<1x128xf32>
    %cst_8 = arith.constant 0.000000e+00 : f32
    %15 = vector.broadcast %cst_8 : f32 to vector<1x128xf32>
    %16 = arith.maximumf %14, %15 : vector<1x128xf32>
    %17 = vector.broadcast %10 : vector<1x128xf32> to vector<256x128xf32>
    %18 = arith.subf %3, %17 : vector<256x128xf32>
    %cst_9 = arith.constant 9.99999974E-6 : f32
    %19 = vector.broadcast %cst_9 : f32 to vector<1x128xf32>
    %20 = arith.addf %16, %19 : vector<1x128xf32>
    %21 = math.rsqrt %20 : vector<1x128xf32>
    %22 = vector.broadcast %21 : vector<1x128xf32> to vector<256x128xf32>
    %23 = arith.mulf %18, %22 : vector<256x128xf32>
    %cst_10 = arith.constant 0.000000e+00 : f32
    %24 = vector.broadcast %cst_10 : f32 to vector<256x128xf32>
    %25 = arith.cmpf oge, %23, %24 : vector<256x128xf32>
    %cst_11 = arith.constant 2.000000e-01 : f32
    %26 = vector.broadcast %cst_11 : f32 to vector<256x128xf32>
    %27 = arith.mulf %26, %23 : vector<256x128xf32>
    %28 = arith.select %25, %23, %27 : vector<256x128xi1>, vector<256x128xf32>
    %29 = arith.truncf %28 : vector<256x128xf32> to vector<256x128xbf16>
    %c0_12 = arith.constant 0 : index
    %c0_13 = arith.constant 0 : index
    %c0_14 = arith.constant 0 : index
    %30 = vector.load %arg3[%c0_12, %c0_13, %c0_14] : memref<1x256x128xbf16, #tpu.memory_space<vmem>>, vector<1x256x128xbf16>
    %31 = vector.shape_cast %30 : vector<1x256x128xbf16> to vector<256x128xbf16>
    %32 = vector.shape_cast %29 : vector<256x128xbf16> to vector<1x256x128xbf16>
    tpu.vector_store %arg3[%c0_12, %c0_13, %c0_14], %32 {strides = array<i32>} : memref<1x256x128xbf16, #tpu.memory_space<vmem>>, vector<1x256x128xbf16>,
    return
  }
  func.func @transform_0(%arg0: i32) -> (i32, i32, i32) {
    %c0_i32 = arith.constant 0 : i32
    %c0_i32_0 = arith.constant 0 : i32
    %c0_i32_1 = arith.constant 0 : i32
    return %arg0, %c0_i32, %c0_i32_0 : i32, i32, i32
  }
  func.func @transform_1(%arg0: i32) -> (i32, i32) {
    %c0_i32 = arith.constant 0 : i32
    %c0_i32_0 = arith.constant 0 : i32
    %c0_i32_1 = arith.constant 0 : i32
    return %c0_i32, %c0_i32_0 : i32, i32
  }
  func.func @transform_2(%arg0: i32) -> (i32, i32, i32) {
    %c0_i32 = arith.constant 0 : i32
    %c0_i32_0 = arith.constant 0 : i32
    %c0_i32_1 = arith.constant 0 : i32
    return %arg0, %c0_i32, %c0_i32_0 : i32, i32, i32
  }
}

module attributes {stable_mosaic.version = 11 : i64} {
  func.func @_conv_fused_kernel(%arg0: i32, %arg1: memref<1x64x512xbf16, #tpu.memory_space<vmem>>, %arg2: memref<512x128xbf16, #tpu.memory_space<vmem>>, %arg3: memref<1x64x128xbf16, #tpu.memory_space<vmem>>) attributes {dimension_semantics = [#tpu.dimension_semantics<parallel>], iteration_bounds = array<i64: 2>, scalar_prefetch = 0 : i64, scratch_operands = 0 : i64, tpu.core_type = #tpu.core_type<tc>, window_params = [{transform_indices = @transform_0, window_bounds = array<i64: 1, 64, 512>}, {pipeline_mode = #tpu.pipeline_mode<synchronous>, transform_indices = @transform_1, window_bounds = array<i64: 512, 128>}, {transform_indices = @transform_2, window_bounds = array<i64: 1, 64, 128>}]} {
    %c0 = arith.constant 0 : index
    %c0_0 = arith.constant 0 : index
    %c0_1 = arith.constant 0 : index
    %0 = vector.load %arg1[%c0, %c0_0, %c0_1] : memref<1x64x512xbf16, #tpu.memory_space<vmem>>, vector<1x64x512xbf16>
    %1 = vector.shape_cast %0 : vector<1x64x512xbf16> to vector<64x512xbf16>
    %c0_2 = arith.constant 0 : index
    %c0_3 = arith.constant 0 : index
    %2 = vector.load %arg2[%c0_2, %c0_3] : memref<512x128xbf16, #tpu.memory_space<vmem>>, vector<512x128xbf16>
    %cst = arith.constant dense<0.000000e+00> : vector<64x128xf32>
    %3 = tpu.matmul %1, %2, %cst {dimension_numbers = #tpu.dot_dimension_numbers<[1], [0], [0], [1], [0, 0, 1, 1], [], []>} : vector<64x512xbf16>, vector<512x128xbf16>, vector<64x128xf32> -> vector<64x128xf32>
    %cst_4 = arith.constant dense<0.000000e+00> : vector<128xf32>
    %4 = vector.multi_reduction <add>, %3, %cst_4 [0] : vector<64x128xf32> to vector<128xf32>
    %5 = vector.shape_cast %4 : vector<128xf32> to vector<1x128xf32>
    %6 = arith.mulf %3, %3 : vector<64x128xf32>
    %cst_5 = arith.constant dense<0.000000e+00> : vector<128xf32>
    %7 = vector.multi_reduction <add>, %6, %cst_5 [0] : vector<64x128xf32> to vector<128xf32>
    %8 = vector.shape_cast %7 : vector<128xf32> to vector<1x128xf32>
    %cst_6 = arith.constant 1.562500e-02 : f32
    %9 = vector.broadcast %cst_6 : f32 to vector<1x128xf32>
    %10 = arith.mulf %5, %9 : vector<1x128xf32>
    %cst_7 = arith.constant 1.562500e-02 : f32
    %11 = vector.broadcast %cst_7 : f32 to vector<1x128xf32>
    %12 = arith.mulf %8, %11 : vector<1x128xf32>
    %13 = arith.mulf %10, %10 : vector<1x128xf32>
    %14 = arith.subf %12, %13 : vector<1x128xf32>
    %cst_8 = arith.constant 0.000000e+00 : f32
    %15 = vector.broadcast %cst_8 : f32 to vector<1x128xf32>
    %16 = arith.maximumf %14, %15 : vector<1x128xf32>
    %17 = vector.broadcast %10 : vector<1x128xf32> to vector<64x128xf32>
    %18 = arith.subf %3, %17 : vector<64x128xf32>
    %cst_9 = arith.constant 9.99999974E-6 : f32
    %19 = vector.broadcast %cst_9 : f32 to vector<1x128xf32>
    %20 = arith.addf %16, %19 : vector<1x128xf32>
    %21 = math.rsqrt %20 : vector<1x128xf32>
    %22 = vector.broadcast %21 : vector<1x128xf32> to vector<64x128xf32>
    %23 = arith.mulf %18, %22 : vector<64x128xf32>
    %cst_10 = arith.constant 0.000000e+00 : f32
    %24 = vector.broadcast %cst_10 : f32 to vector<64x128xf32>
    %25 = arith.cmpf oge, %23, %24 : vector<64x128xf32>
    %cst_11 = arith.constant 2.000000e-01 : f32
    %26 = vector.broadcast %cst_11 : f32 to vector<64x128xf32>
    %27 = arith.mulf %26, %23 : vector<64x128xf32>
    %28 = arith.select %25, %23, %27 : vector<64x128xi1>, vector<64x128xf32>
    %29 = arith.truncf %28 : vector<64x128xf32> to vector<64x128xbf16>
    %c0_12 = arith.constant 0 : index
    %c0_13 = arith.constant 0 : index
    %c0_14 = arith.constant 0 : index
    %30 = vector.load %arg3[%c0_12, %c0_13, %c0_14] : memref<1x64x128xbf16, #tpu.memory_space<vmem>>, vector<1x64x128xbf16>
    %31 = vector.shape_cast %30 : vector<1x64x128xbf16> to vector<64x128xbf16>
    %32 = vector.shape_cast %29 : vector<64x128xbf16> to vector<1x64x128xbf16>
    tpu.vector_store %arg3[%c0_12, %c0_13, %c0_14], %32 {strides = array<i32>} : memref<1x64x128xbf16, #tpu.memory_space<vmem>>, vector<1x64x128xbf16>,
    return
  }
  func.func @transform_0(%arg0: i32) -> (i32, i32, i32) {
    %c0_i32 = arith.constant 0 : i32
    %c0_i32_0 = arith.constant 0 : i32
    %c0_i32_1 = arith.constant 0 : i32
    return %arg0, %c0_i32, %c0_i32_0 : i32, i32, i32
  }
  func.func @transform_1(%arg0: i32) -> (i32, i32) {
    %c0_i32 = arith.constant 0 : i32
    %c0_i32_0 = arith.constant 0 : i32
    %c0_i32_1 = arith.constant 0 : i32
    return %c0_i32, %c0_i32_0 : i32, i32
  }
  func.func @transform_2(%arg0: i32) -> (i32, i32, i32) {
    %c0_i32 = arith.constant 0 : i32
    %c0_i32_0 = arith.constant 0 : i32
    %c0_i32_1 = arith.constant 0 : i32
    return %arg0, %c0_i32, %c0_i32_0 : i32, i32, i32
  }
}

module attributes {stable_mosaic.version = 11 : i64} {
  func.func @_conv_fused_kernel(%arg0: i32, %arg1: memref<1x16x1024xbf16, #tpu.memory_space<vmem>>, %arg2: memref<1024x128xbf16, #tpu.memory_space<vmem>>, %arg3: memref<1x16x128xbf16, #tpu.memory_space<vmem>>) attributes {dimension_semantics = [#tpu.dimension_semantics<parallel>], iteration_bounds = array<i64: 2>, scalar_prefetch = 0 : i64, scratch_operands = 0 : i64, tpu.core_type = #tpu.core_type<tc>, window_params = [{transform_indices = @transform_0, window_bounds = array<i64: 1, 16, 1024>}, {pipeline_mode = #tpu.pipeline_mode<synchronous>, transform_indices = @transform_1, window_bounds = array<i64: 1024, 128>}, {transform_indices = @transform_2, window_bounds = array<i64: 1, 16, 128>}]} {
    %c0 = arith.constant 0 : index
    %c0_0 = arith.constant 0 : index
    %c0_1 = arith.constant 0 : index
    %0 = vector.load %arg1[%c0, %c0_0, %c0_1] : memref<1x16x1024xbf16, #tpu.memory_space<vmem>>, vector<1x16x1024xbf16>
    %1 = vector.shape_cast %0 : vector<1x16x1024xbf16> to vector<16x1024xbf16>
    %c0_2 = arith.constant 0 : index
    %c0_3 = arith.constant 0 : index
    %2 = vector.load %arg2[%c0_2, %c0_3] : memref<1024x128xbf16, #tpu.memory_space<vmem>>, vector<1024x128xbf16>
    %cst = arith.constant dense<0.000000e+00> : vector<16x128xf32>
    %3 = tpu.matmul %1, %2, %cst {dimension_numbers = #tpu.dot_dimension_numbers<[1], [0], [0], [1], [0, 0, 1, 1], [], []>} : vector<16x1024xbf16>, vector<1024x128xbf16>, vector<16x128xf32> -> vector<16x128xf32>
    %cst_4 = arith.constant dense<0.000000e+00> : vector<128xf32>
    %4 = vector.multi_reduction <add>, %3, %cst_4 [0] : vector<16x128xf32> to vector<128xf32>
    %5 = vector.shape_cast %4 : vector<128xf32> to vector<1x128xf32>
    %6 = arith.mulf %3, %3 : vector<16x128xf32>
    %cst_5 = arith.constant dense<0.000000e+00> : vector<128xf32>
    %7 = vector.multi_reduction <add>, %6, %cst_5 [0] : vector<16x128xf32> to vector<128xf32>
    %8 = vector.shape_cast %7 : vector<128xf32> to vector<1x128xf32>
    %cst_6 = arith.constant 6.250000e-02 : f32
    %9 = vector.broadcast %cst_6 : f32 to vector<1x128xf32>
    %10 = arith.mulf %5, %9 : vector<1x128xf32>
    %cst_7 = arith.constant 6.250000e-02 : f32
    %11 = vector.broadcast %cst_7 : f32 to vector<1x128xf32>
    %12 = arith.mulf %8, %11 : vector<1x128xf32>
    %13 = arith.mulf %10, %10 : vector<1x128xf32>
    %14 = arith.subf %12, %13 : vector<1x128xf32>
    %cst_8 = arith.constant 0.000000e+00 : f32
    %15 = vector.broadcast %cst_8 : f32 to vector<1x128xf32>
    %16 = arith.maximumf %14, %15 : vector<1x128xf32>
    %17 = vector.broadcast %10 : vector<1x128xf32> to vector<16x128xf32>
    %18 = arith.subf %3, %17 : vector<16x128xf32>
    %cst_9 = arith.constant 9.99999974E-6 : f32
    %19 = vector.broadcast %cst_9 : f32 to vector<1x128xf32>
    %20 = arith.addf %16, %19 : vector<1x128xf32>
    %21 = math.rsqrt %20 : vector<1x128xf32>
    %22 = vector.broadcast %21 : vector<1x128xf32> to vector<16x128xf32>
    %23 = arith.mulf %18, %22 : vector<16x128xf32>
    %cst_10 = arith.constant 0.000000e+00 : f32
    %24 = vector.broadcast %cst_10 : f32 to vector<16x128xf32>
    %25 = arith.cmpf oge, %23, %24 : vector<16x128xf32>
    %cst_11 = arith.constant 2.000000e-01 : f32
    %26 = vector.broadcast %cst_11 : f32 to vector<16x128xf32>
    %27 = arith.mulf %26, %23 : vector<16x128xf32>
    %28 = arith.select %25, %23, %27 : vector<16x128xi1>, vector<16x128xf32>
    %29 = arith.truncf %28 : vector<16x128xf32> to vector<16x128xbf16>
    %c0_12 = arith.constant 0 : index
    %c0_13 = arith.constant 0 : index
    %c0_14 = arith.constant 0 : index
    %30 = vector.load %arg3[%c0_12, %c0_13, %c0_14] : memref<1x16x128xbf16, #tpu.memory_space<vmem>>, vector<1x16x128xbf16>
    %31 = vector.shape_cast %30 : vector<1x16x128xbf16> to vector<16x128xbf16>
    %32 = vector.shape_cast %29 : vector<16x128xbf16> to vector<1x16x128xbf16>
    tpu.vector_store %arg3[%c0_12, %c0_13, %c0_14], %32 {strides = array<i32>} : memref<1x16x128xbf16, #tpu.memory_space<vmem>>, vector<1x16x128xbf16>,
    return
  }
  func.func @transform_0(%arg0: i32) -> (i32, i32, i32) {
    %c0_i32 = arith.constant 0 : i32
    %c0_i32_0 = arith.constant 0 : i32
    %c0_i32_1 = arith.constant 0 : i32
    return %arg0, %c0_i32, %c0_i32_0 : i32, i32, i32
  }
  func.func @transform_1(%arg0: i32) -> (i32, i32) {
    %c0_i32 = arith.constant 0 : i32
    %c0_i32_0 = arith.constant 0 : i32
    %c0_i32_1 = arith.constant 0 : i32
    return %c0_i32, %c0_i32_0 : i32, i32
  }
  func.func @transform_2(%arg0: i32) -> (i32, i32, i32) {
    %c0_i32 = arith.constant 0 : i32
    %c0_i32_0 = arith.constant 0 : i32
    %c0_i32_1 = arith.constant 0 : i32
    return %arg0, %c0_i32, %c0_i32_0 : i32, i32, i32
  }
}

module attributes {stable_mosaic.version = 11 : i64} {
  func.func @_conv_fused_kernel(%arg0: i32, %arg1: memref<1x24x2048xbf16, #tpu.memory_space<vmem>>, %arg2: memref<2048x128xbf16, #tpu.memory_space<vmem>>, %arg3: memref<1x24x128xf32, #tpu.memory_space<vmem>>) attributes {dimension_semantics = [#tpu.dimension_semantics<parallel>], iteration_bounds = array<i64: 1>, scalar_prefetch = 0 : i64, scratch_operands = 0 : i64, tpu.core_type = #tpu.core_type<tc>, window_params = [{transform_indices = @transform_0, window_bounds = array<i64: 1, 24, 2048>}, {pipeline_mode = #tpu.pipeline_mode<synchronous>, transform_indices = @transform_1, window_bounds = array<i64: 2048, 128>}, {transform_indices = @transform_2, window_bounds = array<i64: 1, 24, 128>}]} {
    %c0 = arith.constant 0 : index
    %c0_0 = arith.constant 0 : index
    %c0_1 = arith.constant 0 : index
    %0 = vector.load %arg1[%c0, %c0_0, %c0_1] : memref<1x24x2048xbf16, #tpu.memory_space<vmem>>, vector<1x24x2048xbf16>
    %1 = vector.shape_cast %0 : vector<1x24x2048xbf16> to vector<24x2048xbf16>
    %c0_2 = arith.constant 0 : index
    %c0_3 = arith.constant 0 : index
    %2 = vector.load %arg2[%c0_2, %c0_3] : memref<2048x128xbf16, #tpu.memory_space<vmem>>, vector<2048x128xbf16>
    %cst = arith.constant dense<0.000000e+00> : vector<24x128xf32>
    %3 = tpu.matmul %1, %2, %cst {dimension_numbers = #tpu.dot_dimension_numbers<[1], [0], [0], [1], [0, 0, 1, 1], [], []>} : vector<24x2048xbf16>, vector<2048x128xbf16>, vector<24x128xf32> -> vector<24x128xf32>
    %c0_4 = arith.constant 0 : index
    %c0_5 = arith.constant 0 : index
    %c0_6 = arith.constant 0 : index
    %4 = vector.load %arg3[%c0_4, %c0_5, %c0_6] : memref<1x24x128xf32, #tpu.memory_space<vmem>>, vector<1x24x128xf32>
    %5 = vector.shape_cast %4 : vector<1x24x128xf32> to vector<24x128xf32>
    %6 = vector.shape_cast %3 : vector<24x128xf32> to vector<1x24x128xf32>
    tpu.vector_store %arg3[%c0_4, %c0_5, %c0_6], %6 {strides = array<i32>} : memref<1x24x128xf32, #tpu.memory_space<vmem>>, vector<1x24x128xf32>,
    return
  }
  func.func @transform_0(%arg0: i32) -> (i32, i32, i32) {
    %c0_i32 = arith.constant 0 : i32
    %c0_i32_0 = arith.constant 0 : i32
    %c0_i32_1 = arith.constant 0 : i32
    return %arg0, %c0_i32, %c0_i32_0 : i32, i32, i32
  }
  func.func @transform_1(%arg0: i32) -> (i32, i32) {
    %c0_i32 = arith.constant 0 : i32
    %c0_i32_0 = arith.constant 0 : i32
    %c0_i32_1 = arith.constant 0 : i32
    return %c0_i32, %c0_i32_0 : i32, i32
  }
  func.func @transform_2(%arg0: i32) -> (i32, i32, i32) {
    %c0_i32 = arith.constant 0 : i32
    %c0_i32_0 = arith.constant 0 : i32
    %c0_i32_1 = arith.constant 0 : i32
    return %arg0, %c0_i32, %c0_i32_0 : i32, i32, i32
  }
}

</mosaic_0001>

<bundles_post_ra>
// kernel: discriminative_forward.5
= control target key start
LH: loop header
LB: loop body
LE: loop exit
PB: predicated region body
PF: predicated region fallthrough
CT: control target
= control target key end

     0   :  { %s1922_s9 = smov 0   ;;  %s2064_s0 = inlined_call_operand.vmem [shape: bf16[4,512,48], index: 0, kind: input, shape index: {}]   ;;  %s2065_s1 = inlined_call_operand.vmem [shape: bf16[48,128], index: 1, kind: input, shape index: {}]   ;;  %s2066_s2 = inlined_call_operand.vmem [shape: bf16[4,512,128], index: 2, kind: output, shape index: {}]  }
   0x1 LB: > { %s1346_s10 = sadd.s32 4294967295, %s1905_s9   ;;  %p1350_p0 = scmp.ge.s32.totalorder %s1905_s9, 1  ;;  %s1905_s9 = sphi %s1922_s9, %s12_s9  }
   0x2   : > { %p112_p1 = scmp.lt.s32.totalorder %s1905_s9, 5 }
   0x4   : > { %p113_p2 = pnand %p1350_p0, %p112_p1 }
   0x5   : > { %p134_p3 = scmp.lt.s32.totalorder (!%p113_p2), %s1346_s10, 3 }
   0x6   : > { %116 = sbr.rel (%p113_p2) target bundleno = 286 (0x11e), region = 28 }
   0xb   : > { %v1864_v0 = vld [vmem:[%s2065_s1 + $0x10] sm:$0xff]   ;;  %v1865_v1 = vld [vmem:[%s2065_s1 + $0x8] sm:$0xff]   ;;  %s2068_s10 = smov (!%p134_p3, %s1346_s10), 3  ;;  %v1866_v2 = vld [vmem:[%s2065_s1] sm:$0xff]   ;;  %vm393_vm0 = vcmask 392192  }
   0xc   : > { %1780 = vmatprep.subr.bf16.mxu0 %v1864_v0  ;;  %1850 = vmatprep.subr.bf16.mxu1 %v1864_v0  ;;  %s1488_s17 = sshll.u32 %s2068_s10, 8 }
   0xd   : > { %1781 = vmatpush3.bf16.msra.mxu0 %v1864_v0  ;;  %1853 = vmatpush3.bf16.msra.mxu1 %v1864_v0  ;;  %s1947_s20 = scalar_lea.vmem %s2064_s0, %s1488_s17  ;;  %s2018_s23 = scalar_lea.vmem %s2066_s2, %s1488_s17 }
   0xe   : > { %1782 = vmatprep.subr.bf16.mxu0 %v1865_v1  ;;  %1851 = vmatprep.subr.bf16.mxu1 %v1865_v1  ;;  %v1867_v3 = vld [vmem:[%s1947_s20] sm:$0xff]   ;;  %v1869_v5 = vld [vmem:[%s1947_s20 + $0x8] sm:$0xff]   ;;  %v1871_v7 = vld [vmem:[%s1947_s20 + $0x10] sm:$0xff]  }
   0xf   : > { %v1868_v4 = vld [vmem:[%s1947_s20 + $0x80] sm:$0xff]   ;;  %1786 = vmatprep.mubr.msk.bf16.mxu0 %vm393_vm0, %v1867_v3  ;;  %v1870_v6 = vld [vmem:[%s1947_s20 + $0x88] sm:$0xff]   ;;  %v1872_v8 = vld [vmem:[%s1947_s20 + $0x90] sm:$0xff]  }
  0x10   : > { %1818 = vmatprep.mubr.msk.bf16.mxu1 %vm393_vm0, %v1868_v4  ;;  %v1873_v9 = vld [vmem:[%s1947_s20 + $0x18] sm:$0xff]   ;;  %v1875_v11 = vld [vmem:[%s1947_s20 + $0x20] sm:$0xff]   ;;  %v1877_v13 = vld [vmem:[%s1947_s20 + $0x28] sm:$0xff]  }
  0x11   : > { %1783 = vmatpush3.bf16.msra.mxu0 %v1865_v1  ;;  %1854 = vmatpush3.bf16.msra.mxu1 %v1865_v1  ;;  %v1874_v10 = vld [vmem:[%s1947_s20 + $0x98] sm:$0xff]   ;;  %v1876_v12 = vld [vmem:[%s1947_s20 + $0xa0] sm:$0xff]   ;;  %v1878_v14 = vld [vmem:[%s1947_s20 + $0xa8] sm:$0xff]  }
  0x12   : > { %1784 = vmatprep.subr.bf16.mxu0 %v1866_v2  ;;  %1852 = vmatprep.subr.bf16.mxu1 %v1866_v2  ;;  %v1879_v15 = vld [vmem:[%s1947_s20 + $0x30] sm:$0xff]   ;;  %v1881_v17 = vld [vmem:[%s1947_s20 + $0x38] sm:$0xff]   ;;  %v1883_v19 = vld [vmem:[%s1947_s20 + $0x40] sm:$0xff]  }
  0x13   : > { %v1880_v16 = vld [vmem:[%s1947_s20 + $0xb0] sm:$0xff]   ;;  %v1882_v18 = vld [vmem:[%s1947_s20 + $0xb8] sm:$0xff]   ;;  %v1884_v20 = vld [vmem:[%s1947_s20 + $0xc0] sm:$0xff]  }
  0x14   : > { %v1885_v21 = vld [vmem:[%s1947_s20 + $0x48] sm:$0xff]   ;;  %v1887_v23 = vld [vmem:[%s1947_s20 + $0x50] sm:$0xff]   ;;  %v1889_v25 = vld [vmem:[%s1947_s20 + $0x58] sm:$0xff]  }
  0x15   : > { %1785 = vmatpush3.bf16.msra.mxu0 %v1866_v2  ;;  %1855 = vmatpush3.bf16.msra.mxu1 %v1866_v2  ;;  %v1886_v22 = vld [vmem:[%s1947_s20 + $0xc8] sm:$0xff]   ;;  %v1888_v24 = vld [vmem:[%s1947_s20 + $0xd0] sm:$0xff]   ;;  %v1890_v26 = vld [vmem:[%s1947_s20 + $0xd8] sm:$0xff]  }
  0x16   : > { %v1891_v27 = vld [vmem:[%s1947_s20 + $0x60] sm:$0xff]   ;;  %v1893_v29 = vld [vmem:[%s1947_s20 + $0x68] sm:$0xff]   ;;  %v1895_v31 = vld [vmem:[%s1947_s20 + $0x70] sm:$0xff]  }
  0x17   : > { %v1892_v28 = vld [vmem:[%s1947_s20 + $0xe0] sm:$0xff]   ;;  %v1894_v30 = vld [vmem:[%s1947_s20 + $0xe8] sm:$0xff]   ;;  %v1896_v32 = vld [vmem:[%s1947_s20 + $0xf0] sm:$0xff]  }
  0x18   : > { %1787 = vmatmul.mubr.msk.bf16.vlgmr.msra.gmra.mxu0 %vm393_vm0, %v1869_v5  ;;  %1819 = vmatmul.mubr.msk.bf16.vlgmr.msra.gmra.mxu1 %vm393_vm0, %v1870_v6  ;;  %v1897_v33 = vld [vmem:[%s1947_s20 + $0x78] sm:$0xff]  }
  0x19   : > { %1790 = vmatprep.mubr.msk.bf16.mxu0 %vm393_vm0, %v1871_v7  ;;  %1822 = vmatprep.mubr.msk.bf16.mxu1 %vm393_vm0, %v1872_v8  ;;  %v1898_v34 = vld [vmem:[%s1947_s20 + $0xf8] sm:$0xff]  }
  0x20   : > { %1791 = vmatmul.mubr.msk.bf16.gmra.mxu0 %vm393_vm0, %v1873_v9  ;;  %1823 = vmatmul.mubr.msk.bf16.gmra.mxu1 %vm393_vm0, %v1874_v10 }
  0x21   : > { %1794 = vmatprep.mubr.msk.bf16.mxu0 %vm393_vm0, %v1875_v11  ;;  %1826 = vmatprep.mubr.msk.bf16.mxu1 %vm393_vm0, %v1876_v12 }
  0x28   : > { %1795 = vmatmul.mubr.msk.bf16.gmra.mxu0 %vm393_vm0, %v1877_v13  ;;  %1827 = vmatmul.mubr.msk.bf16.gmra.mxu1 %vm393_vm0, %v1878_v14 }
  0x29   : > { %1798 = vmatprep.mubr.msk.bf16.mxu0 %vm393_vm0, %v1879_v15  ;;  %1830 = vmatprep.mubr.msk.bf16.mxu1 %vm393_vm0, %v1880_v16 }
  0x30   : > { %1799 = vmatmul.mubr.msk.bf16.gmra.mxu0 %vm393_vm0, %v1881_v17  ;;  %1831 = vmatmul.mubr.msk.bf16.gmra.mxu1 %vm393_vm0, %v1882_v18 }
  0x31   : > { %1802 = vmatprep.mubr.msk.bf16.mxu0 %vm393_vm0, %v1883_v19  ;;  %1834 = vmatprep.mubr.msk.bf16.mxu1 %vm393_vm0, %v1884_v20 }
  0x38   : > { %1803 = vmatmul.mubr.msk.bf16.gmra.mxu0 %vm393_vm0, %v1885_v21  ;;  %1835 = vmatmul.mubr.msk.bf16.gmra.mxu1 %vm393_vm0, %v1886_v22 }
  0x39   : > { %1806 = vmatprep.mubr.msk.bf16.mxu0 %vm393_vm0, %v1887_v23  ;;  %1838 = vmatprep.mubr.msk.bf16.mxu1 %vm393_vm0, %v1888_v24 }
  0x40   : > { %1807 = vmatmul.mubr.msk.bf16.gmra.mxu0 %vm393_vm0, %v1889_v25  ;;  %1839 = vmatmul.mubr.msk.bf16.gmra.mxu1 %vm393_vm0, %v1890_v26 }
  0x41   : > { %1810 = vmatprep.mubr.msk.bf16.mxu0 %vm393_vm0, %v1891_v27  ;;  %1842 = vmatprep.mubr.msk.bf16.mxu1 %vm393_vm0, %v1892_v28 }
  0x48   : > { %1811 = vmatmul.mubr.msk.bf16.gmra.mxu0 %vm393_vm0, %v1893_v29  ;;  %1843 = vmatmul.mubr.msk.bf16.gmra.mxu1 %vm393_vm0, %v1894_v30 }
  0x49   : > { %1814 = vmatprep.mubr.msk.bf16.mxu0 %vm393_vm0, %v1895_v31  ;;  %1846 = vmatprep.mubr.msk.bf16.mxu1 %vm393_vm0, %v1896_v32 }
  0x50   : > { %1815 = vmatmul.mubr.msk.bf16.gmra.mxu0 %vm393_vm0, %v1897_v33  ;;  %1847 = vmatmul.mubr.msk.bf16.gmra.mxu1 %vm393_vm0, %v1898_v34 }
  0xd8   : > { %v1788_v35 = vpop.f32.mrf.mxu0  ;;  %v1820_v36 = vpop.f32.mrf.mxu1 }
  0xd9   : > { %vm781_vm1 = vcmp.ge.f32.partialorder %v1788_v35, 0.0  ;;  %v845_v37 = vmul.f32 0.2, %v1788_v35  ;;  %v877_v38 = vmul.f32 0.2, %v1820_v36  ;;  %vm813_vm2 = vcmp.ge.f32.partialorder %v1820_v36, 0.0 }
  0xda   : > { %v524_v39 = vpop.f32.mrf.mxu0  ;;  %v652_v40 = vpop.f32.mrf.mxu1 }
  0xdb   : > { %v909_v41 = vsel %vm781_vm1, %v1788_v35, %v845_v37  ;;  %v843_v42 = vmul.f32 0.2, %v524_v39  ;;  %vm779_vm3 = vcmp.ge.f32.partialorder %v524_v39, 0.0  ;;  %v941_v46 = vsel %vm813_vm2, %v1820_v36, %v877_v38 }
  0xdc   : > { %v1789_v43 = vpop.f32.mrf.mxu0  ;;  %v1821_v44 = vpop.f32.mrf.mxu1  ;;  %vm811_vm6 = vcmp.ge.f32.partialorder %v652_v40, 0.0  ;;  %v875_v47 = vmul.f32 0.2, %v652_v40 }
  0xdd   : > { %vm782_vm4 = vcmp.ge.f32.partialorder %v1789_v43, 0.0  ;;  %v846_v45 = vmul.f32 0.2, %v1789_v43  ;;  %vm814_vm5 = vcmp.ge.f32.partialorder %v1821_v44, 0.0  ;;  %v878_v48 = vmul.f32 0.2, %v1821_v44 }
  0xde   : > { %v527_v49 = vpop.f32.mrf.mxu0  ;;  %v655_v50 = vpop.f32.mrf.mxu1  ;;  %v907_v53 = vsel %vm779_vm3, %v524_v39, %v843_v42  ;;  %v939_v62 = vsel %vm811_vm6, %v652_v40, %v875_v47 }
  0xdf   : > { %v910_v51 = vsel %vm782_vm4, %v1789_v43, %v846_v45  ;;  %vm780_vm7 = vcmp.ge.f32.partialorder %v527_v49, 0.0  ;;  %v844_v52 = vmul.f32 0.2, %v527_v49  ;;  %vm812_vm8 = vcmp.ge.f32.partialorder %v655_v50, 0.0 }
  0xe0   : > { %v1562_v54 = vpack.c.bf16 %v910_v51, %v909_v41  ;;  %v942_v55 = vsel %vm814_vm5, %v1821_v44, %v878_v48  ;;  %v876_v56 = vmul.f32 0.2, %v655_v50  ;;  %v1792_v57 = vpop.f32.mrf.mxu0  ;;  %v1824_v58 = vpop.f32.mrf.mxu1 }
  0xe1   : > { %v1642_v59 = vpack.c.bf16 %v942_v55, %v941_v46  ;;  %v908_v60 = vsel %vm780_vm7, %v527_v49, %v844_v52  ;;  %vm785_vm9 = vcmp.ge.f32.partialorder %v1792_v57, 0.0  ;;  %v849_v61 = vmul.f32 0.2, %v1792_v57 }
  0xe2   : > { %1714 = vst [vmem:[%s2018_s23 + $0x8] sm:$0xff] %v1562_v54   ;;  %v1557_v63 = vpack.c.bf16 %v908_v60, %v907_v53  ;;  %v940_v0 = vsel %vm812_vm8, %v655_v50, %v876_v56  ;;  %v881_v1 = vmul.f32 0.2, %v1824_v58  ;;  %v540_v2 = vpop.f32.mrf.mxu0  ;;  %v668_v3 = vpop.f32.mrf.mxu1  ;;  %vm817_vm10 = vcmp.ge.f32.partialorder %v1824_v58, 0.0 }
  0xe3   : > { %1730 = vst [vmem:[%s2018_s23 + $0x88] sm:$0xff] %v1642_v59   ;;  %v1637_v4 = vpack.c.bf16 %v940_v0, %v939_v62  ;;  %v913_v5 = vsel %vm785_vm9, %v1792_v57, %v849_v61  ;;  %v847_v6 = vmul.f32 0.2, %v540_v2  ;;  %vm783_vm11 = vcmp.ge.f32.partialorder %v540_v2, 0.0 }
  0xe4   : > { %1558 = vst [vmem:[%s2018_s23] sm:$0xff] %v1557_v63   ;;  %v1793_v7 = vpop.f32.mrf.mxu0  ;;  %v1825_v8 = vpop.f32.mrf.mxu1  ;;  %v945_v10 = vsel %vm817_vm10, %v1824_v58, %v881_v1  ;;  %vm815_vm14 = vcmp.ge.f32.partialorder %v668_v3, 0.0  ;;  %v879_v11 = vmul.f32 0.2, %v668_v3 }
  0xe5   : > { %1729 = vst [vmem:[%s2018_s23 + $0x80] sm:$0xff] %v1637_v4   ;;  %vm786_vm12 = vcmp.ge.f32.partialorder %v1793_v7, 0.0  ;;  %v850_v9 = vmul.f32 0.2, %v1793_v7  ;;  %vm818_vm13 = vcmp.ge.f32.partialorder %v1825_v8, 0.0  ;;  %v911_v17 = vsel %vm783_vm11, %v540_v2, %v847_v6 }
  0xe6   : > { %v882_v12 = vmul.f32 0.2, %v1825_v8  ;;  %v543_v13 = vpop.f32.mrf.mxu0  ;;  %v671_v14 = vpop.f32.mrf.mxu1  ;;  %v943_v26 = vsel %vm815_vm14, %v668_v3, %v879_v11 }
  0xe7   : > { %v914_v15 = vsel %vm786_vm12, %v1793_v7, %v850_v9  ;;  %vm784_vm15 = vcmp.ge.f32.partialorder %v543_v13, 0.0  ;;  %v848_v16 = vmul.f32 0.2, %v543_v13  ;;  %vm816_vm0 = vcmp.ge.f32.partialorder %v671_v14, 0.0 }
  0xe8   : > { %v1572_v18 = vpack.c.bf16 %v914_v15, %v913_v5  ;;  %v946_v19 = vsel %vm818_vm13, %v1825_v8, %v882_v12  ;;  %v880_v20 = vmul.f32 0.2, %v671_v14  ;;  %v1796_v21 = vpop.f32.mrf.mxu0  ;;  %v1828_v22 = vpop.f32.mrf.mxu1 }
  0xe9   : > { %v1652_v23 = vpack.c.bf16 %v946_v19, %v945_v10  ;;  %v912_v24 = vsel %vm784_vm15, %v543_v13, %v848_v16  ;;  %vm789_vm1 = vcmp.ge.f32.partialorder %v1796_v21, 0.0  ;;  %v853_v25 = vmul.f32 0.2, %v1796_v21 }
  0xea   : > { %1716 = vst [vmem:[%s2018_s23 + $0x18] sm:$0xff] %v1572_v18   ;;  %v1567_v27 = vpack.c.bf16 %v912_v24, %v911_v17  ;;  %v944_v28 = vsel %vm816_vm0, %v671_v14, %v880_v20  ;;  %v885_v29 = vmul.f32 0.2, %v1828_v22  ;;  %v556_v30 = vpop.f32.mrf.mxu0  ;;  %v684_v31 = vpop.f32.mrf.mxu1  ;;  %vm821_vm2 = vcmp.ge.f32.partialorder %v1828_v22, 0.0 }
  0xeb   : > { %1732 = vst [vmem:[%s2018_s23 + $0x98] sm:$0xff] %v1652_v23   ;;  %v1647_v32 = vpack.c.bf16 %v944_v28, %v943_v26  ;;  %v917_v33 = vsel %vm789_vm1, %v1796_v21, %v853_v25  ;;  %v851_v34 = vmul.f32 0.2, %v556_v30  ;;  %vm787_vm3 = vcmp.ge.f32.partialorder %v556_v30, 0.0 }
  0xec   : > { %1715 = vst [vmem:[%s2018_s23 + $0x10] sm:$0xff] %v1567_v27   ;;  %v1797_v35 = vpop.f32.mrf.mxu0  ;;  %v1829_v36 = vpop.f32.mrf.mxu1  ;;  %v949_v38 = vsel %vm821_vm2, %v1828_v22, %v885_v29  ;;  %vm819_vm6 = vcmp.ge.f32.partialorder %v684_v31, 0.0  ;;  %v883_v39 = vmul.f32 0.2, %v684_v31 }
  0xed   : > { %1731 = vst [vmem:[%s2018_s23 + $0x90] sm:$0xff] %v1647_v32   ;;  %vm790_vm4 = vcmp.ge.f32.partialorder %v1797_v35, 0.0  ;;  %v854_v37 = vmul.f32 0.2, %v1797_v35  ;;  %vm822_vm5 = vcmp.ge.f32.partialorder %v1829_v36, 0.0  ;;  %v915_v45 = vsel %vm787_vm3, %v556_v30, %v851_v34 }
  0xee   : > { %v886_v40 = vmul.f32 0.2, %v1829_v36  ;;  %v559_v41 = vpop.f32.mrf.mxu0  ;;  %v687_v42 = vpop.f32.mrf.mxu1  ;;  %v947_v54 = vsel %vm819_vm6, %v684_v31, %v883_v39 }
  0xef   : > { %v918_v43 = vsel %vm790_vm4, %v1797_v35, %v854_v37  ;;  %vm788_vm7 = vcmp.ge.f32.partialorder %v559_v41, 0.0  ;;  %v852_v44 = vmul.f32 0.2, %v559_v41  ;;  %vm820_vm8 = vcmp.ge.f32.partialorder %v687_v42, 0.0 }
  0xf0   : > { %v1582_v46 = vpack.c.bf16 %v918_v43, %v917_v33  ;;  %v950_v47 = vsel %vm822_vm5, %v1829_v36, %v886_v40  ;;  %v884_v48 = vmul.f32 0.2, %v687_v42  ;;  %v1800_v49 = vpop.f32.mrf.mxu0  ;;  %v1832_v50 = vpop.f32.mrf.mxu1 }
  0xf1   : > { %v1662_v51 = vpack.c.bf16 %v950_v47, %v949_v38  ;;  %v916_v52 = vsel %vm788_vm7, %v559_v41, %v852_v44  ;;  %vm793_vm9 = vcmp.ge.f32.partialorder %v1800_v49, 0.0  ;;  %v857_v53 = vmul.f32 0.2, %v1800_v49 }
  0xf2   : > { %1718 = vst [vmem:[%s2018_s23 + $0x28] sm:$0xff] %v1582_v46   ;;  %v1577_v55 = vpack.c.bf16 %v916_v52, %v915_v45  ;;  %v948_v56 = vsel %vm820_vm8, %v687_v42, %v884_v48  ;;  %v889_v57 = vmul.f32 0.2, %v1832_v50  ;;  %v572_v58 = vpop.f32.mrf.mxu0  ;;  %v700_v59 = vpop.f32.mrf.mxu1  ;;  %vm825_vm10 = vcmp.ge.f32.partialorder %v1832_v50, 0.0 }
  0xf3   : > { %1734 = vst [vmem:[%s2018_s23 + $0xa8] sm:$0xff] %v1662_v51   ;;  %v1657_v60 = vpack.c.bf16 %v948_v56, %v947_v54  ;;  %v921_v61 = vsel %vm793_vm9, %v1800_v49, %v857_v53  ;;  %v855_v62 = vmul.f32 0.2, %v572_v58  ;;  %vm791_vm11 = vcmp.ge.f32.partialorder %v572_v58, 0.0 }
  0xf4   : > { %1717 = vst [vmem:[%s2018_s23 + $0x20] sm:$0xff] %v1577_v55   ;;  %v1801_v63 = vpop.f32.mrf.mxu0  ;;  %v1833_v0 = vpop.f32.mrf.mxu1  ;;  %v953_v2 = vsel %vm825_vm10, %v1832_v50, %v889_v57  ;;  %vm823_vm14 = vcmp.ge.f32.partialorder %v700_v59, 0.0  ;;  %v887_v3 = vmul.f32 0.2, %v700_v59 }
  0xf5   : > { %1733 = vst [vmem:[%s2018_s23 + $0xa0] sm:$0xff] %v1657_v60   ;;  %vm794_vm12 = vcmp.ge.f32.partialorder %v1801_v63, 0.0  ;;  %v858_v1 = vmul.f32 0.2, %v1801_v63  ;;  %vm826_vm13 = vcmp.ge.f32.partialorder %v1833_v0, 0.0  ;;  %v919_v9 = vsel %vm791_vm11, %v572_v58, %v855_v62 }
  0xf6   : > { %v890_v4 = vmul.f32 0.2, %v1833_v0  ;;  %v575_v5 = vpop.f32.mrf.mxu0  ;;  %v703_v6 = vpop.f32.mrf.mxu1  ;;  %v951_v18 = vsel %vm823_vm14, %v700_v59, %v887_v3 }
  0xf7   : > { %v922_v7 = vsel %vm794_vm12, %v1801_v63, %v858_v1  ;;  %vm792_vm15 = vcmp.ge.f32.partialorder %v575_v5, 0.0  ;;  %v856_v8 = vmul.f32 0.2, %v575_v5  ;;  %vm824_vm0 = vcmp.ge.f32.partialorder %v703_v6, 0.0 }
  0xf8   : > { %v1592_v10 = vpack.c.bf16 %v922_v7, %v921_v61  ;;  %v954_v11 = vsel %vm826_vm13, %v1833_v0, %v890_v4  ;;  %v888_v12 = vmul.f32 0.2, %v703_v6  ;;  %v1804_v13 = vpop.f32.mrf.mxu0  ;;  %v1836_v14 = vpop.f32.mrf.mxu1 }
  0xf9   : > { %v1672_v15 = vpack.c.bf16 %v954_v11, %v953_v2  ;;  %v920_v16 = vsel %vm792_vm15, %v575_v5, %v856_v8  ;;  %vm797_vm1 = vcmp.ge.f32.partialorder %v1804_v13, 0.0  ;;  %v861_v17 = vmul.f32 0.2, %v1804_v13 }
  0xfa   : > { %1720 = vst [vmem:[%s2018_s23 + $0x38] sm:$0xff] %v1592_v10   ;;  %v1587_v19 = vpack.c.bf16 %v920_v16, %v919_v9  ;;  %v952_v20 = vsel %vm824_vm0, %v703_v6, %v888_v12  ;;  %v893_v21 = vmul.f32 0.2, %v1836_v14  ;;  %v588_v22 = vpop.f32.mrf.mxu0  ;;  %v716_v23 = vpop.f32.mrf.mxu1  ;;  %vm829_vm2 = vcmp.ge.f32.partialorder %v1836_v14, 0.0 }
  0xfb   : > { %1736 = vst [vmem:[%s2018_s23 + $0xb8] sm:$0xff] %v1672_v15   ;;  %v1667_v24 = vpack.c.bf16 %v952_v20, %v951_v18  ;;  %v925_v25 = vsel %vm797_vm1, %v1804_v13, %v861_v17  ;;  %v859_v26 = vmul.f32 0.2, %v588_v22  ;;  %vm795_vm3 = vcmp.ge.f32.partialorder %v588_v22, 0.0 }
  0xfc   : > { %1719 = vst [vmem:[%s2018_s23 + $0x30] sm:$0xff] %v1587_v19   ;;  %v1805_v27 = vpop.f32.mrf.mxu0  ;;  %v1837_v28 = vpop.f32.mrf.mxu1  ;;  %v957_v30 = vsel %vm829_vm2, %v1836_v14, %v893_v21  ;;  %vm827_vm6 = vcmp.ge.f32.partialorder %v716_v23, 0.0  ;;  %v891_v31 = vmul.f32 0.2, %v716_v23 }
  0xfd   : > { %1735 = vst [vmem:[%s2018_s23 + $0xb0] sm:$0xff] %v1667_v24   ;;  %vm798_vm4 = vcmp.ge.f32.partialorder %v1805_v27, 0.0  ;;  %v862_v29 = vmul.f32 0.2, %v1805_v27  ;;  %vm830_vm5 = vcmp.ge.f32.partialorder %v1837_v28, 0.0  ;;  %v923_v37 = vsel %vm795_vm3, %v588_v22, %v859_v26 }
  0xfe   : > { %v894_v32 = vmul.f32 0.2, %v1837_v28  ;;  %v591_v33 = vpop.f32.mrf.mxu0  ;;  %v719_v34 = vpop.f32.mrf.mxu1  ;;  %v955_v46 = vsel %vm827_vm6, %v716_v23, %v891_v31 }
  0xff   : > { %v926_v35 = vsel %vm798_vm4, %v1805_v27, %v862_v29  ;;  %vm796_vm7 = vcmp.ge.f32.partialorder %v591_v33, 0.0  ;;  %v860_v36 = vmul.f32 0.2, %v591_v33  ;;  %vm828_vm8 = vcmp.ge.f32.partialorder %v719_v34, 0.0 }
 0x100   : > { %v1602_v38 = vpack.c.bf16 %v926_v35, %v925_v25  ;;  %v958_v39 = vsel %vm830_vm5, %v1837_v28, %v894_v32  ;;  %v892_v40 = vmul.f32 0.2, %v719_v34  ;;  %v1808_v41 = vpop.f32.mrf.mxu0  ;;  %v1840_v42 = vpop.f32.mrf.mxu1 }
 0x101   : > { %v1682_v43 = vpack.c.bf16 %v958_v39, %v957_v30  ;;  %v924_v44 = vsel %vm796_vm7, %v591_v33, %v860_v36  ;;  %vm801_vm9 = vcmp.ge.f32.partialorder %v1808_v41, 0.0  ;;  %v865_v45 = vmul.f32 0.2, %v1808_v41 }
 0x102   : > { %1722 = vst [vmem:[%s2018_s23 + $0x48] sm:$0xff] %v1602_v38   ;;  %v1597_v47 = vpack.c.bf16 %v924_v44, %v923_v37  ;;  %v956_v48 = vsel %vm828_vm8, %v719_v34, %v892_v40  ;;  %v897_v49 = vmul.f32 0.2, %v1840_v42  ;;  %v604_v50 = vpop.f32.mrf.mxu0  ;;  %v732_v51 = vpop.f32.mrf.mxu1  ;;  %vm833_vm10 = vcmp.ge.f32.partialorder %v1840_v42, 0.0 }
 0x103   : > { %1738 = vst [vmem:[%s2018_s23 + $0xc8] sm:$0xff] %v1682_v43   ;;  %v1677_v52 = vpack.c.bf16 %v956_v48, %v955_v46  ;;  %v929_v53 = vsel %vm801_vm9, %v1808_v41, %v865_v45  ;;  %v863_v54 = vmul.f32 0.2, %v604_v50  ;;  %vm799_vm11 = vcmp.ge.f32.partialorder %v604_v50, 0.0 }
 0x104   : > { %1721 = vst [vmem:[%s2018_s23 + $0x40] sm:$0xff] %v1597_v47   ;;  %v1809_v55 = vpop.f32.mrf.mxu0  ;;  %v1841_v56 = vpop.f32.mrf.mxu1  ;;  %v961_v58 = vsel %vm833_vm10, %v1840_v42, %v897_v49  ;;  %vm831_vm14 = vcmp.ge.f32.partialorder %v732_v51, 0.0  ;;  %v895_v59 = vmul.f32 0.2, %v732_v51 }
 0x105   : > { %1737 = vst [vmem:[%s2018_s23 + $0xc0] sm:$0xff] %v1677_v52   ;;  %vm802_vm12 = vcmp.ge.f32.partialorder %v1809_v55, 0.0  ;;  %v866_v57 = vmul.f32 0.2, %v1809_v55  ;;  %vm834_vm13 = vcmp.ge.f32.partialorder %v1841_v56, 0.0  ;;  %v927_v1 = vsel %vm799_vm11, %v604_v50, %v863_v54 }
 0x106   : > { %v898_v60 = vmul.f32 0.2, %v1841_v56  ;;  %v607_v61 = vpop.f32.mrf.mxu0  ;;  %v735_v62 = vpop.f32.mrf.mxu1  ;;  %v959_v10 = vsel %vm831_vm14, %v732_v51, %v895_v59 }
 0x107   : > { %v930_v63 = vsel %vm802_vm12, %v1809_v55, %v866_v57  ;;  %vm800_vm15 = vcmp.ge.f32.partialorder %v607_v61, 0.0  ;;  %v864_v0 = vmul.f32 0.2, %v607_v61  ;;  %vm832_vm0 = vcmp.ge.f32.partialorder %v735_v62, 0.0 }
 0x108   : > { %v1612_v2 = vpack.c.bf16 %v930_v63, %v929_v53  ;;  %v962_v3 = vsel %vm834_vm13, %v1841_v56, %v898_v60  ;;  %v896_v4 = vmul.f32 0.2, %v735_v62  ;;  %v1812_v5 = vpop.f32.mrf.mxu0  ;;  %v1844_v6 = vpop.f32.mrf.mxu1 }
 0x109   : > { %v1692_v7 = vpack.c.bf16 %v962_v3, %v961_v58  ;;  %v928_v8 = vsel %vm800_vm15, %v607_v61, %v864_v0  ;;  %vm805_vm1 = vcmp.ge.f32.partialorder %v1812_v5, 0.0  ;;  %v869_v9 = vmul.f32 0.2, %v1812_v5 }
 0x10a   : > { %1724 = vst [vmem:[%s2018_s23 + $0x58] sm:$0xff] %v1612_v2   ;;  %v1607_v11 = vpack.c.bf16 %v928_v8, %v927_v1  ;;  %v960_v12 = vsel %vm832_vm0, %v735_v62, %v896_v4  ;;  %v901_v13 = vmul.f32 0.2, %v1844_v6  ;;  %v620_v14 = vpop.f32.mrf.mxu0  ;;  %v748_v15 = vpop.f32.mrf.mxu1  ;;  %vm837_vm2 = vcmp.ge.f32.partialorder %v1844_v6, 0.0 }
 0x10b   : > { %1740 = vst [vmem:[%s2018_s23 + $0xd8] sm:$0xff] %v1692_v7   ;;  %v1687_v16 = vpack.c.bf16 %v960_v12, %v959_v10  ;;  %v933_v17 = vsel %vm805_vm1, %v1812_v5, %v869_v9  ;;  %v867_v18 = vmul.f32 0.2, %v620_v14  ;;  %vm803_vm3 = vcmp.ge.f32.partialorder %v620_v14, 0.0 }
 0x10c   : > { %1723 = vst [vmem:[%s2018_s23 + $0x50] sm:$0xff] %v1607_v11   ;;  %v1813_v19 = vpop.f32.mrf.mxu0  ;;  %v1845_v20 = vpop.f32.mrf.mxu1  ;;  %v965_v22 = vsel %vm837_vm2, %v1844_v6, %v901_v13  ;;  %vm835_vm6 = vcmp.ge.f32.partialorder %v748_v15, 0.0  ;;  %v899_v23 = vmul.f32 0.2, %v748_v15 }
 0x10d   : > { %1739 = vst [vmem:[%s2018_s23 + $0xd0] sm:$0xff] %v1687_v16   ;;  %vm806_vm4 = vcmp.ge.f32.partialorder %v1813_v19, 0.0  ;;  %v870_v21 = vmul.f32 0.2, %v1813_v19  ;;  %vm838_vm5 = vcmp.ge.f32.partialorder %v1845_v20, 0.0  ;;  %v931_v29 = vsel %vm803_vm3, %v620_v14, %v867_v18 }
 0x10e   : > { %v902_v24 = vmul.f32 0.2, %v1845_v20  ;;  %v623_v25 = vpop.f32.mrf.mxu0  ;;  %v751_v26 = vpop.f32.mrf.mxu1  ;;  %v963_v38 = vsel %vm835_vm6, %v748_v15, %v899_v23 }
 0x10f   : > { %v934_v27 = vsel %vm806_vm4, %v1813_v19, %v870_v21  ;;  %vm804_vm7 = vcmp.ge.f32.partialorder %v623_v25, 0.0  ;;  %v868_v28 = vmul.f32 0.2, %v623_v25  ;;  %vm836_vm8 = vcmp.ge.f32.partialorder %v751_v26, 0.0 }
 0x110   : > { %v1622_v30 = vpack.c.bf16 %v934_v27, %v933_v17  ;;  %v966_v31 = vsel %vm838_vm5, %v1845_v20, %v902_v24  ;;  %v900_v32 = vmul.f32 0.2, %v751_v26  ;;  %v1816_v33 = vpop.f32.mrf.mxu0  ;;  %v1848_v34 = vpop.f32.mrf.mxu1 }
 0x111   : > { %v1702_v35 = vpack.c.bf16 %v966_v31, %v965_v22  ;;  %v932_v36 = vsel %vm804_vm7, %v623_v25, %v868_v28  ;;  %vm809_vm9 = vcmp.ge.f32.partialorder %v1816_v33, 0.0  ;;  %v873_v37 = vmul.f32 0.2, %v1816_v33 }
 0x112   : > { %1726 = vst [vmem:[%s2018_s23 + $0x68] sm:$0xff] %v1622_v30   ;;  %v1617_v39 = vpack.c.bf16 %v932_v36, %v931_v29  ;;  %v964_v40 = vsel %vm836_vm8, %v751_v26, %v900_v32  ;;  %v636_v41 = vpop.f32.mrf.mxu0  ;;  %v764_v42 = vpop.f32.mrf.mxu1  ;;  %vm841_vm10 = vcmp.ge.f32.partialorder %v1848_v34, 0.0  ;;  %v905_v45 = vmul.f32 0.2, %v1848_v34 }
 0x113   : > { %1742 = vst [vmem:[%s2018_s23 + $0xe8] sm:$0xff] %v1702_v35   ;;  %v1697_v43 = vpack.c.bf16 %v964_v40, %v963_v38  ;;  %v937_v44 = vsel %vm809_vm9, %v1816_v33, %v873_v37  ;;  %v871_v48 = vmul.f32 0.2, %v636_v41  ;;  %vm807_vm13 = vcmp.ge.f32.partialorder %v636_v41, 0.0 }
 0x114   : > { %1725 = vst [vmem:[%s2018_s23 + $0x60] sm:$0xff] %v1617_v39   ;;  %v1817_v46 = vpop.f32.mrf.mxu0  ;;  %v1849_v47 = vpop.f32.mrf.mxu1  ;;  %vm839_vm14 = vcmp.ge.f32.partialorder %v764_v42, 0.0  ;;  %v903_v50 = vmul.f32 0.2, %v764_v42  ;;  %v969_v56 = vsel %vm841_vm10, %v1848_v34, %v905_v45 }
 0x115   : > { %1741 = vst [vmem:[%s2018_s23 + $0xe0] sm:$0xff] %v1697_v43   ;;  %vm810_vm11 = vcmp.ge.f32.partialorder %v1817_v46, 0.0  ;;  %v874_v49 = vmul.f32 0.2, %v1817_v46  ;;  %vm842_vm12 = vcmp.ge.f32.partialorder %v1849_v47, 0.0  ;;  %v935_v60 = vsel %vm807_vm13, %v636_v41, %v871_v48 }
 0x116   : > { %v906_v51 = vmul.f32 0.2, %v1849_v47  ;;  %v639_v52 = vpop.f32.mrf.mxu0  ;;  %v767_v53 = vpop.f32.mrf.mxu1  ;;  %v967_v63 = vsel %vm839_vm14, %v764_v42, %v903_v50 }
 0x117   : > { %v938_v54 = vsel %vm810_vm11, %v1817_v46, %v874_v49  ;;  %vm808_vm15 = vcmp.ge.f32.partialorder %v639_v52, 0.0  ;;  %v872_v55 = vmul.f32 0.2, %v639_v52  ;;  %vm840_vm0 = vcmp.ge.f32.partialorder %v767_v53, 0.0 }
 0x118   : > { %v1632_v57 = vpack.c.bf16 %v938_v54, %v937_v44  ;;  %v970_v58 = vsel %vm842_vm12, %v1849_v47, %v906_v51  ;;  %v904_v59 = vmul.f32 0.2, %v767_v53 }
 0x119   : > { %v1712_v61 = vpack.c.bf16 %v970_v58, %v969_v56  ;;  %v936_v62 = vsel %vm808_vm15, %v639_v52, %v872_v55 }
 0x11a   : > { %1728 = vst [vmem:[%s2018_s23 + $0x78] sm:$0xff] %v1632_v57   ;;  %v1627_v0 = vpack.c.bf16 %v936_v62, %v935_v60  ;;  %v968_v1 = vsel %vm840_vm0, %v767_v53, %v904_v59 }
 0x11b   : > { %1744 = vst [vmem:[%s2018_s23 + $0xf8] sm:$0xff] %v1712_v61   ;;  %v1707_v2 = vpack.c.bf16 %v968_v1, %v967_v63 }
 0x11c   : > { %1727 = vst [vmem:[%s2018_s23 + $0x70] sm:$0xff] %v1627_v0  }
 0x11d   : > { %1743 = vst [vmem:[%s2018_s23 + $0xf0] sm:$0xff] %v1707_v2  }
 0x11e PF: > { %s12_s9 = sadd.s32 1, %s1905_s9  }
 0x11f   : > { %p9_p4 = scmp.ge.s32.totalorder %s12_s9, 6  }
 0x121   :  { %11 = sbr.rel (!%p9_p4) target bundleno = 1 (0x1), region = 58 }

// kernel: discriminative_forward.6
= control target key start
LH: loop header
LB: loop body
LE: loop exit
PB: predicated region body
PF: predicated region fallthrough
CT: control target
= control target key end

     0   :  { %s1559_s9 = smov 0   ;;  %s2210_s0 = inlined_call_operand.vmem [shape: bf16[2,256,256], index: 0, kind: input, shape index: {}]   ;;  %s2211_s1 = inlined_call_operand.vmem [shape: bf16[256,128], index: 1, kind: input, shape index: {}]   ;;  %s2212_s2 = inlined_call_operand.vmem [shape: bf16[2,256,128], index: 2, kind: output, shape index: {}]  }
   0x1 LB: > { %s1114_s10 = sadd.s32 4294967295, %s1542_s9   ;;  %p1118_p0 = scmp.ge.s32.totalorder %s1542_s9, 1  ;;  %s1542_s9 = sphi %s1559_s9, %s12_s9  }
   0x2   : > { %p112_p1 = scmp.lt.s32.totalorder %s1542_s9, 3 }
   0x4   : > { %p113_p2 = pnand %p1118_p0, %p112_p1 }
   0x5   : > { %p134_p3 = scmp.lt.s32.totalorder (!%p113_p2), %s1114_s10, 1 }
   0x6   : > { %116 = sbr.rel (%p113_p2) target bundleno = 413 (0x19d), region = 28 }
   0xb   : > { %v1470_v0 = vld [vmem:[%s2211_s1 + $0x78] sm:$0xff]   ;;  %v1472_v2 = vld [vmem:[%s2211_s1 + $0x70] sm:$0xff]   ;;  %v1474_v4 = vld [vmem:[%s2211_s1 + $0x68] sm:$0xff]   ;;  %s2228_s10 = smov (!%p134_p3, %s1114_s10), 1 }
   0xc   : > { %v1471_v1 = vld [vmem:[%s2211_s1 + $0x38] sm:$0xff]   ;;  %1334 = vmatprep.subr.bf16.mxu0 %v1470_v0  ;;  %1446 = vmatprep.subr.bf16.mxu1 %v1470_v0  ;;  %v1473_v3 = vld [vmem:[%s2211_s1 + $0x30] sm:$0xff]   ;;  %v1475_v5 = vld [vmem:[%s2211_s1 + $0x28] sm:$0xff]   ;;  %s1205_s27 = sshll.u32 %s2228_s10, 8  ;;  %s1206_s21 = sshll.u32 %s2228_s10, 7 }
   0xd   : > { %1335 = vmatpush3.bf16.msra.mxu0 %v1471_v1  ;;  %1454 = vmatpush3.bf16.msra.mxu1 %v1471_v1  ;;  %v1476_v6 = vld [vmem:[%s2211_s1 + $0x60] sm:$0xff]   ;;  %v1478_v8 = vld [vmem:[%s2211_s1 + $0x58] sm:$0xff]   ;;  %s1600_s4 = scalar_lea.vmem %s2210_s0, %s1205_s27  ;;  %v1480_v10 = vld [vmem:[%s2211_s1 + $0x50] sm:$0xff]   ;;  %s2169_s23 = scalar_lea.vmem %s2212_s2, %s1206_s21 }
   0xe   : > { %1336 = vmatprep.subr.bf16.mxu0 %v1472_v2  ;;  %1447 = vmatprep.subr.bf16.mxu1 %v1472_v2  ;;  %v1477_v7 = vld [vmem:[%s2211_s1 + $0x20] sm:$0xff]   ;;  %v1479_v9 = vld [vmem:[%s2211_s1 + $0x18] sm:$0xff]   ;;  %v1481_v12 = vld [vmem:[%s2211_s1 + $0x10] sm:$0xff]  }
   0xf   : > { %v1488_v11 = vld [vmem:[%s1600_s4 + $0x4] ss:$8 sps:$4 sm:$0xff]   ;;  %v1486_v18 = vld [vmem:[%s1600_s4] ss:$8 sps:$4 sm:$0xff]   ;;  %v1489_v19 = vld [vmem:[%s1600_s4 + $0x14] ss:$8 sps:$4 sm:$0xff]  }
  0x10   : > { %497 = vmatprep.mubr.bf16.mxu0 %v1488_v11  ;;  %v1482_v13 = vld [vmem:[%s2211_s1 + $0x48] sm:$0xff]   ;;  %v1484_v16 = vld [vmem:[%s2211_s1 + $0x40] sm:$0xff]   ;;  %v1504_v21 = vld [vmem:[%s1600_s4 + $0x94] ss:$8 sps:$4 sm:$0xff]  }
  0x11   : > { %1337 = vmatpush3.bf16.msra.mxu0 %v1473_v3  ;;  %1455 = vmatpush3.bf16.msra.mxu1 %v1473_v3  ;;  %v1500_v14 = vld [vmem:[%s1600_s4 + $0x84] ss:$8 sps:$4 sm:$0xff]   ;;  %v1498_v20 = vld [vmem:[%s1600_s4 + $0x80] ss:$8 sps:$4 sm:$0xff]   ;;  %v1491_v22 = vld [vmem:[%s1600_s4 + $0x10] ss:$8 sps:$4 sm:$0xff]  }
  0x12   : > { %1338 = vmatprep.subr.bf16.mxu0 %v1474_v4  ;;  %1448 = vmatprep.subr.bf16.mxu1 %v1474_v4  ;;  %v1483_v15 = vld [vmem:[%s2211_s1 + $0x8] sm:$0xff]   ;;  %v1485_v17 = vld [vmem:[%s2211_s1] sm:$0xff]   ;;  %v1506_v24 = vld [vmem:[%s1600_s4 + $0x90] ss:$8 sps:$4 sm:$0xff]  }
  0x13   : > { %561 = vmatprep.mubr.bf16.mxu1 %v1500_v14  ;;  %v1492_v23 = vld [vmem:[%s1600_s4 + $0x24] ss:$8 sps:$4 sm:$0xff]   ;;  %v1494_v26 = vld [vmem:[%s1600_s4 + $0x20] ss:$8 sps:$4 sm:$0xff]   ;;  %v1495_v27 = vld [vmem:[%s1600_s4 + $0x34] ss:$8 sps:$4 sm:$0xff]  }
  0x14   : > { %v1510_v25 = vld [vmem:[%s1600_s4 + $0xa4] ss:$8 sps:$4 sm:$0xff]   ;;  %v1512_v28 = vld [vmem:[%s1600_s4 + $0xa0] ss:$8 sps:$4 sm:$0xff]   ;;  %v1516_v29 = vld [vmem:[%s1600_s4 + $0xb4] ss:$8 sps:$4 sm:$0xff]  }
  0x15   : > { %1339 = vmatpush3.bf16.msra.mxu0 %v1475_v5  ;;  %1456 = vmatpush3.bf16.msra.mxu1 %v1475_v5  ;;  %v1497_v30 = vld [vmem:[%s1600_s4 + $0x30] ss:$8 sps:$4 sm:$0xff]   ;;  %v1501_v31 = vld [vmem:[%s1600_s4 + $0x44] ss:$8 sps:$4 sm:$0xff]   ;;  %v1503_v34 = vld [vmem:[%s1600_s4 + $0x40] ss:$8 sps:$4 sm:$0xff]  }
  0x16   : > { %1340 = vmatprep.subr.bf16.mxu0 %v1476_v6  ;;  %1449 = vmatprep.subr.bf16.mxu1 %v1476_v6  ;;  %v1518_v32 = vld [vmem:[%s1600_s4 + $0xb0] ss:$8 sps:$4 sm:$0xff]   ;;  %v1522_v33 = vld [vmem:[%s1600_s4 + $0xc4] ss:$8 sps:$4 sm:$0xff]   ;;  %v1507_v35 = vld [vmem:[%s1600_s4 + $0x54] ss:$8 sps:$4 sm:$0xff]  }
  0x17   : > { %v1524_v36 = vld [vmem:[%s1600_s4 + $0xc0] ss:$8 sps:$4 sm:$0xff]   ;;  %v1525_v37 = vld [vmem:[%s1600_s4 + $0xd4] ss:$8 sps:$4 sm:$0xff]   ;;  %v1509_v38 = vld [vmem:[%s1600_s4 + $0x50] ss:$8 sps:$4 sm:$0xff]  }
  0x18   : > { %v1513_v39 = vld [vmem:[%s1600_s4 + $0x64] ss:$8 sps:$4 sm:$0xff]   ;;  %v1527_v40 = vld [vmem:[%s1600_s4 + $0xd0] ss:$8 sps:$4 sm:$0xff]   ;;  %v1515_v42 = vld [vmem:[%s1600_s4 + $0x60] ss:$8 sps:$4 sm:$0xff]  }
  0x19   : > { %1341 = vmatpush3.bf16.msra.mxu0 %v1477_v7  ;;  %1457 = vmatpush3.bf16.msra.mxu1 %v1477_v7  ;;  %v1528_v41 = vld [vmem:[%s1600_s4 + $0xe4] ss:$8 sps:$4 sm:$0xff]   ;;  %v1519_v43 = vld [vmem:[%s1600_s4 + $0x74] ss:$8 sps:$4 sm:$0xff]   ;;  %v1530_v44 = vld [vmem:[%s1600_s4 + $0xe0] ss:$8 sps:$4 sm:$0xff]  }
  0x1a   : > { %1342 = vmatprep.subr.bf16.mxu0 %v1478_v8  ;;  %1450 = vmatprep.subr.bf16.mxu1 %v1478_v8  ;;  %v1531_v45 = vld [vmem:[%s1600_s4 + $0xf4] ss:$8 sps:$4 sm:$0xff]   ;;  %v1521_v46 = vld [vmem:[%s1600_s4 + $0x70] ss:$8 sps:$4 sm:$0xff]  }
  0x1b   : > { %v1533_v47 = vld [vmem:[%s1600_s4 + $0xf0] ss:$8 sps:$4 sm:$0xff]  }
  0x1d   : > { %1343 = vmatpush3.bf16.msra.mxu0 %v1479_v9  ;;  %1458 = vmatpush3.bf16.msra.mxu1 %v1479_v9 }
  0x1e   : > { %1344 = vmatprep.subr.bf16.mxu0 %v1480_v10  ;;  %1451 = vmatprep.subr.bf16.mxu1 %v1480_v10 }
  0x21   : > { %1345 = vmatpush3.bf16.msra.mxu0 %v1481_v12  ;;  %1459 = vmatpush3.bf16.msra.mxu1 %v1481_v12 }
  0x22   : > { %1346 = vmatprep.subr.bf16.mxu0 %v1482_v13  ;;  %1452 = vmatprep.subr.bf16.mxu1 %v1482_v13 }
  0x25   : > { %1347 = vmatpush3.bf16.msra.mxu0 %v1483_v15  ;;  %1460 = vmatpush3.bf16.msra.mxu1 %v1483_v15 }
  0x26   : > { %1348 = vmatprep.subr.bf16.mxu0 %v1484_v16  ;;  %1453 = vmatprep.subr.bf16.mxu1 %v1484_v16 }
  0x29   : > { %1349 = vmatpush3.bf16.msra.mxu0 %v1485_v17  ;;  %1461 = vmatpush3.bf16.msra.mxu1 %v1485_v17 }
  0x2c   : > { %498 = vmatmul.mubr.bf16.vlgmr.msra.gmra.mxu0 %v1486_v18  ;;  %562 = vmatmul.mubr.bf16.vlgmr.msra.gmra.mxu1 %v1498_v20 }
  0x2d   : > { %505 = vmatprep.mubr.bf16.mxu0 %v1489_v19  ;;  %569 = vmatprep.mubr.bf16.mxu1 %v1504_v21 }
  0x34   : > { %506 = vmatmul.mubr.bf16.gmra.mxu0 %v1491_v22  ;;  %570 = vmatmul.mubr.bf16.gmra.mxu1 %v1506_v24 }
  0x35   : > { %513 = vmatprep.mubr.bf16.mxu0 %v1492_v23  ;;  %577 = vmatprep.mubr.bf16.mxu1 %v1510_v25 }
  0x3c   : > { %514 = vmatmul.mubr.bf16.gmra.mxu0 %v1494_v26  ;;  %578 = vmatmul.mubr.bf16.gmra.mxu1 %v1512_v28 }
  0x3d   : > { %521 = vmatprep.mubr.bf16.mxu0 %v1495_v27  ;;  %585 = vmatprep.mubr.bf16.mxu1 %v1516_v29 }
  0x44   : > { %522 = vmatmul.mubr.bf16.gmra.mxu0 %v1497_v30  ;;  %586 = vmatmul.mubr.bf16.gmra.mxu1 %v1518_v32 }
  0x45   : > { %529 = vmatprep.mubr.bf16.mxu0 %v1501_v31  ;;  %593 = vmatprep.mubr.bf16.mxu1 %v1522_v33 }
  0x4c   : > { %530 = vmatmul.mubr.bf16.gmra.mxu0 %v1503_v34  ;;  %594 = vmatmul.mubr.bf16.gmra.mxu1 %v1524_v36 }
  0x4d   : > { %537 = vmatprep.mubr.bf16.mxu0 %v1507_v35  ;;  %601 = vmatprep.mubr.bf16.mxu1 %v1525_v37 }
  0x54   : > { %538 = vmatmul.mubr.bf16.gmra.mxu0 %v1509_v38  ;;  %602 = vmatmul.mubr.bf16.gmra.mxu1 %v1527_v40 }
  0x55   : > { %545 = vmatprep.mubr.bf16.mxu0 %v1513_v39  ;;  %609 = vmatprep.mubr.bf16.mxu1 %v1528_v41 }
  0x5c   : > { %546 = vmatmul.mubr.bf16.gmra.mxu0 %v1515_v42  ;;  %610 = vmatmul.mubr.bf16.gmra.mxu1 %v1530_v44 }
  0x5d   : > { %553 = vmatprep.mubr.bf16.mxu0 %v1519_v43  ;;  %617 = vmatprep.mubr.bf16.mxu1 %v1531_v45 }
  0x64   : > { %554 = vmatmul.mubr.bf16.gmra.mxu0 %v1521_v46  ;;  %618 = vmatmul.mubr.bf16.gmra.mxu1 %v1533_v47 }
  0xec   : > { %v1350_v48 = vpop.f32.mrf.mxu0  ;;  %v1655_v49 = vpop.f32.mrf.mxu1 }
  0xee   : > { %v1351_v50 = vpop.f32.mrf.mxu0  ;;  %v1657_v51 = vpop.f32.mrf.mxu1 }
  0xef   : > { %v1689_v18 = vadd.f32 %v1351_v50, %v1350_v48 }
  0xf0   : > { %v1353_v52 = vpop.f32.mrf.mxu0  ;;  %v1659_v53 = vpop.f32.mrf.mxu1 }
  0xf1   : > { %v663_v26 = vmul.f32 %v1689_v18, %v1689_v18 }
  0xf2   : > { %v1354_v54 = vpop.f32.mrf.mxu0  ;;  %v1661_v55 = vpop.f32.mrf.mxu1 }
  0xf3   : > { %v1685_v15 = vadd.f32 %v1354_v54, %v1353_v52 }
  0xf4   : > { %v1356_v56 = vpop.f32.mrf.mxu0  ;;  %v1663_v57 = vpop.f32.mrf.mxu1 }
  0xf5   : > { %v664_v22 = vmul.f32 %v1685_v15, %v1685_v15  ;;  %v626_v27 = vadd.f32 %v1685_v15, %v1689_v18 }
  0xf6   : > { %v1357_v58 = vpop.f32.mrf.mxu0  ;;  %v1665_v59 = vpop.f32.mrf.mxu1 }
  0xf7   : > { %v1691_v19 = vadd.f32 %v1357_v58, %v1356_v56  ;;  %v695_v32 = vadd.f32 %v664_v22, %v663_v26 }
  0xf8   : > { %v1359_v60 = vpop.f32.mrf.mxu0  ;;  %v1667_v61 = vpop.f32.mrf.mxu1 }
  0xf9   : > { %v665_v28 = vmul.f32 %v1691_v19, %v1691_v19  ;;  %v627_v33 = vadd.f32 %v1691_v19, %v626_v27 }
  0xfa   : > { %v1360_v62 = vpop.f32.mrf.mxu0  ;;  %v1669_v63 = vpop.f32.mrf.mxu1 }
  0xfb   : > { %v1697_v23 = vadd.f32 %v1360_v62, %v1359_v60  ;;  %v696_v37 = vadd.f32 %v695_v32, %v665_v28 }
  0xfc   : > { %v1362_v0 = vpop.f32.mrf.mxu0  ;;  %v1671_v1 = vpop.f32.mrf.mxu1 }
  0xfd   : > { %v666_v34 = vmul.f32 %v1697_v23, %v1697_v23  ;;  %v628_v38 = vadd.f32 %v1697_v23, %v627_v33 }
  0xfe   : > { %v1363_v2 = vpop.f32.mrf.mxu0  ;;  %v1673_v3 = vpop.f32.mrf.mxu1 }
  0xff   : > { %v1707_v29 = vadd.f32 %v1363_v2, %v1362_v0  ;;  %v697_v43 = vadd.f32 %v696_v37, %v666_v34 }
 0x100   : > { %v1365_v4 = vpop.f32.mrf.mxu0  ;;  %v1675_v5 = vpop.f32.mrf.mxu1 }
 0x101   : > { %v667_v39 = vmul.f32 %v1707_v29, %v1707_v29  ;;  %v629_v44 = vadd.f32 %v1707_v29, %v628_v38 }
 0x102   : > { %v1366_v6 = vpop.f32.mrf.mxu0  ;;  %v1677_v7 = vpop.f32.mrf.mxu1 }
 0x103   : > { %v1714_v35 = vadd.f32 %v1366_v6, %v1365_v4  ;;  %v698_v48 = vadd.f32 %v697_v43, %v667_v39 }
 0x104   : > { %v1368_v8 = vpop.f32.mrf.mxu0  ;;  %v1679_v9 = vpop.f32.mrf.mxu1 }
 0x105   : > { %v668_v45 = vmul.f32 %v1714_v35, %v1714_v35  ;;  %v630_v50 = vadd.f32 %v1714_v35, %v629_v44 }
 0x106   : > { %v1369_v10 = vpop.f32.mrf.mxu0  ;;  %v1681_v11 = vpop.f32.mrf.mxu1 }
 0x107   : > { %v1719_v40 = vadd.f32 %v1369_v10, %v1368_v8  ;;  %v699_v60 = vadd.f32 %v698_v48, %v668_v45 }
 0x108   : > { %v1371_v12 = vpop.f32.mrf.mxu0  ;;  %v1683_v13 = vpop.f32.mrf.mxu1 }
 0x109   : > { %v669_v52 = vmul.f32 %v1719_v40, %v1719_v40  ;;  %v631_v62 = vadd.f32 %v1719_v40, %v630_v50 }
 0x10a   : > { %v1372_v14 = vpop.f32.mrf.mxu0  ;;  %v1687_v16 = vpop.f32.mrf.mxu1 }
 0x10b   : > { %v1726_v46 = vadd.f32 %v1372_v14, %v1371_v12  ;;  %v700_v6 = vadd.f32 %v699_v60, %v669_v52 }
 0x10c   : > { %v1374_v17 = vpop.f32.mrf.mxu0  ;;  %v1693_v20 = vpop.f32.mrf.mxu1 }
 0x10d   : > { %v670_v0 = vmul.f32 %v1726_v46, %v1726_v46  ;;  %v632_v8 = vadd.f32 %v1726_v46, %v631_v62 }
 0x10e   : > { %v1375_v21 = vpop.f32.mrf.mxu0  ;;  %v1699_v24 = vpop.f32.mrf.mxu1 }
 0x10f   : > { %v1731_v54 = vadd.f32 %v1375_v21, %v1374_v17  ;;  %v701_v21 = vadd.f32 %v700_v6, %v670_v0 }
 0x110   : > { %v1377_v25 = vpop.f32.mrf.mxu0  ;;  %v1709_v31 = vpop.f32.mrf.mxu1 }
 0x111   : > { %v671_v10 = vmul.f32 %v1731_v54, %v1731_v54  ;;  %v633_v22 = vadd.f32 %v1731_v54, %v632_v8 }
 0x112   : > { %v1378_v30 = vpop.f32.mrf.mxu0  ;;  %v1721_v42 = vpop.f32.mrf.mxu1 }
 0x113   : > { %v1738_v2 = vadd.f32 %v1378_v30, %v1377_v25  ;;  %v702_v28 = vadd.f32 %v701_v21, %v671_v10  ;;  %v1779_v21 = vadd.f32 %v1657_v51, %v1655_v49  ;;  %v1795_v51 = vadd.f32 %v1665_v59, %v1663_v57 }
 0x114   : > { %v1380_v36 = vpop.f32.mrf.mxu0  ;;  %v1733_v58 = vpop.f32.mrf.mxu1  ;;  %v1809_v57 = vadd.f32 %v1673_v3, %v1671_v1  ;;  %v1823_v1 = vadd.f32 %v1681_v11, %v1679_v9  ;;  %v1837_v9 = vadd.f32 %v1699_v24, %v1693_v20 }
 0x115   : > { %v672_v26 = vmul.f32 %v1738_v2, %v1738_v2  ;;  %v634_v30 = vadd.f32 %v1738_v2, %v633_v22  ;;  %v679_v49 = vmul.f32 %v1779_v21, %v1779_v21 }
 0x116   : > { %v1381_v41 = vpop.f32.mrf.mxu0  ;;  %v1745_v17 = vpop.f32.mrf.mxu1 }
 0x117   : > { %v1743_v12 = vadd.f32 %v1381_v41, %v1380_v36  ;;  %v703_v37 = vadd.f32 %v702_v28, %v672_v26  ;;  %v1786_v28 = vadd.f32 %v1661_v55, %v1659_v53  ;;  %v1802_v55 = vadd.f32 %v1669_v63, %v1667_v61 }
 0x118   : > { %v1383_v47 = vpop.f32.mrf.mxu0  ;;  %v1757_v36 = vpop.f32.mrf.mxu1  ;;  %v1816_v61 = vadd.f32 %v1677_v7, %v1675_v5  ;;  %v1830_v5 = vadd.f32 %v1687_v16, %v1683_v13  ;;  %v1844_v13 = vadd.f32 %v1721_v42, %v1709_v31 }
 0x119   : > { %v673_v32 = vmul.f32 %v1743_v12, %v1743_v12  ;;  %v635_v38 = vadd.f32 %v1743_v12, %v634_v30  ;;  %v680_v53 = vmul.f32 %v1786_v28, %v1786_v28 }
 0x11a   : > { %v1384_v56 = vpop.f32.mrf.mxu0  ;;  %v1767_v50 = vpop.f32.mrf.mxu1  ;;  %v688_v31 = vmul.f32 %v1844_v13, %v1844_v13 }
 0x11b   : > { %v1750_v25 = vadd.f32 %v1384_v56, %v1383_v47  ;;  %v704_v44 = vadd.f32 %v703_v37, %v673_v32 }
 0x11c   : > { %v1386_v4 = vpop.f32.mrf.mxu0 }
 0x11d   : > { %v674_v39 = vmul.f32 %v1750_v25, %v1750_v25  ;;  %v636_v45 = vadd.f32 %v1750_v25, %v635_v38 }
 0x11e   : > { %v1387_v14 = vpop.f32.mrf.mxu0 }
 0x11f   : > { %v1755_v33 = vadd.f32 %v1387_v14, %v1386_v4  ;;  %v705_v52 = vadd.f32 %v704_v44, %v674_v39  ;;  %v1434_v14 = vpop.f32.mrf.mxu1 }
 0x120   : > { %v1389_v27 = vpop.f32.mrf.mxu0 }
 0x121   : > { %v675_v47 = vmul.f32 %v1755_v33, %v1755_v33  ;;  %v637_v56 = vadd.f32 %v1755_v33, %v636_v45  ;;  %v1435_v37 = vpop.f32.mrf.mxu1 }
 0x122   : > { %v1390_v34 = vpop.f32.mrf.mxu0 }
 0x123   : > { %v1762_v41 = vadd.f32 %v1390_v34, %v1389_v27  ;;  %v706_v4 = vadd.f32 %v705_v52, %v675_v47  ;;  %v1437_v45 = vpop.f32.mrf.mxu1  ;;  %v681_v47 = vmul.f32 %v1795_v51, %v1795_v51  ;;  %v682_v52 = vmul.f32 %v1802_v55, %v1802_v55 }
 0x124   : > { %v1392_v43 = vpop.f32.mrf.mxu0 }
 0x125   : > { %v676_v60 = vmul.f32 %v1762_v41, %v1762_v41  ;;  %v638_v6 = vadd.f32 %v1762_v41, %v637_v56 }
 0x126   : > { %v1393_v48 = vpop.f32.mrf.mxu0 }
 0x127   : > { %v1772_v62 = vadd.f32 %v1393_v48, %v1392_v43  ;;  %v707_v22 = vadd.f32 %v706_v4, %v676_v60  ;;  %v1438_v60 = vpop.f32.mrf.mxu1 }
 0x128   : > { %v1395_v0 = vpop.f32.mrf.mxu0 }
 0x129   : > { %v677_v8 = vmul.f32 %v1772_v62, %v1772_v62  ;;  %v639_v26 = vadd.f32 %v1772_v62, %v638_v6  ;;  %v684_v6 = vmul.f32 %v1816_v61, %v1816_v61 }
 0x12a   : > { %v1396_v10 = vpop.f32.mrf.mxu0 }
 0x12b   : > { %v1782_v27 = vadd.f32 %v1396_v10, %v1395_v0  ;;  %v708_v30 = vadd.f32 %v707_v22, %v677_v8  ;;  %v683_v0 = vmul.f32 %v1809_v57, %v1809_v57  ;;  %v1440_v10 = vpop.f32.mrf.mxu1  ;;  %v685_v22 = vmul.f32 %v1823_v1, %v1823_v1 }
 0x12d   : > { %v640_v32 = vadd.f32 %v1782_v27, %v639_v26  ;;  %v678_v34 = vmul.f32 %v1782_v27, %v1782_v27 }
 0x12f   : > { %v641_v38 = vadd.f32 %v1779_v21, %v640_v32  ;;  %v709_v39 = vadd.f32 %v708_v30, %v678_v34  ;;  %v686_v30 = vmul.f32 %v1830_v5, %v1830_v5  ;;  %v1441_v34 = vpop.f32.mrf.mxu1 }
 0x131   : > { %v642_v43 = vadd.f32 %v1786_v28, %v641_v38  ;;  %v710_v44 = vadd.f32 %v709_v39, %v679_v49  ;;  %v687_v49 = vmul.f32 %v1837_v9, %v1837_v9  ;;  %v1852_v38 = vadd.f32 %v1745_v17, %v1733_v58 }
 0x133   : > { %v643_v59 = vadd.f32 %v1795_v51, %v642_v43  ;;  %v711_v48 = vadd.f32 %v710_v44, %v680_v53  ;;  %v1859_v53 = vadd.f32 %v1767_v50, %v1757_v36  ;;  %v1443_v43 = vpop.f32.mrf.mxu1 }
 0x135   : > { %v644_v63 = vadd.f32 %v1802_v55, %v643_v59  ;;  %v712_v56 = vadd.f32 %v711_v48, %v681_v47  ;;  %v689_v59 = vmul.f32 %v1852_v38, %v1852_v38  ;;  %v1864_v48 = vadd.f32 %v1435_v37, %v1434_v14 }
 0x137   : > { %v713_v3 = vadd.f32 %v712_v56, %v682_v52  ;;  %v645_v4 = vadd.f32 %v1809_v57, %v644_v63  ;;  %v690_v52 = vmul.f32 %v1859_v53, %v1859_v53  ;;  %v1869_v63 = vadd.f32 %v1438_v60, %v1437_v45  ;;  %v1444_v56 = vpop.f32.mrf.mxu1 }
 0x139   : > { %v646_v7 = vadd.f32 %v1816_v61, %v645_v4  ;;  %v714_v8 = vadd.f32 %v713_v3, %v683_v0  ;;  %v691_v0 = vmul.f32 %v1864_v48, %v1864_v48  ;;  %v1874_v3 = vadd.f32 %v1441_v34, %v1440_v10 }
 0x13a   : > { %v692_v37 = vmul.f32 %v1869_v63, %v1869_v63 }
 0x13b   : > { %v647_v11 = vadd.f32 %v1823_v1, %v646_v7  ;;  %v715_v26 = vadd.f32 %v714_v8, %v684_v6  ;;  %v1879_v6 = vadd.f32 %v1444_v56, %v1443_v43  ;;  %v693_v60 = vmul.f32 %v1874_v3, %v1874_v3 }
 0x13d   : > { %v648_v16 = vadd.f32 %v1830_v5, %v647_v11  ;;  %v716_v32 = vadd.f32 %v715_v26, %v685_v22  ;;  %v694_v10 = vmul.f32 %v1879_v6, %v1879_v6 }
 0x13f   : > { %v649_v20 = vadd.f32 %v1837_v9, %v648_v16  ;;  %v717_v24 = vadd.f32 %v716_v32, %v686_v30 }
 0x141   : > { %v650_v39 = vadd.f32 %v1844_v13, %v649_v20  ;;  %v718_v42 = vadd.f32 %v717_v24, %v687_v49 }
 0x143   : > { %v719_v44 = vadd.f32 %v718_v42, %v688_v31  ;;  %v651_v47 = vadd.f32 %v1852_v38, %v650_v39 }
 0x145   : > { %v720_v58 = vadd.f32 %v719_v44, %v689_v59  ;;  %v652_v17 = vadd.f32 %v1859_v53, %v651_v47 }
 0x147   : > { %v721_v36 = vadd.f32 %v720_v58, %v690_v52  ;;  %v653_v50 = vadd.f32 %v1864_v48, %v652_v17 }
 0x149   : > { %v722_v4 = vadd.f32 %v721_v36, %v691_v0  ;;  %v654_v14 = vadd.f32 %v1869_v63, %v653_v50 }
 0x14b   : > { %v723_v7 = vadd.f32 %v722_v4, %v692_v37  ;;  %v655_v45 = vadd.f32 %v1874_v3, %v654_v14 }
 0x14d   : > { %v724_v8 = vadd.f32 %v723_v7, %v693_v60  ;;  %v656_v22 = vadd.f32 %v1879_v6, %v655_v45 }
 0x14f   : > { %v657_v11 = vrot.slane %v656_v22, 4  ;;  %v725_v26 = vadd.f32 %v724_v8, %v694_v10 }
 0x151   : > { %v658_v30 = vadd.f32 %v657_v11, %v656_v22  ;;  %v726_v16 = vrot.slane %v725_v26, 4 }
 0x153   : > { %v659_v32 = vrot.slane %v658_v30, 2  ;;  %v727_v34 = vadd.f32 %v726_v16, %v725_v26 }
 0x155   : > { %v660_v49 = vadd.f32 %v659_v32, %v658_v30  ;;  %v728_v20 = vrot.slane %v727_v34, 2 }
 0x157   : > { %v661_v24 = vrot.slane %v660_v49, 1  ;;  %v729_v39 = vadd.f32 %v728_v20, %v727_v34 }
 0x159   : > { %v662_v31 = vadd.f32 %v661_v24, %v660_v49  ;;  %v730_v42 = vrot.slane %v729_v39, 1 }
 0x15b   : > { %v731_v43 = vadd.f32 %v730_v42, %v729_v39  ;;  %v1887_v44 = vmul.f32 0.00390625, %v662_v31 }
 0x15d   : > { %v733_v47 = vmul.f32 0.00390625, %v731_v43  ;;  %v734_v59 = vmul.f32 %v1887_v44, %v1887_v44  ;;  %v737_v56 = vsub.f32 %v1689_v18, %v1887_v44  ;;  %v738_v36 = vsub.f32 %v1685_v15, %v1887_v44 }
 0x15e   : > { %v739_v50 = vsub.f32 %v1691_v19, %v1887_v44  ;;  %v740_v0 = vsub.f32 %v1697_v23, %v1887_v44  ;;  %v741_v4 = vsub.f32 %v1707_v29, %v1887_v44  ;;  %v742_v14 = vsub.f32 %v1714_v35, %v1887_v44 }
 0x15f   : > { %v735_v58 = vsub.f32 %v733_v47, %v734_v59  ;;  %v743_v37 = vsub.f32 %v1719_v40, %v1887_v44  ;;  %v744_v18 = vsub.f32 %v1726_v46, %v1887_v44  ;;  %v745_v15 = vsub.f32 %v1731_v54, %v1887_v44 }
 0x160   : > { %v746_v19 = vsub.f32 %v1738_v2, %v1887_v44  ;;  %v747_v23 = vsub.f32 %v1743_v12, %v1887_v44  ;;  %v748_v29 = vsub.f32 %v1750_v25, %v1887_v44  ;;  %v749_v35 = vsub.f32 %v1755_v33, %v1887_v44 }
 0x161   : > { %v736_v17 = vmax.f32 %v735_v58, 0.0  ;;  %v750_v40 = vsub.f32 %v1762_v41, %v1887_v44  ;;  %v751_v46 = vsub.f32 %v1772_v62, %v1887_v44  ;;  %v752_v54 = vsub.f32 %v1782_v27, %v1887_v44 }
 0x162   : > { %v753_v2 = vsub.f32 %v1779_v21, %v1887_v44  ;;  %v754_v12 = vsub.f32 %v1786_v28, %v1887_v44  ;;  %v755_v25 = vsub.f32 %v1795_v51, %v1887_v44  ;;  %v756_v33 = vsub.f32 %v1802_v55, %v1887_v44 }
 0x163   : > { %v769_v52 = vadd.f32 1e-05, %v736_v17  ;;  %v757_v41 = vsub.f32 %v1809_v57, %v1887_v44  ;;  %v758_v62 = vsub.f32 %v1816_v61, %v1887_v44  ;;  %v759_v27 = vsub.f32 %v1823_v1, %v1887_v44 }
 0x164   : > { %v760_v21 = vsub.f32 %v1830_v5, %v1887_v44  ;;  %v761_v28 = vsub.f32 %v1837_v9, %v1887_v44  ;;  %v762_v51 = vsub.f32 %v1844_v13, %v1887_v44  ;;  %v763_v55 = vsub.f32 %v1852_v38, %v1887_v44 }
 0x165   : > { %1534 = vrsqrt.f32 %v769_v52  ;;  %v764_v57 = vsub.f32 %v1859_v53, %v1887_v44  ;;  %v765_v61 = vsub.f32 %v1864_v48, %v1887_v44  ;;  %v766_v1 = vsub.f32 %v1869_v63, %v1887_v44 }
 0x166   : > { %v767_v5 = vsub.f32 %v1874_v3, %v1887_v44  ;;  %v768_v9 = vsub.f32 %v1879_v6, %v1887_v44 }
 0x172   : > { %v1535_v7 = vpop.eup %1534 }
 0x173   : > { %v1955_v45 = vmul.f32 %v1535_v7, %v737_v56  ;;  %v1957_v13 = vmul.f32 %v1535_v7, %v738_v36  ;;  %v1959_v38 = vmul.f32 %v1535_v7, %v739_v50  ;;  %v1961_v60 = vmul.f32 %v1535_v7, %v740_v0 }
 0x174   : > { %v1963_v53 = vmul.f32 %v1535_v7, %v741_v4  ;;  %v1965_v48 = vmul.f32 %v1535_v7, %v742_v14  ;;  %v1967_v8 = vmul.f32 %v1535_v7, %v743_v37  ;;  %v1969_v63 = vmul.f32 %v1535_v7, %v744_v18 }
 0x175   : > { %v1971_v3 = vmul.f32 %v1535_v7, %v745_v15  ;;  %v1973_v22 = vmul.f32 %v1535_v7, %v746_v19  ;;  %v1975_v6 = vmul.f32 %v1535_v7, %v747_v23  ;;  %v1977_v10 = vmul.f32 %v1535_v7, %v748_v29 }
 0x176   : > { %v1979_v11 = vmul.f32 %v1535_v7, %v749_v35  ;;  %v1981_v26 = vmul.f32 %v1535_v7, %v750_v40  ;;  %v1983_v30 = vmul.f32 %v1535_v7, %v751_v46  ;;  %v1985_v16 = vmul.f32 %v1535_v7, %v752_v54 }
 0x177   : > { %v1987_v32 = vmul.f32 %v1535_v7, %v753_v2  ;;  %v1989_v34 = vmul.f32 %v1535_v7, %v754_v12  ;;  %v1991_v49 = vmul.f32 %v1535_v7, %v755_v25  ;;  %v1993_v20 = vmul.f32 %v1535_v7, %v756_v33 }
 0x178   : > { %v1995_v24 = vmul.f32 %v1535_v7, %v757_v41  ;;  %v1997_v39 = vmul.f32 %v1535_v7, %v758_v62  ;;  %v1999_v31 = vmul.f32 %v1535_v7, %v759_v27  ;;  %v2001_v42 = vmul.f32 %v1535_v7, %v760_v21 }
 0x179   : > { %v2003_v43 = vmul.f32 %v1535_v7, %v761_v28  ;;  %v2005_v44 = vmul.f32 %v1535_v7, %v762_v51  ;;  %v2007_v47 = vmul.f32 %v1535_v7, %v763_v55  ;;  %v2009_v59 = vmul.f32 %v1535_v7, %v764_v57 }
 0x17a   : > { %v2011_v58 = vmul.f32 %v1535_v7, %v765_v61  ;;  %v2013_v17 = vmul.f32 %v1535_v7, %v766_v1  ;;  %vm803_vm0 = vcmp.ge.f32.partialorder %v1955_v45, 0.0  ;;  %vm804_vm1 = vcmp.ge.f32.partialorder %v1957_v13, 0.0 }
 0x17b   : > { %vm805_vm2 = vcmp.ge.f32.partialorder %v1959_v38, 0.0  ;;  %vm806_vm3 = vcmp.ge.f32.partialorder %v1961_v60, 0.0  ;;  %vm807_vm4 = vcmp.ge.f32.partialorder %v1963_v53, 0.0  ;;  %vm808_vm5 = vcmp.ge.f32.partialorder %v1965_v48, 0.0 }
 0x17c   : > { %vm809_vm6 = vcmp.ge.f32.partialorder %v1967_v8, 0.0  ;;  %vm810_vm7 = vcmp.ge.f32.partialorder %v1969_v63, 0.0  ;;  %vm811_vm8 = vcmp.ge.f32.partialorder %v1971_v3, 0.0  ;;  %v2025_v52 = vmul.f32 %v1535_v7, %v767_v5 }
 0x17d   : > { %v835_v56 = vmul.f32 0.2, %v1955_v45  ;;  %v836_v36 = vmul.f32 0.2, %v1957_v13  ;;  %v837_v50 = vmul.f32 0.2, %v1959_v38  ;;  %v2034_v0 = vmul.f32 %v1535_v7, %v768_v9 }
 0x17e   : > { %vm818_vm15 = vcmp.ge.f32.partialorder %v1985_v16, 0.0  ;;  %vm819_vm10 = vcmp.ge.f32.partialorder %v1987_v32, 0.0  ;;  %v838_v4 = vmul.f32 0.2, %v1961_v60  ;;  %v839_v14 = vmul.f32 0.2, %v1963_v53 }
 0x17f   : > { %v840_v37 = vmul.f32 0.2, %v1965_v48  ;;  %vm824_vm14 = vcmp.ge.f32.partialorder %v1997_v39, 0.0  ;;  %v841_v18 = vmul.f32 0.2, %v1967_v8  ;;  %v2053_v23 = vsel %vm803_vm0, %v1955_v45, %v835_v56 }
 0x180   : > { %v842_v15 = vmul.f32 0.2, %v1969_v63  ;;  %v843_v19 = vmul.f32 0.2, %v1971_v3  ;;  %vm828_vm9 = vcmp.ge.f32.partialorder %v2005_v44, 0.0  ;;  %v2065_v46 = vsel %vm804_vm1, %v1957_v13, %v836_v36 }
 0x181   : > { %v844_v29 = vmul.f32 0.2, %v1973_v22  ;;  %v845_v35 = vmul.f32 0.2, %v1975_v6  ;;  %v846_v40 = vmul.f32 0.2, %v1977_v10  ;;  %v869_v25 = vsel %vm805_vm2, %v1959_v38, %v837_v50 }
 0x182   : > { %vm830_vm11 = vcmp.ge.f32.partialorder %v2009_v59, 0.0  ;;  %vm831_vm13 = vcmp.ge.f32.partialorder %v2011_v58, 0.0  ;;  %vm832_vm12 = vcmp.ge.f32.partialorder %v2013_v17, 0.0  ;;  %v847_v54 = vmul.f32 0.2, %v1979_v11 }
 0x183   : > { %v848_v2 = vmul.f32 0.2, %v1981_v26  ;;  %v849_v12 = vmul.f32 0.2, %v1983_v30  ;;  %vm833_vm1 = vcmp.ge.f32.partialorder %v2025_v52, 0.0  ;;  %vm834_vm0 = vcmp.ge.f32.partialorder %v2034_v0, 0.0 }
 0x184   : > { %v850_v33 = vmul.f32 0.2, %v1985_v16  ;;  %v851_v7 = vmul.f32 0.2, %v1987_v32  ;;  %v852_v41 = vmul.f32 0.2, %v1989_v34  ;;  %v870_v62 = vsel %vm806_vm3, %v1961_v60, %v838_v4 }
 0x185   : > { %v853_v27 = vmul.f32 0.2, %v1991_v49  ;;  %v854_v21 = vmul.f32 0.2, %v1993_v20  ;;  %v855_v28 = vmul.f32 0.2, %v1995_v24  ;;  %v871_v51 = vsel %vm807_vm4, %v1963_v53, %v839_v14 }
 0x186   : > { %v856_v55 = vmul.f32 0.2, %v1997_v39  ;;  %v857_v57 = vmul.f32 0.2, %v1999_v31  ;;  %v858_v61 = vmul.f32 0.2, %v2001_v42  ;;  %v872_v1 = vsel %vm808_vm5, %v1965_v48, %v840_v37 }
 0x187   : > { %v859_v5 = vmul.f32 0.2, %v2003_v43  ;;  %v860_v9 = vmul.f32 0.2, %v2005_v44  ;;  %v861_v45 = vmul.f32 0.2, %v2007_v47  ;;  %v873_v13 = vsel %vm809_vm6, %v1967_v8, %v841_v18 }
 0x188   : > { %v862_v38 = vmul.f32 0.2, %v2009_v59  ;;  %v863_v60 = vmul.f32 0.2, %v2011_v58  ;;  %v864_v53 = vmul.f32 0.2, %v2013_v17  ;;  %v874_v48 = vsel %vm810_vm7, %v1969_v63, %v842_v15 }
 0x189   : > { %v865_v56 = vmul.f32 0.2, %v2025_v52  ;;  %v866_v36 = vmul.f32 0.2, %v2034_v0  ;;  %v875_v50 = vsel %vm811_vm8, %v1971_v3, %v843_v19  ;;  %vm2213_vm2 = vcmp.ge.f32.partialorder %v1973_v22, 0.0 }
 0x18a   : > { %v876_v8 = vsel %vm2213_vm2, %v1973_v22, %v844_v29  ;;  %vm2214_vm3 = vcmp.ge.f32.partialorder %v1975_v6, 0.0  ;;  %vm2215_vm4 = vcmp.ge.f32.partialorder %v1977_v10, 0.0  ;;  %vm2216_vm5 = vcmp.ge.f32.partialorder %v1979_v11, 0.0 }
 0x18b   : > { %v877_v4 = vsel %vm2214_vm3, %v1975_v6, %v845_v35  ;;  %v878_v63 = vsel %vm2215_vm4, %v1977_v10, %v846_v40  ;;  %v879_v14 = vsel %vm2216_vm5, %v1979_v11, %v847_v54  ;;  %vm2217_vm6 = vcmp.ge.f32.partialorder %v1981_v26, 0.0 }
 0x18c   : > { %v880_v3 = vsel %vm2217_vm6, %v1981_v26, %v848_v2  ;;  %vm2218_vm7 = vcmp.ge.f32.partialorder %v1983_v30, 0.0  ;;  %v882_v6 = vsel %vm818_vm15, %v1985_v16, %v850_v33  ;;  %v883_v10 = vsel %vm819_vm10, %v1987_v32, %v851_v7 }
 0x18d   : > { %v881_v22 = vsel %vm2218_vm7, %v1983_v30, %v849_v12  ;;  %vm2219_vm8 = vcmp.ge.f32.partialorder %v1989_v34, 0.0  ;;  %vm2220_vm2 = vcmp.ge.f32.partialorder %v1991_v49, 0.0  ;;  %vm2221_vm3 = vcmp.ge.f32.partialorder %v1993_v20, 0.0 }
 0x18e   : > { %v884_v11 = vsel %vm2219_vm8, %v1989_v34, %v852_v41  ;;  %v885_v26 = vsel %vm2220_vm2, %v1991_v49, %v853_v27  ;;  %v886_v30 = vsel %vm2221_vm3, %v1993_v20, %v854_v21  ;;  %vm2222_vm4 = vcmp.ge.f32.partialorder %v1995_v24, 0.0 }
 0x18f   : > { %v887_v16 = vsel %vm2222_vm4, %v1995_v24, %v855_v28  ;;  %v888_v32 = vsel %vm824_vm14, %v1997_v39, %v856_v55  ;;  %vm2223_vm10 = vcmp.ge.f32.partialorder %v1999_v31, 0.0  ;;  %vm2224_vm15 = vcmp.ge.f32.partialorder %v2001_v42, 0.0 }
 0x190   : > { %v889_v34 = vsel %vm2223_vm10, %v1999_v31, %v857_v57  ;;  %v890_v49 = vsel %vm2224_vm15, %v2001_v42, %v858_v61  ;;  %vm2225_vm5 = vcmp.ge.f32.partialorder %v2003_v43, 0.0  ;;  %v892_v24 = vsel %vm828_vm9, %v2005_v44, %v860_v9 }
 0x191   : > { %v891_v20 = vsel %vm2225_vm5, %v2003_v43, %v859_v5  ;;  %vm2226_vm14 = vcmp.ge.f32.partialorder %v2007_v47, 0.0  ;;  %v894_v31 = vsel %vm830_vm11, %v2009_v59, %v862_v38  ;;  %v895_v42 = vsel %vm831_vm13, %v2011_v58, %v863_v60 }
 0x192   : > { %v893_v39 = vsel %vm2226_vm14, %v2007_v47, %v861_v45  ;;  %v896_v43 = vsel %vm832_vm12, %v2013_v17, %v864_v53  ;;  %v897_v44 = vsel %vm833_vm1, %v2025_v52, %v865_v56  ;;  %v898_v47 = vsel %vm834_vm0, %v2034_v0, %v866_v36 }
 0x193   : > { %v1242_v59 = vpack.c.bf16 %v2065_v46, %v2053_v23  ;;  %v1247_v58 = vpack.c.bf16 %v870_v62, %v869_v25  ;;  %v1252_v37 = vpack.c.bf16 %v872_v1, %v871_v51  ;;  %v1257_v18 = vpack.c.bf16 %v874_v48, %v873_v13 }
 0x194   : > { %v1262_v15 = vpack.c.bf16 %v876_v8, %v875_v50  ;;  %v1267_v17 = vpack.c.bf16 %v878_v63, %v877_v4  ;;  %v1272_v52 = vpack.c.bf16 %v880_v3, %v879_v14  ;;  %v1277_v19 = vpack.c.bf16 %v882_v6, %v881_v22 }
 0x195   : > { %1243 = vst [vmem:[%s2169_s23] sm:$0xff] %v1242_v59   ;;  %1319 = vst [vmem:[%s2169_s23 + $0x8] sm:$0xff] %v1247_v58   ;;  %v1282_v29 = vpack.c.bf16 %v884_v11, %v883_v10  ;;  %v1287_v0 = vpack.c.bf16 %v886_v30, %v885_v26  ;;  %v1292_v23 = vpack.c.bf16 %v888_v32, %v887_v16 }
 0x196   : > { %1320 = vst [vmem:[%s2169_s23 + $0x10] sm:$0xff] %v1252_v37   ;;  %1321 = vst [vmem:[%s2169_s23 + $0x18] sm:$0xff] %v1257_v18   ;;  %v1297_v35 = vpack.c.bf16 %v890_v49, %v889_v34  ;;  %v1302_v40 = vpack.c.bf16 %v892_v24, %v891_v20  ;;  %v1307_v46 = vpack.c.bf16 %v894_v31, %v893_v39 }
 0x197   : > { %1322 = vst [vmem:[%s2169_s23 + $0x20] sm:$0xff] %v1262_v15   ;;  %1323 = vst [vmem:[%s2169_s23 + $0x28] sm:$0xff] %v1267_v17   ;;  %v1312_v54 = vpack.c.bf16 %v896_v43, %v895_v42  ;;  %v1317_v2 = vpack.c.bf16 %v898_v47, %v897_v44 }
 0x198   : > { %1324 = vst [vmem:[%s2169_s23 + $0x30] sm:$0xff] %v1272_v52   ;;  %1325 = vst [vmem:[%s2169_s23 + $0x38] sm:$0xff] %v1277_v19  }
 0x199   : > { %1326 = vst [vmem:[%s2169_s23 + $0x40] sm:$0xff] %v1282_v29   ;;  %1327 = vst [vmem:[%s2169_s23 + $0x48] sm:$0xff] %v1287_v0  }
 0x19a   : > { %1328 = vst [vmem:[%s2169_s23 + $0x50] sm:$0xff] %v1292_v23   ;;  %1329 = vst [vmem:[%s2169_s23 + $0x58] sm:$0xff] %v1297_v35  }
 0x19b   : > { %1330 = vst [vmem:[%s2169_s23 + $0x60] sm:$0xff] %v1302_v40   ;;  %1331 = vst [vmem:[%s2169_s23 + $0x68] sm:$0xff] %v1307_v46  }
 0x19c   : > { %1332 = vst [vmem:[%s2169_s23 + $0x70] sm:$0xff] %v1312_v54   ;;  %1333 = vst [vmem:[%s2169_s23 + $0x78] sm:$0xff] %v1317_v2  }
 0x19d PF: > { %s12_s9 = sadd.s32 1, %s1542_s9  }
 0x19e   : > { %p9_p4 = scmp.ge.s32.totalorder %s12_s9, 4  }
 0x1a0   :  { %11 = sbr.rel (!%p9_p4) target bundleno = 1 (0x1), region = 58 }

// kernel: discriminative_forward.7
= control target key start
LH: loop header
LB: loop body
LE: loop exit
PB: predicated region body
PF: predicated region fallthrough
CT: control target
= control target key end

     0   :  { %s1072_s9 = smov 0   ;;  %s1249_s0 = inlined_call_operand.vmem [shape: bf16[2,64,512], index: 0, kind: input, shape index: {}]   ;;  %s1250_s1 = inlined_call_operand.vmem [shape: bf16[512,128], index: 1, kind: input, shape index: {}]   ;;  %s1251_s2 = inlined_call_operand.vmem [shape: bf16[2,64,128], index: 2, kind: output, shape index: {}]  }
   0x1 LB: > { %s803_s10 = sadd.s32 4294967295, %s1055_s9   ;;  %p807_p0 = scmp.ge.s32.totalorder %s1055_s9, 1  ;;  %s1055_s9 = sphi %s1072_s9, %s12_s9  }
   0x2   : > { %p112_p1 = scmp.lt.s32.totalorder %s1055_s9, 3 }
   0x4   : > { %p113_p2 = pnand %p807_p0, %p112_p1 }
   0x5   : > { %p134_p3 = scmp.lt.s32.totalorder (!%p113_p2), %s803_s10, 1 }
   0x6   : > { %116 = sbr.rel (%p113_p2) target bundleno = 323 (0x143), region = 28 }
   0xb   : > { %v991_v0 = vld [vmem:[%s1250_s1 + $0x78] sm:$0xff]   ;;  %v995_v4 = vld [vmem:[%s1250_s1 + $0x70] sm:$0xff]   ;;  %v999_v8 = vld [vmem:[%s1250_s1 + $0x68] sm:$0xff]   ;;  %s1253_s10 = smov (!%p134_p3, %s803_s10), 1 }
   0xc   : > { %v992_v1 = vld [vmem:[%s1250_s1 + $0xf8] sm:$0xff]   ;;  %903 = vmatprep.subr.bf16.mxu0 %v991_v0  ;;  %v996_v5 = vld [vmem:[%s1250_s1 + $0xf0] sm:$0xff]   ;;  %v1000_v9 = vld [vmem:[%s1250_s1 + $0xe8] sm:$0xff]   ;;  %s870_s13 = sshll.u32 %s1253_s10, 7  ;;  %s871_s27 = sshll.u32 %s1253_s10, 5 }
   0xd   : > { %v993_v2 = vld [vmem:[%s1250_s1 + $0x38] sm:$0xff]   ;;  %943 = vmatprep.subr.bf16.mxu1 %v992_v1  ;;  %v997_v6 = vld [vmem:[%s1250_s1 + $0x30] sm:$0xff]   ;;  %v1001_v10 = vld [vmem:[%s1250_s1 + $0x28] sm:$0xff]   ;;  %s1180_s22 = scalar_lea.vmem %s1249_s0, %s870_s13  ;;  %s143_s10 = scalar_lea.vmem %s1251_s2, %s871_s27 }
   0xe   : > { %v994_v3 = vld [vmem:[%s1250_s1 + $0xb8] sm:$0xff]   ;;  %904 = vmatpush3.bf16.msra.mxu0 %v993_v2  ;;  %v998_v7 = vld [vmem:[%s1250_s1 + $0xb0] sm:$0xff]   ;;  %v1002_v11 = vld [vmem:[%s1250_s1 + $0xa8] sm:$0xff]  }
   0xf   : > { %944 = vmatpush3.bf16.msra.mxu1 %v994_v3  ;;  %905 = vmatprep.subr.bf16.mxu0 %v995_v4  ;;  %v1003_v12 = vld [vmem:[%s1250_s1 + $0x60] sm:$0xff]   ;;  %v1007_v16 = vld [vmem:[%s1250_s1 + $0x58] sm:$0xff]   ;;  %v1011_v20 = vld [vmem:[%s1250_s1 + $0x50] sm:$0xff]  }
  0x10   : > { %945 = vmatprep.subr.bf16.mxu1 %v996_v5  ;;  %v1004_v13 = vld [vmem:[%s1250_s1 + $0xe0] sm:$0xff]   ;;  %v1008_v17 = vld [vmem:[%s1250_s1 + $0xd8] sm:$0xff]   ;;  %v1012_v21 = vld [vmem:[%s1250_s1 + $0xd0] sm:$0xff]  }
  0x11   : > { %v1005_v14 = vld [vmem:[%s1250_s1 + $0x20] sm:$0xff]   ;;  %v1009_v18 = vld [vmem:[%s1250_s1 + $0x18] sm:$0xff]   ;;  %v1013_v22 = vld [vmem:[%s1250_s1 + $0x10] sm:$0xff]  }
  0x12   : > { %906 = vmatpush3.bf16.msra.mxu0 %v997_v6  ;;  %v1006_v15 = vld [vmem:[%s1250_s1 + $0xa0] sm:$0xff]   ;;  %v1010_v19 = vld [vmem:[%s1250_s1 + $0x98] sm:$0xff]   ;;  %v1014_v23 = vld [vmem:[%s1250_s1 + $0x90] sm:$0xff]  }
  0x13   : > { %946 = vmatpush3.bf16.msra.mxu1 %v998_v7  ;;  %907 = vmatprep.subr.bf16.mxu0 %v999_v8  ;;  %v1015_v24 = vld [vmem:[%s1250_s1 + $0x48] sm:$0xff]   ;;  %v1019_v28 = vld [vmem:[%s1250_s1 + $0x40] sm:$0xff]  }
  0x14   : > { %947 = vmatprep.subr.bf16.mxu1 %v1000_v9  ;;  %v1016_v25 = vld [vmem:[%s1250_s1 + $0xc8] sm:$0xff]   ;;  %v1020_v29 = vld [vmem:[%s1250_s1 + $0xc0] sm:$0xff]  }
  0x15   : > { %v1017_v26 = vld [vmem:[%s1250_s1 + $0x8] sm:$0xff]   ;;  %v1021_v30 = vld [vmem:[%s1250_s1] sm:$0xff]  }
  0x16   : > { %908 = vmatpush3.bf16.msra.mxu0 %v1001_v10  ;;  %v1018_v27 = vld [vmem:[%s1250_s1 + $0x88] sm:$0xff]   ;;  %v1022_v31 = vld [vmem:[%s1250_s1 + $0x80] sm:$0xff]  }
  0x17   : > { %948 = vmatpush3.bf16.msra.mxu1 %v1002_v11  ;;  %909 = vmatprep.subr.bf16.mxu0 %v1003_v12  ;;  %v1023_v32 = vld [vmem:[%s1180_s22] ss:$16 sps:$4 sm:$0xff]   ;;  %v1025_v33 = vld [vmem:[%s1180_s22 + $0x4] ss:$16 sps:$4 sm:$0xff]   ;;  %v1026_v34 = vld [vmem:[%s1180_s22 + $0x8] ss:$16 sps:$4 sm:$0xff]  }
  0x18   : > { %949 = vmatprep.subr.bf16.mxu1 %v1004_v13  ;;  %v1028_v35 = vld [vmem:[%s1180_s22 + $0xc] ss:$16 sps:$4 sm:$0xff]   ;;  %529 = vmatprep.mubr.bf16.mxu0 %v1025_v33  ;;  %v1029_v36 = vld [vmem:[%s1180_s22 + $0x24] ss:$16 sps:$4 sm:$0xff]   ;;  %v1033_v38 = vld [vmem:[%s1180_s22 + $0x20] ss:$16 sps:$4 sm:$0xff]  }
  0x19   : > { %594 = vmatprep.mubr.bf16.mxu1 %v1028_v35  ;;  %v1031_v37 = vld [vmem:[%s1180_s22 + $0x2c] ss:$16 sps:$4 sm:$0xff]   ;;  %v1034_v39 = vld [vmem:[%s1180_s22 + $0x28] ss:$16 sps:$4 sm:$0xff]   ;;  %v1035_v40 = vld [vmem:[%s1180_s22 + $0x44] ss:$16 sps:$4 sm:$0xff]  }
  0x1a   : > { %910 = vmatpush3.bf16.msra.mxu0 %v1005_v14  ;;  %v1037_v41 = vld [vmem:[%s1180_s22 + $0x4c] ss:$16 sps:$4 sm:$0xff]   ;;  %v1039_v42 = vld [vmem:[%s1180_s22 + $0x40] ss:$16 sps:$4 sm:$0xff]   ;;  %v1040_v43 = vld [vmem:[%s1180_s22 + $0x48] ss:$16 sps:$4 sm:$0xff]  }
  0x1b   : > { %950 = vmatpush3.bf16.msra.mxu1 %v1006_v15  ;;  %911 = vmatprep.subr.bf16.mxu0 %v1007_v16  ;;  %v1041_v44 = vld [vmem:[%s1180_s22 + $0x64] ss:$16 sps:$4 sm:$0xff]   ;;  %v1043_v45 = vld [vmem:[%s1180_s22 + $0x6c] ss:$16 sps:$4 sm:$0xff]   ;;  %v1045_v46 = vld [vmem:[%s1180_s22 + $0x60] ss:$16 sps:$4 sm:$0xff]  }
  0x1c   : > { %951 = vmatprep.subr.bf16.mxu1 %v1008_v17  ;;  %v1046_v47 = vld [vmem:[%s1180_s22 + $0x68] ss:$16 sps:$4 sm:$0xff]  }
  0x1e   : > { %912 = vmatpush3.bf16.msra.mxu0 %v1009_v18 }
  0x1f   : > { %952 = vmatpush3.bf16.msra.mxu1 %v1010_v19  ;;  %913 = vmatprep.subr.bf16.mxu0 %v1011_v20 }
  0x20   : > { %953 = vmatprep.subr.bf16.mxu1 %v1012_v21 }
  0x22   : > { %914 = vmatpush3.bf16.msra.mxu0 %v1013_v22 }
  0x23   : > { %954 = vmatpush3.bf16.msra.mxu1 %v1014_v23  ;;  %915 = vmatprep.subr.bf16.mxu0 %v1015_v24 }
  0x24   : > { %955 = vmatprep.subr.bf16.mxu1 %v1016_v25 }
  0x26   : > { %916 = vmatpush3.bf16.msra.mxu0 %v1017_v26 }
  0x27   : > { %956 = vmatpush3.bf16.msra.mxu1 %v1018_v27  ;;  %917 = vmatprep.subr.bf16.mxu0 %v1019_v28 }
  0x28   : > { %957 = vmatprep.subr.bf16.mxu1 %v1020_v29 }
  0x2a   : > { %918 = vmatpush3.bf16.msra.mxu0 %v1021_v30 }
  0x2b   : > { %958 = vmatpush3.bf16.msra.mxu1 %v1022_v31 }
  0x2d   : > { %530 = vmatmul.mubr.bf16.vlgmr.msra.gmra.mxu0 %v1023_v32 }
  0x2e   : > { %595 = vmatmul.mubr.bf16.vlgmr.msra.gmra.mxu1 %v1026_v34  ;;  %537 = vmatprep.mubr.bf16.mxu0 %v1029_v36 }
  0x2f   : > { %602 = vmatprep.mubr.bf16.mxu1 %v1031_v37 }
  0x35   : > { %538 = vmatmul.mubr.bf16.gmra.mxu0 %v1033_v38 }
  0x36   : > { %603 = vmatmul.mubr.bf16.gmra.mxu1 %v1034_v39  ;;  %545 = vmatprep.mubr.bf16.mxu0 %v1035_v40 }
  0x37   : > { %610 = vmatprep.mubr.bf16.mxu1 %v1037_v41 }
  0x3d   : > { %546 = vmatmul.mubr.bf16.gmra.mxu0 %v1039_v42 }
  0x3e   : > { %611 = vmatmul.mubr.bf16.gmra.mxu1 %v1040_v43  ;;  %553 = vmatprep.mubr.bf16.mxu0 %v1041_v44 }
  0x3f   : > { %618 = vmatprep.mubr.bf16.mxu1 %v1043_v45 }
  0x45   : > { %554 = vmatmul.mubr.bf16.gmra.mxu0 %v1045_v46 }
  0x46   : > { %619 = vmatmul.mubr.bf16.gmra.mxu1 %v1046_v47 }
  0xed   : > { %v919_v48 = vpop.f32.mrf.mxu0 }
  0xee   : > { %v959_v49 = vpop.f32.mrf.mxu1 }
  0xef   : > { %v920_v50 = vpop.f32.mrf.mxu0 }
  0xf0   : > { %v960_v51 = vpop.f32.mrf.mxu1  ;;  %v921_v1 = vadd.f32 %v920_v50, %v919_v48 }
  0xf1   : > { %v922_v52 = vpop.f32.mrf.mxu0  ;;  %v961_v2 = vadd.f32 %v960_v51, %v959_v49 }
  0xf2   : > { %v962_v53 = vpop.f32.mrf.mxu1 }
  0xf3   : > { %v923_v54 = vpop.f32.mrf.mxu0  ;;  %v1206_v12 = vadd.f32 %v961_v2, %v921_v1 }
  0xf4   : > { %v963_v55 = vpop.f32.mrf.mxu1  ;;  %v924_v62 = vadd.f32 %v923_v54, %v922_v52 }
  0xf5   : > { %v925_v56 = vpop.f32.mrf.mxu0  ;;  %v964_v63 = vadd.f32 %v963_v55, %v962_v53  ;;  %v640_v22 = vmul.f32 %v1206_v12, %v1206_v12 }
  0xf6   : > { %v965_v57 = vpop.f32.mrf.mxu1 }
  0xf7   : > { %v926_v58 = vpop.f32.mrf.mxu0  ;;  %v1204_v8 = vadd.f32 %v964_v63, %v924_v62 }
  0xf8   : > { %v966_v59 = vpop.f32.mrf.mxu1  ;;  %v927_v4 = vadd.f32 %v926_v58, %v925_v56 }
  0xf9   : > { %v928_v60 = vpop.f32.mrf.mxu0  ;;  %v967_v5 = vadd.f32 %v966_v59, %v965_v57  ;;  %v641_v19 = vmul.f32 %v1204_v8, %v1204_v8  ;;  %v627_v25 = vadd.f32 %v1204_v8, %v1206_v12 }
  0xfa   : > { %v968_v61 = vpop.f32.mrf.mxu1 }
  0xfb   : > { %v929_v0 = vpop.f32.mrf.mxu0  ;;  %v1208_v14 = vadd.f32 %v967_v5, %v927_v4  ;;  %v648_v31 = vadd.f32 %v641_v19, %v640_v22 }
  0xfc   : > { %v969_v3 = vpop.f32.mrf.mxu1  ;;  %v930_v9 = vadd.f32 %v929_v0, %v928_v60 }
  0xfd   : > { %v931_v6 = vpop.f32.mrf.mxu0  ;;  %v970_v10 = vadd.f32 %v969_v3, %v968_v61  ;;  %v642_v26 = vmul.f32 %v1208_v14, %v1208_v14  ;;  %v628_v32 = vadd.f32 %v627_v25, %v1208_v14 }
  0xfe   : > { %v971_v7 = vpop.f32.mrf.mxu1 }
  0xff   : > { %v932_v11 = vpop.f32.mrf.mxu0  ;;  %v1212_v20 = vadd.f32 %v970_v10, %v930_v9  ;;  %v649_v38 = vadd.f32 %v648_v31, %v642_v26 }
 0x100   : > { %v972_v13 = vpop.f32.mrf.mxu1  ;;  %v933_v15 = vadd.f32 %v932_v11, %v931_v6 }
 0x101   : > { %v973_v16 = vadd.f32 %v972_v13, %v971_v7  ;;  %v934_v17 = vpop.f32.mrf.mxu0  ;;  %v643_v33 = vmul.f32 %v1212_v20, %v1212_v20  ;;  %v629_v39 = vadd.f32 %v628_v32, %v1212_v20 }
 0x102   : > { %v974_v18 = vpop.f32.mrf.mxu1 }
 0x103   : > { %v935_v21 = vpop.f32.mrf.mxu0  ;;  %v1220_v27 = vadd.f32 %v973_v16, %v933_v15  ;;  %v650_v44 = vadd.f32 %v649_v38, %v643_v33 }
 0x104   : > { %v936_v23 = vadd.f32 %v935_v21, %v934_v17  ;;  %v975_v24 = vpop.f32.mrf.mxu1 }
 0x105   : > { %v976_v28 = vadd.f32 %v975_v24, %v974_v18  ;;  %v937_v29 = vpop.f32.mrf.mxu0  ;;  %v644_v40 = vmul.f32 %v1220_v27, %v1220_v27  ;;  %v630_v45 = vadd.f32 %v629_v39, %v1220_v27 }
 0x106   : > { %v977_v30 = vpop.f32.mrf.mxu1 }
 0x107   : > { %v616_v34 = vadd.f32 %v976_v28, %v936_v23  ;;  %v938_v35 = vpop.f32.mrf.mxu0  ;;  %v651_v51 = vadd.f32 %v650_v44, %v644_v40 }
 0x108   : > { %v939_v36 = vadd.f32 %v938_v35, %v937_v29  ;;  %v978_v37 = vpop.f32.mrf.mxu1 }
 0x109   : > { %v979_v41 = vadd.f32 %v978_v37, %v977_v30  ;;  %v940_v42 = vpop.f32.mrf.mxu0  ;;  %v645_v46 = vmul.f32 %v616_v34, %v616_v34  ;;  %v631_v52 = vadd.f32 %v630_v45, %v616_v34 }
 0x10a   : > { %v980_v43 = vpop.f32.mrf.mxu1 }
 0x10b   : > { %v621_v47 = vadd.f32 %v979_v41, %v939_v36  ;;  %v941_v48 = vpop.f32.mrf.mxu0  ;;  %v652_v55 = vadd.f32 %v651_v51, %v645_v46 }
 0x10c   : > { %v942_v49 = vadd.f32 %v941_v48, %v940_v42  ;;  %v981_v50 = vpop.f32.mrf.mxu1 }
 0x10d   : > { %v646_v53 = vmul.f32 %v621_v47, %v621_v47  ;;  %v982_v54 = vadd.f32 %v981_v50, %v980_v43  ;;  %v632_v56 = vadd.f32 %v631_v52, %v621_v47 }
 0x10f   : > { %v624_v57 = vadd.f32 %v982_v54, %v942_v49  ;;  %v653_v58 = vadd.f32 %v652_v55, %v646_v53 }
 0x111   : > { %v633_v59 = vadd.f32 %v632_v56, %v624_v57  ;;  %v647_v60 = vmul.f32 %v624_v57, %v624_v57 }
 0x113   : > { %v634_v61 = vrot.slane %v633_v59, 4  ;;  %v654_v62 = vadd.f32 %v653_v58, %v647_v60 }
 0x115   : > { %v635_v63 = vadd.f32 %v634_v61, %v633_v59  ;;  %v655_v0 = vrot.slane %v654_v62, 4 }
 0x117   : > { %v636_v1 = vrot.slane %v635_v63, 2  ;;  %v656_v2 = vadd.f32 %v655_v0, %v654_v62 }
 0x119   : > { %v637_v3 = vadd.f32 %v636_v1, %v635_v63  ;;  %v657_v4 = vrot.slane %v656_v2, 2 }
 0x11b   : > { %v638_v5 = vrot.slane %v637_v3, 1  ;;  %v658_v6 = vadd.f32 %v657_v4, %v656_v2 }
 0x11d   : > { %v639_v7 = vadd.f32 %v638_v5, %v637_v3  ;;  %v659_v9 = vrot.slane %v658_v6, 1 }
 0x11f   : > { %v660_v10 = vadd.f32 %v659_v9, %v658_v6  ;;  %v661_v11 = vmul.f32 0.015625, %v639_v7 }
 0x121   : > { %v662_v13 = vmul.f32 0.015625, %v660_v10  ;;  %v663_v15 = vmul.f32 %v661_v11, %v661_v11  ;;  %v666_v19 = vsub.f32 %v1206_v12, %v661_v11  ;;  %v667_v21 = vsub.f32 %v1204_v8, %v661_v11 }
 0x122   : > { %v668_v22 = vsub.f32 %v1208_v14, %v661_v11  ;;  %v669_v23 = vsub.f32 %v1212_v20, %v661_v11  ;;  %v670_v25 = vsub.f32 %v1220_v27, %v661_v11  ;;  %v671_v26 = vsub.f32 %v616_v34, %v661_v11 }
 0x123   : > { %v664_v16 = vsub.f32 %v662_v13, %v663_v15  ;;  %v672_v28 = vsub.f32 %v621_v47, %v661_v11  ;;  %v673_v29 = vsub.f32 %v624_v57, %v661_v11 }
 0x125   : > { %v665_v17 = vmax.f32 %v664_v16, 0.0 }
 0x127   : > { %v674_v18 = vadd.f32 1e-05, %v665_v17 }
 0x129   : > { %1047 = vrsqrt.f32 %v674_v18 }
 0x136   : > { %v1048_v24 = vpop.eup %1047 }
 0x137   : > { %v676_v30 = vmul.f32 %v1048_v24, %v666_v19  ;;  %v677_v31 = vmul.f32 %v1048_v24, %v667_v21  ;;  %v678_v32 = vmul.f32 %v1048_v24, %v668_v22  ;;  %v679_v33 = vmul.f32 %v1048_v24, %v669_v23 }
 0x138   : > { %v680_v35 = vmul.f32 %v1048_v24, %v670_v25  ;;  %v681_v36 = vmul.f32 %v1048_v24, %v671_v26  ;;  %v682_v12 = vmul.f32 %v1048_v24, %v672_v28  ;;  %v683_v37 = vmul.f32 %v1048_v24, %v673_v29 }
 0x139   : > { %vm684_vm0 = vcmp.ge.f32.partialorder %v676_v30, 0.0  ;;  %vm685_vm1 = vcmp.ge.f32.partialorder %v677_v31, 0.0  ;;  %vm686_vm2 = vcmp.ge.f32.partialorder %v678_v32, 0.0  ;;  %vm687_vm3 = vcmp.ge.f32.partialorder %v679_v33, 0.0 }
 0x13a   : > { %vm688_vm4 = vcmp.ge.f32.partialorder %v680_v35, 0.0  ;;  %vm689_vm5 = vcmp.ge.f32.partialorder %v681_v36, 0.0  ;;  %vm690_vm6 = vcmp.ge.f32.partialorder %v682_v12, 0.0  ;;  %vm691_vm7 = vcmp.ge.f32.partialorder %v683_v37, 0.0 }
 0x13b   : > { %v692_v8 = vmul.f32 0.2, %v676_v30  ;;  %v693_v14 = vmul.f32 0.2, %v677_v31  ;;  %v694_v20 = vmul.f32 0.2, %v678_v32 }
 0x13c   : > { %v695_v27 = vmul.f32 0.2, %v679_v33  ;;  %v696_v34 = vmul.f32 0.2, %v680_v35  ;;  %v697_v38 = vmul.f32 0.2, %v681_v36 }
 0x13d   : > { %v698_v39 = vmul.f32 0.2, %v682_v12  ;;  %v699_v40 = vmul.f32 0.2, %v683_v37  ;;  %v700_v41 = vsel %vm684_vm0, %v676_v30, %v692_v8  ;;  %v701_v42 = vsel %vm685_vm1, %v677_v31, %v693_v14 }
 0x13e   : > { %v702_v43 = vsel %vm686_vm2, %v678_v32, %v694_v20  ;;  %v703_v44 = vsel %vm687_vm3, %v679_v33, %v695_v27  ;;  %v704_v45 = vsel %vm688_vm4, %v680_v35, %v696_v34  ;;  %v705_v46 = vsel %vm689_vm5, %v681_v36, %v697_v38 }
 0x13f   : > { %v706_v47 = vsel %vm690_vm6, %v682_v12, %v698_v39  ;;  %v707_v48 = vsel %vm691_vm7, %v683_v37, %v699_v40  ;;  %v883_v49 = vpack.c.bf16 %v701_v42, %v700_v41  ;;  %v888_v50 = vpack.c.bf16 %v703_v44, %v702_v43 }
 0x140   : > { %v893_v51 = vpack.c.bf16 %v705_v46, %v704_v45  ;;  %v898_v52 = vpack.c.bf16 %v707_v48, %v706_v47 }
 0x141   : > { %884 = vst [vmem:[%s143_s10] sm:$0xff] %v883_v49   ;;  %900 = vst [vmem:[%s143_s10 + $0x8] sm:$0xff] %v888_v50  }
 0x142   : > { %901 = vst [vmem:[%s143_s10 + $0x10] sm:$0xff] %v893_v51   ;;  %902 = vst [vmem:[%s143_s10 + $0x18] sm:$0xff] %v898_v52  }
 0x143 PF: > { %s12_s9 = sadd.s32 1, %s1055_s9  }
 0x144   : > { %p9_p4 = scmp.ge.s32.totalorder %s12_s9, 4  }
 0x146   :  { %11 = sbr.rel (!%p9_p4) target bundleno = 1 (0x1), region = 58 }

// kernel: discriminative_forward.8
= control target key start
LH: loop header
LB: loop body
LE: loop exit
PB: predicated region body
PF: predicated region fallthrough
CT: control target
= control target key end

     0   :  { %s1246_s9 = smov 0   ;;  %s1473_s0 = inlined_call_operand.vmem [shape: bf16[2,16,1024], index: 0, kind: input, shape index: {}]   ;;  %s1474_s1 = inlined_call_operand.vmem [shape: bf16[1024,128], index: 1, kind: input, shape index: {}]   ;;  %s1475_s2 = inlined_call_operand.vmem [shape: bf16[2,16,128], index: 2, kind: output, shape index: {}]  }
   0x1 LB: > { %s967_s10 = sadd.s32 4294967295, %s1229_s9   ;;  %p971_p0 = scmp.ge.s32.totalorder %s1229_s9, 1  ;;  %s1229_s9 = sphi %s1246_s9, %s12_s9  }
   0x2   : > { %p112_p1 = scmp.lt.s32.totalorder %s1229_s9, 3 }
   0x4   : > { %p113_p2 = pnand %p971_p0, %p112_p1 }
   0x5   : > { %p134_p3 = scmp.lt.s32.totalorder (!%p113_p2), %s967_s10, 1 }
   0x6   : > { %116 = sbr.rel (%p113_p2) target bundleno = 328 (0x148), region = 28 }
   0xb   : > { %v1157_v0 = vld [vmem:[%s1474_s1 + $0x78] sm:$0xff]   ;;  %v1161_v4 = vld [vmem:[%s1474_s1 + $0x70] sm:$0xff]   ;;  %v1165_v8 = vld [vmem:[%s1474_s1 + $0x68] sm:$0xff]   ;;  %s1477_s10 = smov (!%p134_p3, %s967_s10), 1 }
   0xc   : > { %v1158_v1 = vld [vmem:[%s1474_s1 + $0xf8] sm:$0xff]   ;;  %1061 = vmatprep.subr.bf16.mxu0 %v1157_v0  ;;  %v1162_v5 = vld [vmem:[%s1474_s1 + $0xf0] sm:$0xff]   ;;  %v1166_v9 = vld [vmem:[%s1474_s1 + $0xe8] sm:$0xff]   ;;  %s1052_s13 = sshll.u32 %s1477_s10, 6 }
   0xd   : > { %v1159_v2 = vld [vmem:[%s1474_s1 + $0x38] sm:$0xff]   ;;  %1083 = vmatprep.subr.bf16.mxu1 %v1158_v1  ;;  %v1163_v6 = vld [vmem:[%s1474_s1 + $0x30] sm:$0xff]   ;;  %v1167_v10 = vld [vmem:[%s1474_s1 + $0x28] sm:$0xff]   ;;  %s1354_s22 = scalar_lea.vmem %s1473_s0, %s1052_s13 }
   0xe   : > { %v1160_v3 = vld [vmem:[%s1474_s1 + $0xb8] sm:$0xff]   ;;  %1062 = vmatpush3.bf16.msra.mxu0 %v1159_v2  ;;  %v1164_v7 = vld [vmem:[%s1474_s1 + $0xb0] sm:$0xff]   ;;  %v1168_v11 = vld [vmem:[%s1474_s1 + $0xa8] sm:$0xff]  }
   0xf   : > { %1084 = vmatpush3.bf16.msra.mxu1 %v1160_v3  ;;  %1063 = vmatprep.subr.bf16.mxu0 %v1161_v4  ;;  %v1169_v12 = vld [vmem:[%s1474_s1 + $0x60] sm:$0xff]   ;;  %v1173_v16 = vld [vmem:[%s1474_s1 + $0x58] sm:$0xff]   ;;  %v1177_v20 = vld [vmem:[%s1474_s1 + $0x50] sm:$0xff]  }
  0x10   : > { %1085 = vmatprep.subr.bf16.mxu1 %v1162_v5  ;;  %v1170_v13 = vld [vmem:[%s1474_s1 + $0xe0] sm:$0xff]   ;;  %v1174_v17 = vld [vmem:[%s1474_s1 + $0xd8] sm:$0xff]   ;;  %v1178_v21 = vld [vmem:[%s1474_s1 + $0xd0] sm:$0xff]  }
  0x11   : > { %v1171_v14 = vld [vmem:[%s1474_s1 + $0x20] sm:$0xff]   ;;  %v1175_v18 = vld [vmem:[%s1474_s1 + $0x18] sm:$0xff]   ;;  %v1179_v22 = vld [vmem:[%s1474_s1 + $0x10] sm:$0xff]  }
  0x12   : > { %1064 = vmatpush3.bf16.msra.mxu0 %v1163_v6  ;;  %v1172_v15 = vld [vmem:[%s1474_s1 + $0xa0] sm:$0xff]   ;;  %v1176_v19 = vld [vmem:[%s1474_s1 + $0x98] sm:$0xff]   ;;  %v1180_v23 = vld [vmem:[%s1474_s1 + $0x90] sm:$0xff]  }
  0x13   : > { %1086 = vmatpush3.bf16.msra.mxu1 %v1164_v7  ;;  %1065 = vmatprep.subr.bf16.mxu0 %v1165_v8  ;;  %v1181_v24 = vld [vmem:[%s1474_s1 + $0x48] sm:$0xff]   ;;  %v1185_v28 = vld [vmem:[%s1474_s1 + $0x40] sm:$0xff]   ;;  %v1189_v40 = vld [vmem:[%s1474_s1 + $0x178] sm:$0xff]  }
  0x14   : > { %1087 = vmatprep.subr.bf16.mxu1 %v1166_v9  ;;  %v1182_v25 = vld [vmem:[%s1474_s1 + $0xc8] sm:$0xff]   ;;  %v1186_v29 = vld [vmem:[%s1474_s1 + $0xc0] sm:$0xff]   ;;  %v1190_v41 = vld [vmem:[%s1474_s1 + $0x1f8] sm:$0xff]  }
  0x15   : > { %v1183_v26 = vld [vmem:[%s1474_s1 + $0x8] sm:$0xff]   ;;  %v1187_v30 = vld [vmem:[%s1474_s1] sm:$0xff]   ;;  %v1191_v42 = vld [vmem:[%s1474_s1 + $0x138] sm:$0xff]  }
  0x16   : > { %1066 = vmatpush3.bf16.msra.mxu0 %v1167_v10  ;;  %v1184_v27 = vld [vmem:[%s1474_s1 + $0x88] sm:$0xff]   ;;  %v1188_v31 = vld [vmem:[%s1474_s1 + $0x80] sm:$0xff]   ;;  %v1192_v43 = vld [vmem:[%s1474_s1 + $0x1b8] sm:$0xff]  }
  0x17   : > { %1088 = vmatpush3.bf16.msra.mxu1 %v1168_v11  ;;  %1067 = vmatprep.subr.bf16.mxu0 %v1169_v12  ;;  %v145_v32 = vld [vmem:[%s1354_s22] sm:$0xff]  ;;  %v146_v34 = vld [vmem:[%s1354_s22 + $0x8] sm:$0xff]  ;;  %v1193_v44 = vld [vmem:[%s1474_s1 + $0x170] sm:$0xff]  }
  0x18   : > { %1089 = vmatprep.subr.bf16.mxu1 %v1170_v13  ;;  %v149_v33 = vld [vmem:[%s1354_s22 + $0x20] sm:$0xff]  ;;  %v150_v37 = vld [vmem:[%s1354_s22 + $0x28] sm:$0xff]  ;;  %v1194_v45 = vld [vmem:[%s1474_s1 + $0x1f0] sm:$0xff]  }
  0x19   : > { %v976_v35 = vcombine.low %v145_v32, %v149_v33  ;;  %v977_v36 = vcombine.high %v145_v32, %v149_v33  ;;  %v978_v38 = vcombine.low %v146_v34, %v150_v37  ;;  %v979_v39 = vcombine.high %v146_v34, %v150_v37  ;;  %v1195_v46 = vld [vmem:[%s1474_s1 + $0x130] sm:$0xff]   ;;  %v1197_v48 = vld [vmem:[%s1474_s1 + $0x168] sm:$0xff]   ;;  %v1201_v52 = vld [vmem:[%s1474_s1 + $0x160] sm:$0xff]  }
  0x1a   : > { %1068 = vmatpush3.bf16.msra.mxu0 %v1171_v14  ;;  %v1196_v47 = vld [vmem:[%s1474_s1 + $0x1b0] sm:$0xff]   ;;  %v1198_v49 = vld [vmem:[%s1474_s1 + $0x1e8] sm:$0xff]   ;;  %v1202_v53 = vld [vmem:[%s1474_s1 + $0x1e0] sm:$0xff]  }
  0x1b   : > { %1090 = vmatpush3.bf16.msra.mxu1 %v1172_v15  ;;  %1069 = vmatprep.subr.bf16.mxu0 %v1173_v16  ;;  %v1199_v50 = vld [vmem:[%s1474_s1 + $0x128] sm:$0xff]   ;;  %v1203_v54 = vld [vmem:[%s1474_s1 + $0x120] sm:$0xff]   ;;  %v1205_v56 = vld [vmem:[%s1474_s1 + $0x158] sm:$0xff]  }
  0x1c   : > { %1091 = vmatprep.subr.bf16.mxu1 %v1174_v17  ;;  %737 = vmatprep.mubr.bf16.mxu0 %v977_v36  ;;  %v1200_v51 = vld [vmem:[%s1474_s1 + $0x1a8] sm:$0xff]   ;;  %v1204_v55 = vld [vmem:[%s1474_s1 + $0x1a0] sm:$0xff]   ;;  %v1206_v57 = vld [vmem:[%s1474_s1 + $0x1d8] sm:$0xff]  }
  0x1d   : > { %778 = vmatprep.mubr.bf16.mxu1 %v979_v39  ;;  %v1207_v58 = vld [vmem:[%s1474_s1 + $0x118] sm:$0xff]   ;;  %v1209_v60 = vld [vmem:[%s1474_s1 + $0x150] sm:$0xff]   ;;  %v1213_v0 = vld [vmem:[%s1474_s1 + $0x148] sm:$0xff]  }
  0x1e   : > { %1070 = vmatpush3.bf16.msra.mxu0 %v1175_v18  ;;  %v1208_v59 = vld [vmem:[%s1474_s1 + $0x198] sm:$0xff]   ;;  %v1210_v61 = vld [vmem:[%s1474_s1 + $0x1d0] sm:$0xff]   ;;  %v1214_v1 = vld [vmem:[%s1474_s1 + $0x1c8] sm:$0xff]  }
  0x1f   : > { %1092 = vmatpush3.bf16.msra.mxu1 %v1176_v19  ;;  %1071 = vmatprep.subr.bf16.mxu0 %v1177_v20  ;;  %v1211_v62 = vld [vmem:[%s1474_s1 + $0x110] sm:$0xff]   ;;  %v1215_v2 = vld [vmem:[%s1474_s1 + $0x108] sm:$0xff]   ;;  %v1217_v4 = vld [vmem:[%s1474_s1 + $0x140] sm:$0xff]  }
  0x20   : > { %1093 = vmatprep.subr.bf16.mxu1 %v1178_v21  ;;  %v1212_v63 = vld [vmem:[%s1474_s1 + $0x190] sm:$0xff]   ;;  %v1216_v3 = vld [vmem:[%s1474_s1 + $0x188] sm:$0xff]   ;;  %v1218_v5 = vld [vmem:[%s1474_s1 + $0x1c0] sm:$0xff]  }
  0x21   : > { %v1219_v6 = vld [vmem:[%s1474_s1 + $0x100] sm:$0xff]   ;;  %v147_v8 = vld [vmem:[%s1354_s22 + $0x10] sm:$0xff]  ;;  %v148_v12 = vld [vmem:[%s1354_s22 + $0x18] sm:$0xff] }
  0x22   : > { %1072 = vmatpush3.bf16.msra.mxu0 %v1179_v22  ;;  %v1220_v7 = vld [vmem:[%s1474_s1 + $0x180] sm:$0xff]   ;;  %v151_v9 = vld [vmem:[%s1354_s22 + $0x30] sm:$0xff]  ;;  %v152_v13 = vld [vmem:[%s1354_s22 + $0x38] sm:$0xff]  ;;  %s1053_s22 = sshll.u32 %s1477_s10, 3 }
  0x23   : > { %1094 = vmatpush3.bf16.msra.mxu1 %v1180_v23  ;;  %1073 = vmatprep.subr.bf16.mxu0 %v1181_v24  ;;  %v980_v10 = vcombine.low %v147_v8, %v151_v9  ;;  %v981_v11 = vcombine.high %v147_v8, %v151_v9  ;;  %v982_v14 = vcombine.low %v148_v12, %v152_v13  ;;  %s143_s17 = scalar_lea.vmem %s1475_s2, %s1053_s22 }
  0x24   : > { %1095 = vmatprep.subr.bf16.mxu1 %v1182_v25  ;;  %v983_v15 = vcombine.high %v148_v12, %v152_v13 }
  0x26   : > { %1074 = vmatpush3.bf16.msra.mxu0 %v1183_v26 }
  0x27   : > { %1096 = vmatpush3.bf16.msra.mxu1 %v1184_v27  ;;  %1075 = vmatprep.subr.bf16.mxu0 %v1185_v28 }
  0x28   : > { %1097 = vmatprep.subr.bf16.mxu1 %v1186_v29 }
  0x2a   : > { %1076 = vmatpush3.bf16.msra.mxu0 %v1187_v30 }
  0x2b   : > { %1098 = vmatpush3.bf16.msra.mxu1 %v1188_v31  ;;  %1105 = vmatprep.subr.bf16.mxu0 %v1189_v40 }
  0x2c   : > { %1127 = vmatprep.subr.bf16.mxu1 %v1190_v41 }
  0x2d   : > { %738 = vmatmul.mubr.bf16.vlgmr.msra.gmra.mxu0 %v976_v35 }
  0x2e   : > { %779 = vmatmul.mubr.bf16.vlgmr.msra.gmra.mxu1 %v978_v38  ;;  %1106 = vmatpush3.bf16.msra.mxu0 %v1191_v42 }
  0x2f   : > { %1128 = vmatpush3.bf16.msra.mxu1 %v1192_v43  ;;  %1107 = vmatprep.subr.bf16.mxu0 %v1193_v44 }
  0x30   : > { %1129 = vmatprep.subr.bf16.mxu1 %v1194_v45  ;;  %819 = vmatprep.mubr.bf16.mxu0 %v981_v11 }
  0x31   : > { %860 = vmatprep.mubr.bf16.mxu1 %v983_v15 }
  0x32   : > { %1108 = vmatpush3.bf16.msra.mxu0 %v1195_v46 }
  0x33   : > { %1130 = vmatpush3.bf16.msra.mxu1 %v1196_v47  ;;  %1109 = vmatprep.subr.bf16.mxu0 %v1197_v48 }
  0x34   : > { %1131 = vmatprep.subr.bf16.mxu1 %v1198_v49 }
  0x36   : > { %1110 = vmatpush3.bf16.msra.mxu0 %v1199_v50 }
  0x37   : > { %1132 = vmatpush3.bf16.msra.mxu1 %v1200_v51  ;;  %1111 = vmatprep.subr.bf16.mxu0 %v1201_v52 }
  0x38   : > { %1133 = vmatprep.subr.bf16.mxu1 %v1202_v53 }
  0x3a   : > { %1112 = vmatpush3.bf16.msra.mxu0 %v1203_v54 }
  0x3b   : > { %1134 = vmatpush3.bf16.msra.mxu1 %v1204_v55  ;;  %1113 = vmatprep.subr.bf16.mxu0 %v1205_v56 }
  0x3c   : > { %1135 = vmatprep.subr.bf16.mxu1 %v1206_v57 }
  0x3e   : > { %1114 = vmatpush3.bf16.msra.mxu0 %v1207_v58 }
  0x3f   : > { %1136 = vmatpush3.bf16.msra.mxu1 %v1208_v59  ;;  %1115 = vmatprep.subr.bf16.mxu0 %v1209_v60 }
  0x40   : > { %1137 = vmatprep.subr.bf16.mxu1 %v1210_v61 }
  0x42   : > { %1116 = vmatpush3.bf16.msra.mxu0 %v1211_v62 }
  0x43   : > { %1138 = vmatpush3.bf16.msra.mxu1 %v1212_v63  ;;  %1117 = vmatprep.subr.bf16.mxu0 %v1213_v0 }
  0x44   : > { %1139 = vmatprep.subr.bf16.mxu1 %v1214_v1 }
  0x46   : > { %1118 = vmatpush3.bf16.msra.mxu0 %v1215_v2 }
  0x47   : > { %1140 = vmatpush3.bf16.msra.mxu1 %v1216_v3  ;;  %1119 = vmatprep.subr.bf16.mxu0 %v1217_v4 }
  0x48   : > { %1141 = vmatprep.subr.bf16.mxu1 %v1218_v5 }
  0x4a   : > { %1120 = vmatpush3.bf16.msra.mxu0 %v1219_v6 }
  0x4b   : > { %1142 = vmatpush3.bf16.msra.mxu1 %v1220_v7 }
  0x4d   : > { %820 = vmatmul.mubr.bf16.vlgmr.msra.gmra.mxu0 %v980_v10 }
  0x4e   : > { %861 = vmatmul.mubr.bf16.vlgmr.msra.gmra.mxu1 %v982_v14 }
  0xed   : > { %v1077_v16 = vpop.f32.mrf.mxu0 }
  0xee   : > { %v1099_v17 = vpop.f32.mrf.mxu1 }
  0xef   : > { %v1078_v18 = vpop.f32.mrf.mxu0 }
  0xf0   : > { %v1100_v19 = vpop.f32.mrf.mxu1  ;;  %v1079_v23 = vadd.f32 %v1078_v18, %v1077_v16 }
  0xf1   : > { %v1080_v20 = vpop.f32.mrf.mxu0  ;;  %v1101_v24 = vadd.f32 %v1100_v19, %v1099_v17 }
  0xf2   : > { %v1102_v21 = vpop.f32.mrf.mxu1 }
  0xf3   : > { %v1081_v22 = vpop.f32.mrf.mxu0  ;;  %v781_v29 = vadd.f32 %v1101_v24, %v1079_v23 }
  0xf4   : > { %v1103_v25 = vpop.f32.mrf.mxu1  ;;  %v1082_v30 = vadd.f32 %v1081_v22, %v1080_v20 }
  0xf5   : > { %v1104_v31 = vadd.f32 %v1103_v25, %v1102_v21 }
  0xf7   : > { %v784_v38 = vadd.f32 %v1104_v31, %v1082_v30 }
 0x10d   : > { %v1121_v26 = vpop.f32.mrf.mxu0 }
 0x10e   : > { %v1143_v27 = vpop.f32.mrf.mxu1 }
 0x10f   : > { %v1122_v28 = vpop.f32.mrf.mxu0 }
 0x110   : > { %v1123_v32 = vadd.f32 %v1122_v28, %v1121_v26  ;;  %v1144_v33 = vpop.f32.mrf.mxu1 }
 0x111   : > { %v1124_v34 = vpop.f32.mrf.mxu0  ;;  %v1145_v39 = vadd.f32 %v1144_v33, %v1143_v27 }
 0x112   : > { %v822_v35 = vadd.f32 %v1123_v32, %v781_v29  ;;  %v1146_v36 = vpop.f32.mrf.mxu1 }
 0x113   : > { %v1125_v37 = vpop.f32.mrf.mxu0 }
 0x114   : > { %v1126_v40 = vadd.f32 %v1125_v37, %v1124_v34  ;;  %v1147_v41 = vpop.f32.mrf.mxu1  ;;  %v863_v42 = vadd.f32 %v1145_v39, %v822_v35 }
 0x115   : > { %v1148_v44 = vadd.f32 %v1147_v41, %v1146_v36 }
 0x116   : > { %v825_v43 = vadd.f32 %v1126_v40, %v784_v38  ;;  %v876_v46 = vmul.f32 %v863_v42, %v863_v42 }
 0x118   : > { %v866_v45 = vadd.f32 %v1148_v44, %v825_v43 }
 0x11a   : > { %v869_v47 = vadd.f32 %v866_v45, %v863_v42  ;;  %v877_v48 = vmul.f32 %v866_v45, %v866_v45 }
 0x11c   : > { %v870_v49 = vrot.slane %v869_v47, 4  ;;  %v878_v50 = vadd.f32 %v877_v48, %v876_v46 }
 0x11e   : > { %v871_v51 = vadd.f32 %v870_v49, %v869_v47  ;;  %v879_v52 = vrot.slane %v878_v50, 4 }
 0x120   : > { %v872_v53 = vrot.slane %v871_v51, 2  ;;  %v880_v54 = vadd.f32 %v879_v52, %v878_v50 }
 0x122   : > { %v873_v55 = vadd.f32 %v872_v53, %v871_v51  ;;  %v881_v56 = vrot.slane %v880_v54, 2 }
 0x124   : > { %v874_v57 = vrot.slane %v873_v55, 1  ;;  %v882_v58 = vadd.f32 %v881_v56, %v880_v54 }
 0x126   : > { %v875_v59 = vadd.f32 %v874_v57, %v873_v55  ;;  %v883_v60 = vrot.slane %v882_v58, 1 }
 0x128   : > { %v884_v61 = vadd.f32 %v883_v60, %v882_v58  ;;  %v885_v62 = vmul.f32 0.0625, %v875_v59 }
 0x12a   : > { %v886_v63 = vmul.f32 0.0625, %v884_v61  ;;  %v887_v0 = vmul.f32 %v885_v62, %v885_v62  ;;  %v890_v4 = vsub.f32 %v863_v42, %v885_v62  ;;  %v891_v5 = vsub.f32 %v866_v45, %v885_v62 }
 0x12c   : > { %v888_v1 = vsub.f32 %v886_v63, %v887_v0 }
 0x12e   : > { %v889_v2 = vmax.f32 %v888_v1, 0.0 }
 0x130   : > { %v892_v3 = vadd.f32 1e-05, %v889_v2 }
 0x132   : > { %1221 = vrsqrt.f32 %v892_v3 }
 0x13f   : > { %v1222_v6 = vpop.eup %1221 }
 0x140   : > { %v894_v7 = vmul.f32 %v1222_v6, %v890_v4  ;;  %v895_v8 = vmul.f32 %v1222_v6, %v891_v5 }
 0x142   : > { %vm896_vm0 = vcmp.ge.f32.partialorder %v894_v7, 0.0  ;;  %vm897_vm1 = vcmp.ge.f32.partialorder %v895_v8, 0.0  ;;  %v898_v9 = vmul.f32 0.2, %v894_v7  ;;  %v899_v10 = vmul.f32 0.2, %v895_v8 }
 0x144   : > { %v900_v11 = vsel %vm896_vm0, %v894_v7, %v898_v9  ;;  %v901_v12 = vsel %vm897_vm1, %v895_v8, %v899_v10 }
 0x145   : > { %v1059_v13 = vpack.c.bf16 %v901_v12, %v900_v11 }
 0x147   : > { %1060 = vst [vmem:[%s143_s17] sm:$0xff] %v1059_v13  }
 0x148 PF: > { %s12_s9 = sadd.s32 1, %s1229_s9  }
 0x149   : > { %p9_p4 = scmp.ge.s32.totalorder %s12_s9, 4  }
 0x14b   :  { %11 = sbr.rel (!%p9_p4) target bundleno = 1 (0x1), region = 58 }

// kernel: discriminative_forward.9
= control target key start
LH: loop header
LB: loop body
LE: loop exit
PB: predicated region body
PF: predicated region fallthrough
CT: control target
= control target key end

     0   :  { %s2595_s1 = inlined_call_operand.vmem [shape: bf16[2048,128], index: 1, kind: input, shape index: {}]   ;;  %s2596_s0 = inlined_call_operand.vmem [shape: bf16[1,24,2048], index: 0, kind: input, shape index: {}]   ;;  %s2597_s2 = inlined_call_operand.vmem [shape: f32[1,24,128], index: 2, kind: output, shape index: {}]  }
   0x1   :  { %v1971_v0 = vld [vmem:[%s2595_s1 + $0x78] sm:$0xff]   ;;  %v1975_v4 = vld [vmem:[%s2595_s1 + $0x70] sm:$0xff]   ;;  %v1979_v8 = vld [vmem:[%s2595_s1 + $0x68] sm:$0xff]  }
   0x2   :  { %v1972_v1 = vld [vmem:[%s2595_s1 + $0xf8] sm:$0xff]   ;;  %1747 = vmatprep.subr.bf16.mxu0 %v1971_v0  ;;  %v1976_v5 = vld [vmem:[%s2595_s1 + $0xf0] sm:$0xff]   ;;  %v1980_v9 = vld [vmem:[%s2595_s1 + $0xe8] sm:$0xff]  }
   0x3   :  { %v1973_v2 = vld [vmem:[%s2595_s1 + $0x38] sm:$0xff]   ;;  %1775 = vmatprep.subr.bf16.mxu1 %v1972_v1  ;;  %v1977_v6 = vld [vmem:[%s2595_s1 + $0x30] sm:$0xff]   ;;  %v1981_v10 = vld [vmem:[%s2595_s1 + $0x28] sm:$0xff]  }
   0x4   :  { %v1974_v3 = vld [vmem:[%s2595_s1 + $0xb8] sm:$0xff]   ;;  %1748 = vmatpush3.bf16.msra.mxu0 %v1973_v2  ;;  %v1978_v7 = vld [vmem:[%s2595_s1 + $0xb0] sm:$0xff]   ;;  %v1982_v11 = vld [vmem:[%s2595_s1 + $0xa8] sm:$0xff]  }
   0x5   :  { %1776 = vmatpush3.bf16.msra.mxu1 %v1974_v3  ;;  %1749 = vmatprep.subr.bf16.mxu0 %v1975_v4  ;;  %v1983_v12 = vld [vmem:[%s2595_s1 + $0x60] sm:$0xff]   ;;  %v1987_v16 = vld [vmem:[%s2595_s1 + $0x58] sm:$0xff]   ;;  %v1991_v20 = vld [vmem:[%s2595_s1 + $0x50] sm:$0xff]  }
   0x6   :  { %1777 = vmatprep.subr.bf16.mxu1 %v1976_v5  ;;  %v1984_v13 = vld [vmem:[%s2595_s1 + $0xe0] sm:$0xff]   ;;  %v1988_v17 = vld [vmem:[%s2595_s1 + $0xd8] sm:$0xff]   ;;  %v1992_v21 = vld [vmem:[%s2595_s1 + $0xd0] sm:$0xff]  }
   0x7   :  { %v1985_v14 = vld [vmem:[%s2595_s1 + $0x20] sm:$0xff]   ;;  %v1989_v18 = vld [vmem:[%s2595_s1 + $0x18] sm:$0xff]   ;;  %v1993_v22 = vld [vmem:[%s2595_s1 + $0x10] sm:$0xff]  }
   0x8   :  { %1750 = vmatpush3.bf16.msra.mxu0 %v1977_v6  ;;  %v1986_v15 = vld [vmem:[%s2595_s1 + $0xa0] sm:$0xff]   ;;  %v1990_v19 = vld [vmem:[%s2595_s1 + $0x98] sm:$0xff]   ;;  %v1994_v23 = vld [vmem:[%s2595_s1 + $0x90] sm:$0xff]  }
   0x9   :  { %1778 = vmatpush3.bf16.msra.mxu1 %v1978_v7  ;;  %1751 = vmatprep.subr.bf16.mxu0 %v1979_v8  ;;  %v1995_v24 = vld [vmem:[%s2595_s1 + $0x48] sm:$0xff]   ;;  %v1999_v28 = vld [vmem:[%s2595_s1 + $0x40] sm:$0xff]   ;;  %v2003_v40 = vld [vmem:[%s2595_s1 + $0x178] sm:$0xff]  }
   0xa   :  { %1779 = vmatprep.subr.bf16.mxu1 %v1980_v9  ;;  %v1996_v25 = vld [vmem:[%s2595_s1 + $0xc8] sm:$0xff]   ;;  %v2000_v29 = vld [vmem:[%s2595_s1 + $0xc0] sm:$0xff]   ;;  %v2004_v41 = vld [vmem:[%s2595_s1 + $0x1f8] sm:$0xff]  }
   0xb   :  { %v1997_v26 = vld [vmem:[%s2595_s1 + $0x8] sm:$0xff]   ;;  %v2001_v30 = vld [vmem:[%s2595_s1] sm:$0xff]   ;;  %v2005_v42 = vld [vmem:[%s2595_s1 + $0x138] sm:$0xff]  }
   0xc   :  { %1752 = vmatpush3.bf16.msra.mxu0 %v1981_v10  ;;  %v1998_v27 = vld [vmem:[%s2595_s1 + $0x88] sm:$0xff]   ;;  %v2002_v31 = vld [vmem:[%s2595_s1 + $0x80] sm:$0xff]   ;;  %v2006_v43 = vld [vmem:[%s2595_s1 + $0x1b8] sm:$0xff]  }
   0xd   :  { %1780 = vmatpush3.bf16.msra.mxu1 %v1982_v11  ;;  %1753 = vmatprep.subr.bf16.mxu0 %v1983_v12  ;;  %v12_v32 = vld [vmem:[%s2596_s0] sm:$0xff]  ;;  %v13_v34 = vld [vmem:[%s2596_s0 + $0x8] sm:$0xff]  ;;  %v2007_v44 = vld [vmem:[%s2595_s1 + $0x170] sm:$0xff]  }
   0xe   :  { %1781 = vmatprep.subr.bf16.mxu1 %v1984_v13  ;;  %v20_v33 = vld [vmem:[%s2596_s0 + $0x40] sm:$0xff]  ;;  %v21_v37 = vld [vmem:[%s2596_s0 + $0x48] sm:$0xff]  ;;  %v2008_v45 = vld [vmem:[%s2595_s1 + $0x1f0] sm:$0xff]  }
   0xf   :  { %v1587_v35 = vcombine.low %v12_v32, %v20_v33  ;;  %v1588_v36 = vcombine.high %v12_v32, %v20_v33  ;;  %v1589_v38 = vcombine.low %v13_v34, %v21_v37  ;;  %v1590_v39 = vcombine.high %v13_v34, %v21_v37  ;;  %v2009_v46 = vld [vmem:[%s2595_s1 + $0x130] sm:$0xff]   ;;  %v2011_v48 = vld [vmem:[%s2595_s1 + $0x168] sm:$0xff]   ;;  %v2015_v52 = vld [vmem:[%s2595_s1 + $0x160] sm:$0xff]  }
  0x10   :  { %1754 = vmatpush3.bf16.msra.mxu0 %v1985_v14  ;;  %v2010_v47 = vld [vmem:[%s2595_s1 + $0x1b0] sm:$0xff]   ;;  %v2012_v49 = vld [vmem:[%s2595_s1 + $0x1e8] sm:$0xff]   ;;  %v2016_v53 = vld [vmem:[%s2595_s1 + $0x1e0] sm:$0xff]  }
  0x11   :  { %1782 = vmatpush3.bf16.msra.mxu1 %v1986_v15  ;;  %1755 = vmatprep.subr.bf16.mxu0 %v1987_v16  ;;  %v2013_v50 = vld [vmem:[%s2595_s1 + $0x128] sm:$0xff]   ;;  %v2017_v54 = vld [vmem:[%s2595_s1 + $0x120] sm:$0xff]   ;;  %v2019_v56 = vld [vmem:[%s2595_s1 + $0x158] sm:$0xff]  }
  0x12   :  { %1783 = vmatprep.subr.bf16.mxu1 %v1988_v17  ;;  %1228 = vmatprep.mubr.bf16.mxu0 %v1588_v36  ;;  %v2014_v51 = vld [vmem:[%s2595_s1 + $0x1a8] sm:$0xff]   ;;  %v2018_v55 = vld [vmem:[%s2595_s1 + $0x1a0] sm:$0xff]   ;;  %v2020_v57 = vld [vmem:[%s2595_s1 + $0x1d8] sm:$0xff]  }
  0x13   :  { %1276 = vmatprep.mubr.bf16.mxu1 %v1590_v39  ;;  %v2021_v58 = vld [vmem:[%s2595_s1 + $0x118] sm:$0xff]   ;;  %v28_v60 = vld [vmem:[%s2596_s0 + $0x80] sm:$0xff]  ;;  %v29_v61 = vld [vmem:[%s2596_s0 + $0x88] sm:$0xff] }
  0x14   :  { %1756 = vmatpush3.bf16.msra.mxu0 %v1989_v18  ;;  %v2022_v59 = vld [vmem:[%s2595_s1 + $0x198] sm:$0xff]   ;;  %v1604_v62 = vcombine.high %v28_v60, %v28_v60  ;;  %v1603_v63 = vcombine.low %v28_v60, %v28_v60  ;;  %v1606_v0 = vcombine.high %v29_v61, %v29_v61  ;;  %v2026_v1 = vld [vmem:[%s2595_s1 + $0x150] sm:$0xff]   ;;  %v1605_v2 = vcombine.low %v29_v61, %v29_v61  ;;  %v2031_v6 = vld [vmem:[%s2595_s1 + $0x148] sm:$0xff]  }
  0x15   :  { %1784 = vmatpush3.bf16.msra.mxu1 %v1990_v19  ;;  %1757 = vmatprep.subr.bf16.mxu0 %v1991_v20  ;;  %v2027_v3 = vld [vmem:[%s2595_s1 + $0x1d0] sm:$0xff]   ;;  %v2032_v7 = vld [vmem:[%s2595_s1 + $0x1c8] sm:$0xff]   ;;  %v2035_v10 = vld [vmem:[%s2595_s1 + $0x140] sm:$0xff]  }
  0x16   :  { %1785 = vmatprep.subr.bf16.mxu1 %v1992_v21  ;;  %v2029_v4 = vld [vmem:[%s2595_s1 + $0x110] sm:$0xff]   ;;  %v2033_v8 = vld [vmem:[%s2595_s1 + $0x108] sm:$0xff]   ;;  %v2036_v11 = vld [vmem:[%s2595_s1 + $0x1c0] sm:$0xff]  }
  0x17   :  { %v2030_v5 = vld [vmem:[%s2595_s1 + $0x190] sm:$0xff]   ;;  %v2034_v9 = vld [vmem:[%s2595_s1 + $0x188] sm:$0xff]   ;;  %v2037_v12 = vld [vmem:[%s2595_s1 + $0x100] sm:$0xff]  }
  0x18   :  { %1758 = vmatpush3.bf16.msra.mxu0 %v1993_v22  ;;  %v2038_v13 = vld [vmem:[%s2595_s1 + $0x180] sm:$0xff]   ;;  %v14_v14 = vld [vmem:[%s2596_s0 + $0x10] sm:$0xff]  ;;  %v15_v16 = vld [vmem:[%s2596_s0 + $0x18] sm:$0xff] }
  0x19   :  { %1786 = vmatpush3.bf16.msra.mxu1 %v1994_v23  ;;  %1759 = vmatprep.subr.bf16.mxu0 %v1995_v24  ;;  %v22_v15 = vld [vmem:[%s2596_s0 + $0x50] sm:$0xff]  ;;  %v23_v19 = vld [vmem:[%s2596_s0 + $0x58] sm:$0xff]  ;;  %v2049_v33 = vld [vmem:[%s2595_s1 + $0x268] sm:$0xff]  }
  0x1a   :  { %1787 = vmatprep.subr.bf16.mxu1 %v1996_v25  ;;  %v1591_v17 = vcombine.low %v14_v14, %v22_v15  ;;  %v1592_v18 = vcombine.high %v14_v14, %v22_v15  ;;  %v1593_v20 = vcombine.low %v15_v16, %v23_v19  ;;  %v1594_v21 = vcombine.high %v15_v16, %v23_v19  ;;  %v2039_v22 = vld [vmem:[%s2595_s1 + $0x278] sm:$0xff]   ;;  %v2050_v34 = vld [vmem:[%s2595_s1 + $0x2e8] sm:$0xff]   ;;  %v16_v60 = vld [vmem:[%s2596_s0 + $0x20] sm:$0xff] }
  0x1b   :  { %v2040_v23 = vld [vmem:[%s2595_s1 + $0x2f8] sm:$0xff]   ;;  %v2052_v37 = vld [vmem:[%s2595_s1 + $0x228] sm:$0xff]   ;;  %v24_v61 = vld [vmem:[%s2596_s0 + $0x60] sm:$0xff] }
  0x1c   :  { %1760 = vmatpush3.bf16.msra.mxu0 %v1997_v26  ;;  %v2041_v24 = vld [vmem:[%s2595_s1 + $0x238] sm:$0xff]   ;;  %v2043_v26 = vld [vmem:[%s2595_s1 + $0x270] sm:$0xff]   ;;  %v2053_v39 = vld [vmem:[%s2595_s1 + $0x2a8] sm:$0xff]  }
  0x1d   :  { %1788 = vmatpush3.bf16.msra.mxu1 %v1998_v27  ;;  %1761 = vmatprep.subr.bf16.mxu0 %v1999_v28  ;;  %v2042_v25 = vld [vmem:[%s2595_s1 + $0x2b8] sm:$0xff]   ;;  %v2044_v27 = vld [vmem:[%s2595_s1 + $0x2f0] sm:$0xff]   ;;  %v2085_v15 = vld [vmem:[%s2595_s1 + $0x368] sm:$0xff]  }
  0x1e   :  { %1789 = vmatprep.subr.bf16.mxu1 %v2000_v29  ;;  %v2045_v28 = vld [vmem:[%s2595_s1 + $0x230] sm:$0xff]   ;;  %v2086_v16 = vld [vmem:[%s2595_s1 + $0x3e8] sm:$0xff]  }
  0x1f   :  { %v2046_v29 = vld [vmem:[%s2595_s1 + $0x2b0] sm:$0xff]   ;;  %v2088_v19 = vld [vmem:[%s2595_s1 + $0x328] sm:$0xff]  }
  0x20   :  { %1762 = vmatpush3.bf16.msra.mxu0 %v2001_v30  ;;  %v30_v30 = vld [vmem:[%s2596_s0 + $0x90] sm:$0xff] }
  0x21   :  { %1790 = vmatpush3.bf16.msra.mxu1 %v2002_v31  ;;  %1803 = vmatprep.subr.bf16.mxu0 %v2003_v40  ;;  %v1608_v31 = vcombine.high %v30_v30, %v30_v30  ;;  %v1607_v32 = vcombine.low %v30_v30, %v30_v30  ;;  %v2055_v40 = vld [vmem:[%s2595_s1 + $0x260] sm:$0xff]   ;;  %v2099_v30 = vld [vmem:[%s2595_s1 + $0x350] sm:$0xff]  }
  0x22   :  { %1831 = vmatprep.subr.bf16.mxu1 %v2004_v41  ;;  %v2056_v41 = vld [vmem:[%s2595_s1 + $0x2e0] sm:$0xff]  }
  0x23   :  { %1229 = vmatmul.mubr.bf16.vlgmr.msra.gmra.mxu0 %v1587_v35  ;;  %v31_v35 = vld [vmem:[%s2596_s0 + $0x98] sm:$0xff] }
  0x24   :  { %1277 = vmatmul.mubr.bf16.vlgmr.msra.gmra.mxu1 %v1589_v38  ;;  %1804 = vmatpush3.bf16.msra.mxu0 %v2005_v42  ;;  %v1610_v36 = vcombine.high %v31_v35, %v31_v35  ;;  %v1609_v38 = vcombine.low %v31_v35, %v31_v35  ;;  %v2057_v42 = vld [vmem:[%s2595_s1 + $0x220] sm:$0xff]   ;;  %v2104_v35 = vld [vmem:[%s2595_s1 + $0x3c8] sm:$0xff]  }
  0x25   :  { %1832 = vmatpush3.bf16.msra.mxu1 %v2006_v43  ;;  %1805 = vmatprep.subr.bf16.mxu0 %v2007_v44  ;;  %v2058_v43 = vld [vmem:[%s2595_s1 + $0x2a0] sm:$0xff]   ;;  %v2059_v44 = vld [vmem:[%s2595_s1 + $0x258] sm:$0xff]  }
  0x26   :  { %1833 = vmatprep.subr.bf16.mxu1 %v2008_v45  ;;  %1236 = vmatprep.mubr.bf16.mxu0 %v1604_v62  ;;  %v2060_v45 = vld [vmem:[%s2595_s1 + $0x2d8] sm:$0xff]   ;;  %v17_v62 = vld [vmem:[%s2596_s0 + $0x28] sm:$0xff] }
  0x27   :  { %1284 = vmatprep.mubr.bf16.mxu1 %v1606_v0  ;;  %v1596_v0 = vcombine.high %v16_v60, %v24_v61 }
  0x28   :  { %1806 = vmatpush3.bf16.msra.mxu0 %v2009_v46  ;;  %v2061_v46 = vld [vmem:[%s2595_s1 + $0x218] sm:$0xff]  }
  0x29   :  { %1834 = vmatpush3.bf16.msra.mxu1 %v2010_v47  ;;  %1807 = vmatprep.subr.bf16.mxu0 %v2011_v48  ;;  %v2062_v47 = vld [vmem:[%s2595_s1 + $0x298] sm:$0xff]   ;;  %v2063_v48 = vld [vmem:[%s2595_s1 + $0x250] sm:$0xff]  }
  0x2a   :  { %1835 = vmatprep.subr.bf16.mxu1 %v2012_v49  ;;  %v2064_v49 = vld [vmem:[%s2595_s1 + $0x2d0] sm:$0xff]  }
  0x2b   :  { %1237 = vmatmul.mubr.bf16.gmra.mxu0 %v1603_v63  ;;  %v1595_v63 = vcombine.low %v16_v60, %v24_v61 }
  0x2c   :  { %1808 = vmatpush3.bf16.msra.mxu0 %v2013_v50  ;;  %1285 = vmatmul.mubr.bf16.gmra.mxu1 %v1605_v2  ;;  %v2065_v50 = vld [vmem:[%s2595_s1 + $0x210] sm:$0xff]  }
  0x2d   :  { %1836 = vmatpush3.bf16.msra.mxu1 %v2014_v51  ;;  %1809 = vmatprep.subr.bf16.mxu0 %v2015_v52  ;;  %v2066_v51 = vld [vmem:[%s2595_s1 + $0x290] sm:$0xff]   ;;  %v2067_v52 = vld [vmem:[%s2595_s1 + $0x248] sm:$0xff]  }
  0x2e   :  { %1837 = vmatprep.subr.bf16.mxu1 %v2016_v53  ;;  %1324 = vmatprep.mubr.bf16.mxu0 %v1592_v18  ;;  %v2068_v53 = vld [vmem:[%s2595_s1 + $0x2c8] sm:$0xff]  }
  0x2f   :  { %1372 = vmatprep.mubr.bf16.mxu1 %v1594_v21  ;;  %v2089_v21 = vld [vmem:[%s2595_s1 + $0x3a8] sm:$0xff]  }
  0x30   :  { %1810 = vmatpush3.bf16.msra.mxu0 %v2017_v54  ;;  %v2069_v54 = vld [vmem:[%s2595_s1 + $0x208] sm:$0xff]  }
  0x31   :  { %1838 = vmatpush3.bf16.msra.mxu1 %v2018_v55  ;;  %1811 = vmatprep.subr.bf16.mxu0 %v2019_v56  ;;  %v2070_v55 = vld [vmem:[%s2595_s1 + $0x288] sm:$0xff]   ;;  %v2071_v56 = vld [vmem:[%s2595_s1 + $0x240] sm:$0xff]  }
  0x32   :  { %1839 = vmatprep.subr.bf16.mxu1 %v2020_v57  ;;  %v2072_v57 = vld [vmem:[%s2595_s1 + $0x2c0] sm:$0xff]  }
  0x34   :  { %1812 = vmatpush3.bf16.msra.mxu0 %v2021_v58  ;;  %v2073_v58 = vld [vmem:[%s2595_s1 + $0x200] sm:$0xff]  }
  0x35   :  { %1840 = vmatpush3.bf16.msra.mxu1 %v2022_v59  ;;  %1813 = vmatprep.subr.bf16.mxu0 %v2026_v1  ;;  %v2074_v59 = vld [vmem:[%s2595_s1 + $0x280] sm:$0xff]   ;;  %v25_v1 = vld [vmem:[%s2596_s0 + $0x68] sm:$0xff] }
  0x36   :  { %1841 = vmatprep.subr.bf16.mxu1 %v2027_v3  ;;  %v1597_v2 = vcombine.low %v17_v62, %v25_v1  ;;  %v1598_v3 = vcombine.high %v17_v62, %v25_v1 }
  0x38   :  { %1814 = vmatpush3.bf16.msra.mxu0 %v2029_v4  ;;  %v2075_v4 = vld [vmem:[%s2595_s1 + $0x378] sm:$0xff]  }
  0x39   :  { %1842 = vmatpush3.bf16.msra.mxu1 %v2030_v5  ;;  %1815 = vmatprep.subr.bf16.mxu0 %v2031_v6  ;;  %v2076_v5 = vld [vmem:[%s2595_s1 + $0x3f8] sm:$0xff]  }
  0x3a   :  { %1843 = vmatprep.subr.bf16.mxu1 %v2032_v7  ;;  %v2077_v6 = vld [vmem:[%s2595_s1 + $0x338] sm:$0xff]  }
  0x3b   :  { %v2078_v7 = vld [vmem:[%s2595_s1 + $0x3b8] sm:$0xff]  }
  0x3c   :  { %1816 = vmatpush3.bf16.msra.mxu0 %v2033_v8  ;;  %v2079_v8 = vld [vmem:[%s2595_s1 + $0x370] sm:$0xff]  }
  0x3d   :  { %1844 = vmatpush3.bf16.msra.mxu1 %v2034_v9  ;;  %1817 = vmatprep.subr.bf16.mxu0 %v2035_v10  ;;  %v2080_v9 = vld [vmem:[%s2595_s1 + $0x3f0] sm:$0xff]  }
  0x3e   :  { %1845 = vmatprep.subr.bf16.mxu1 %v2036_v11  ;;  %v2081_v10 = vld [vmem:[%s2595_s1 + $0x330] sm:$0xff]  }
  0x3f   :  { %v2082_v11 = vld [vmem:[%s2595_s1 + $0x3b0] sm:$0xff]  }
  0x40   :  { %1818 = vmatpush3.bf16.msra.mxu0 %v2037_v12  ;;  %v32_v12 = vld [vmem:[%s2596_s0 + $0xa0] sm:$0xff] }
  0x41   :  { %1846 = vmatpush3.bf16.msra.mxu1 %v2038_v13  ;;  %1859 = vmatprep.subr.bf16.mxu0 %v2039_v22  ;;  %v1612_v13 = vcombine.high %v32_v12, %v32_v12  ;;  %v1611_v14 = vcombine.low %v32_v12, %v32_v12  ;;  %v2091_v22 = vld [vmem:[%s2595_s1 + $0x360] sm:$0xff]  }
  0x42   :  { %1887 = vmatprep.subr.bf16.mxu1 %v2040_v23  ;;  %v2092_v23 = vld [vmem:[%s2595_s1 + $0x3e0] sm:$0xff]  }
  0x43   :  { %1325 = vmatmul.mubr.bf16.vlgmr.msra.gmra.mxu0 %v1591_v17  ;;  %v33_v17 = vld [vmem:[%s2596_s0 + $0xa8] sm:$0xff] }
  0x44   :  { %1373 = vmatmul.mubr.bf16.vlgmr.msra.gmra.mxu1 %v1593_v20  ;;  %1860 = vmatpush3.bf16.msra.mxu0 %v2041_v24  ;;  %v1614_v18 = vcombine.high %v33_v17, %v33_v17  ;;  %v1613_v20 = vcombine.low %v33_v17, %v33_v17  ;;  %v2093_v24 = vld [vmem:[%s2595_s1 + $0x320] sm:$0xff]  }
  0x45   :  { %1888 = vmatpush3.bf16.msra.mxu1 %v2042_v25  ;;  %1861 = vmatprep.subr.bf16.mxu0 %v2043_v26  ;;  %v2094_v25 = vld [vmem:[%s2595_s1 + $0x3a0] sm:$0xff]   ;;  %v2095_v26 = vld [vmem:[%s2595_s1 + $0x358] sm:$0xff]  }
  0x46   :  { %1889 = vmatprep.subr.bf16.mxu1 %v2044_v27  ;;  %1332 = vmatprep.mubr.bf16.mxu0 %v1608_v31  ;;  %v2096_v27 = vld [vmem:[%s2595_s1 + $0x3d8] sm:$0xff]   ;;  %v2100_v31 = vld [vmem:[%s2595_s1 + $0x3d0] sm:$0xff]  }
  0x47   :  { %1380 = vmatprep.mubr.bf16.mxu1 %v1610_v36  ;;  %v2105_v36 = vld [vmem:[%s2595_s1 + $0x308] sm:$0xff]  }
  0x48   :  { %1862 = vmatpush3.bf16.msra.mxu0 %v2045_v28  ;;  %v2097_v28 = vld [vmem:[%s2595_s1 + $0x318] sm:$0xff]  }
  0x49   :  { %1890 = vmatpush3.bf16.msra.mxu1 %v2046_v29  ;;  %1863 = vmatprep.subr.bf16.mxu0 %v2049_v33  ;;  %v2098_v29 = vld [vmem:[%s2595_s1 + $0x398] sm:$0xff]   ;;  %v2102_v33 = vld [vmem:[%s2595_s1 + $0x390] sm:$0xff]  }
  0x4a   :  { %1891 = vmatprep.subr.bf16.mxu1 %v2050_v34  ;;  %v2103_v34 = vld [vmem:[%s2595_s1 + $0x348] sm:$0xff]  }
  0x4b   :  { %1333 = vmatmul.mubr.bf16.gmra.mxu0 %v1607_v32  ;;  %v2101_v32 = vld [vmem:[%s2595_s1 + $0x310] sm:$0xff]  }
  0x4c   :  { %1864 = vmatpush3.bf16.msra.mxu0 %v2052_v37  ;;  %1381 = vmatmul.mubr.bf16.gmra.mxu1 %v1609_v38  ;;  %v2106_v37 = vld [vmem:[%s2595_s1 + $0x388] sm:$0xff]   ;;  %v2107_v38 = vld [vmem:[%s2595_s1 + $0x340] sm:$0xff]  }
  0x4d   :  { %1892 = vmatpush3.bf16.msra.mxu1 %v2053_v39  ;;  %1865 = vmatprep.subr.bf16.mxu0 %v2055_v40  ;;  %v2108_v39 = vld [vmem:[%s2595_s1 + $0x3c0] sm:$0xff]  }
  0x4e   :  { %1893 = vmatprep.subr.bf16.mxu1 %v2056_v41  ;;  %1420 = vmatprep.mubr.bf16.mxu0 %v1596_v0  ;;  %v2109_v40 = vld [vmem:[%s2595_s1 + $0x300] sm:$0xff]  }
  0x4f   :  { %1468 = vmatprep.mubr.bf16.mxu1 %v1598_v3  ;;  %v2110_v41 = vld [vmem:[%s2595_s1 + $0x380] sm:$0xff]  }
  0x50   :  { %1866 = vmatpush3.bf16.msra.mxu0 %v2057_v42  ;;  %v18_v42 = vld [vmem:[%s2596_s0 + $0x30] sm:$0xff] }
  0x51   :  { %1894 = vmatpush3.bf16.msra.mxu1 %v2058_v43  ;;  %1867 = vmatprep.subr.bf16.mxu0 %v2059_v44  ;;  %v26_v43 = vld [vmem:[%s2596_s0 + $0x70] sm:$0xff]  ;;  %v19_v44 = vld [vmem:[%s2596_s0 + $0x38] sm:$0xff] }
  0x52   :  { %1895 = vmatprep.subr.bf16.mxu1 %v2060_v45  ;;  %v1599_v45 = vcombine.low %v18_v42, %v26_v43 }
  0x54   :  { %1868 = vmatpush3.bf16.msra.mxu0 %v2061_v46  ;;  %v1600_v46 = vcombine.high %v18_v42, %v26_v43 }
  0x55   :  { %1896 = vmatpush3.bf16.msra.mxu1 %v2062_v47  ;;  %1869 = vmatprep.subr.bf16.mxu0 %v2063_v48  ;;  %v27_v47 = vld [vmem:[%s2596_s0 + $0x78] sm:$0xff]  ;;  %v34_v48 = vld [vmem:[%s2596_s0 + $0xb0] sm:$0xff] }
  0x56   :  { %1897 = vmatprep.subr.bf16.mxu1 %v2064_v49  ;;  %v35_v49 = vld [vmem:[%s2596_s0 + $0xb8] sm:$0xff] }
  0x58   :  { %1870 = vmatpush3.bf16.msra.mxu0 %v2065_v50  ;;  %v1601_v50 = vcombine.low %v19_v44, %v27_v47 }
  0x59   :  { %1898 = vmatpush3.bf16.msra.mxu1 %v2066_v51  ;;  %1871 = vmatprep.subr.bf16.mxu0 %v2067_v52  ;;  %v1602_v51 = vcombine.high %v19_v44, %v27_v47  ;;  %v1616_v52 = vcombine.high %v34_v48, %v34_v48 }
  0x5a   :  { %1899 = vmatprep.subr.bf16.mxu1 %v2068_v53  ;;  %v1618_v53 = vcombine.high %v35_v49, %v35_v49 }
  0x5c   :  { %1872 = vmatpush3.bf16.msra.mxu0 %v2069_v54  ;;  %v1615_v54 = vcombine.low %v34_v48, %v34_v48 }
  0x5d   :  { %1900 = vmatpush3.bf16.msra.mxu1 %v2070_v55  ;;  %1873 = vmatprep.subr.bf16.mxu0 %v2071_v56  ;;  %v1617_v55 = vcombine.low %v35_v49, %v35_v49 }
  0x5e   :  { %1901 = vmatprep.subr.bf16.mxu1 %v2072_v57 }
  0x60   :  { %1874 = vmatpush3.bf16.msra.mxu0 %v2073_v58 }
  0x61   :  { %1902 = vmatpush3.bf16.msra.mxu1 %v2074_v59  ;;  %1915 = vmatprep.subr.bf16.mxu0 %v2075_v4 }
  0x62   :  { %1943 = vmatprep.subr.bf16.mxu1 %v2076_v5 }
  0x63   :  { %1421 = vmatmul.mubr.bf16.vlgmr.msra.gmra.mxu0 %v1595_v63 }
  0x64   :  { %1469 = vmatmul.mubr.bf16.vlgmr.msra.gmra.mxu1 %v1597_v2  ;;  %1916 = vmatpush3.bf16.msra.mxu0 %v2077_v6 }
  0x65   :  { %1944 = vmatpush3.bf16.msra.mxu1 %v2078_v7  ;;  %1917 = vmatprep.subr.bf16.mxu0 %v2079_v8 }
  0x66   :  { %1945 = vmatprep.subr.bf16.mxu1 %v2080_v9  ;;  %1428 = vmatprep.mubr.bf16.mxu0 %v1612_v13 }
  0x67   :  { %1476 = vmatprep.mubr.bf16.mxu1 %v1614_v18 }
  0x68   :  { %1918 = vmatpush3.bf16.msra.mxu0 %v2081_v10 }
  0x69   :  { %1946 = vmatpush3.bf16.msra.mxu1 %v2082_v11  ;;  %1919 = vmatprep.subr.bf16.mxu0 %v2085_v15 }
  0x6a   :  { %1947 = vmatprep.subr.bf16.mxu1 %v2086_v16 }
  0x6b   :  { %1429 = vmatmul.mubr.bf16.gmra.mxu0 %v1611_v14 }
  0x6c   :  { %1920 = vmatpush3.bf16.msra.mxu0 %v2088_v19  ;;  %1477 = vmatmul.mubr.bf16.gmra.mxu1 %v1613_v20 }
  0x6d   :  { %1948 = vmatpush3.bf16.msra.mxu1 %v2089_v21  ;;  %1921 = vmatprep.subr.bf16.mxu0 %v2091_v22 }
  0x6e   :  { %1949 = vmatprep.subr.bf16.mxu1 %v2092_v23  ;;  %1516 = vmatprep.mubr.bf16.mxu0 %v1600_v46 }
  0x6f   :  { %1564 = vmatprep.mubr.bf16.mxu1 %v1602_v51 }
  0x70   :  { %1922 = vmatpush3.bf16.msra.mxu0 %v2093_v24 }
  0x71   :  { %1950 = vmatpush3.bf16.msra.mxu1 %v2094_v25  ;;  %1923 = vmatprep.subr.bf16.mxu0 %v2095_v26 }
  0x72   :  { %1951 = vmatprep.subr.bf16.mxu1 %v2096_v27 }
  0x74   :  { %1924 = vmatpush3.bf16.msra.mxu0 %v2097_v28 }
  0x75   :  { %1952 = vmatpush3.bf16.msra.mxu1 %v2098_v29  ;;  %1925 = vmatprep.subr.bf16.mxu0 %v2099_v30 }
  0x76   :  { %1953 = vmatprep.subr.bf16.mxu1 %v2100_v31 }
  0x78   :  { %1926 = vmatpush3.bf16.msra.mxu0 %v2101_v32 }
  0x79   :  { %1954 = vmatpush3.bf16.msra.mxu1 %v2102_v33  ;;  %1927 = vmatprep.subr.bf16.mxu0 %v2103_v34 }
  0x7a   :  { %1955 = vmatprep.subr.bf16.mxu1 %v2104_v35 }
  0x7c   :  { %1928 = vmatpush3.bf16.msra.mxu0 %v2105_v36 }
  0x7d   :  { %1956 = vmatpush3.bf16.msra.mxu1 %v2106_v37  ;;  %1929 = vmatprep.subr.bf16.mxu0 %v2107_v38 }
  0x7e   :  { %1957 = vmatprep.subr.bf16.mxu1 %v2108_v39 }
  0x80   :  { %1930 = vmatpush3.bf16.msra.mxu0 %v2109_v40 }
  0x81   :  { %1958 = vmatpush3.bf16.msra.mxu1 %v2110_v41 }
  0x83   :  { %1517 = vmatmul.mubr.bf16.vlgmr.msra.gmra.mxu0 %v1599_v45 }
  0x84   :  { %1565 = vmatmul.mubr.bf16.vlgmr.msra.gmra.mxu1 %v1601_v50  ;;  %1524 = vmatprep.mubr.bf16.mxu0 %v1616_v52 }
  0x85   :  { %1572 = vmatprep.mubr.bf16.mxu1 %v1618_v53 }
  0x8b   :  { %1525 = vmatmul.mubr.bf16.gmra.mxu0 %v1615_v54 }
  0x8c   :  { %1573 = vmatmul.mubr.bf16.gmra.mxu1 %v1617_v55 }
  0xe3   :  { %v1763_v56 = vpop.f32.mrf.mxu0 }
  0xe4   :  { %v1791_v57 = vpop.f32.mrf.mxu1 }
  0xe5   :  { %v1764_v58 = vpop.f32.mrf.mxu0 }
  0xe6   :  { %v1765_v59 = vadd.f32 %v1764_v58, %v1763_v56  ;;  %v1792_v60 = vpop.f32.mrf.mxu1 }
  0xe7   :  { %v1793_v61 = vadd.f32 %v1792_v60, %v1791_v57  ;;  %v1766_v62 = vpop.f32.mrf.mxu0 }
  0xe8   :  { %v1794_v63 = vpop.f32.mrf.mxu1 }
  0xe9   :  { %v1279_v0 = vadd.f32 %v1793_v61, %v1765_v59  ;;  %v1767_v1 = vpop.f32.mrf.mxu0 }
  0xea   :  { %v1768_v2 = vadd.f32 %v1767_v1, %v1766_v62  ;;  %v1795_v3 = vpop.f32.mrf.mxu1 }
  0xeb   :  { %v1796_v4 = vadd.f32 %v1795_v3, %v1794_v63  ;;  %v1769_v6 = vpop.f32.mrf.mxu0 }
  0xec   :  { %v1797_v7 = vpop.f32.mrf.mxu1 }
  0xed   :  { %v1282_v5 = vadd.f32 %v1796_v4, %v1768_v2  ;;  %v1770_v8 = vpop.f32.mrf.mxu0 }
  0xee   :  { %v1771_v9 = vadd.f32 %v1770_v8, %v1769_v6  ;;  %v1798_v10 = vpop.f32.mrf.mxu1 }
  0xef   :  { %v1772_v11 = vpop.f32.mrf.mxu0  ;;  %v1799_v12 = vadd.f32 %v1798_v10, %v1797_v7 }
  0xf0   :  { %v1800_v13 = vpop.f32.mrf.mxu1 }
  0xf1   :  { %v1287_v14 = vadd.f32 %v1799_v12, %v1771_v9  ;;  %v1773_v15 = vpop.f32.mrf.mxu0 }
  0xf2   :  { %v1801_v16 = vpop.f32.mrf.mxu1 }
 0x103   :  { %v1819_v17 = vpop.f32.mrf.mxu0 }
 0x104   :  { %v1847_v18 = vpop.f32.mrf.mxu1 }
 0x105   :  { %v1820_v19 = vpop.f32.mrf.mxu0 }
 0x106   :  { %v1848_v20 = vpop.f32.mrf.mxu1  ;;  %v1821_v49 = vadd.f32 %v1820_v19, %v1819_v17 }
 0x107   :  { %v1822_v21 = vpop.f32.mrf.mxu0  ;;  %v1849_v52 = vadd.f32 %v1848_v20, %v1847_v18 }
 0x108   :  { %v1850_v22 = vpop.f32.mrf.mxu1  ;;  %v1327_v51 = vadd.f32 %v1821_v49, %v1279_v0 }
 0x109   :  { %v1823_v23 = vpop.f32.mrf.mxu0 }
 0x10a   :  { %v1851_v25 = vpop.f32.mrf.mxu1  ;;  %v1824_v50 = vadd.f32 %v1823_v23, %v1822_v21  ;;  %v1375_v55 = vadd.f32 %v1849_v52, %v1327_v51 }
 0x10b   :  { %v1825_v24 = vpop.f32.mrf.mxu0  ;;  %v1852_v57 = vadd.f32 %v1851_v25, %v1850_v22 }
 0x10c   :  { %v1853_v27 = vpop.f32.mrf.mxu1  ;;  %v1330_v54 = vadd.f32 %v1824_v50, %v1282_v5 }
 0x10d   :  { %v1826_v26 = vpop.f32.mrf.mxu0 }
 0x10e   :  { %v1854_v29 = vpop.f32.mrf.mxu1  ;;  %v1827_v56 = vadd.f32 %v1826_v26, %v1825_v24  ;;  %v1378_v61 = vadd.f32 %v1852_v57, %v1330_v54 }
 0x10f   :  { %v1828_v28 = vpop.f32.mrf.mxu0  ;;  %v1855_v1 = vadd.f32 %v1854_v29, %v1853_v27 }
 0x110   :  { %v1856_v31 = vpop.f32.mrf.mxu1  ;;  %v1335_v63 = vadd.f32 %v1827_v56, %v1287_v14 }
 0x111   :  { %v1829_v30 = vpop.f32.mrf.mxu0 }
 0x112   :  { %v1857_v32 = vpop.f32.mrf.mxu1  ;;  %v1383_v5 = vadd.f32 %v1855_v1, %v1335_v63 }
 0x123   :  { %v1875_v33 = vpop.f32.mrf.mxu0 }
 0x124   :  { %v1903_v34 = vpop.f32.mrf.mxu1 }
 0x125   :  { %v1876_v35 = vpop.f32.mrf.mxu0 }
 0x126   :  { %v1904_v36 = vpop.f32.mrf.mxu1  ;;  %v1877_v53 = vadd.f32 %v1876_v35, %v1875_v33 }
 0x127   :  { %v1878_v37 = vpop.f32.mrf.mxu0  ;;  %v1905_v60 = vadd.f32 %v1904_v36, %v1903_v34 }
 0x128   :  { %v1906_v38 = vpop.f32.mrf.mxu1  ;;  %v1423_v59 = vadd.f32 %v1877_v53, %v1375_v55 }
 0x129   :  { %v1879_v39 = vpop.f32.mrf.mxu0 }
 0x12a   :  { %v1907_v41 = vpop.f32.mrf.mxu1  ;;  %v1880_v58 = vadd.f32 %v1879_v39, %v1878_v37  ;;  %v1471_v6 = vadd.f32 %v1905_v60, %v1423_v59 }
 0x12b   :  { %v1881_v40 = vpop.f32.mrf.mxu0  ;;  %v1908_v9 = vadd.f32 %v1907_v41, %v1906_v38 }
 0x12c   :  { %v1909_v43 = vpop.f32.mrf.mxu1  ;;  %v1426_v3 = vadd.f32 %v1880_v58, %v1378_v61 }
 0x12d   :  { %v1882_v42 = vpop.f32.mrf.mxu0 }
 0x12e   :  { %v1910_v45 = vpop.f32.mrf.mxu1  ;;  %v1883_v7 = vadd.f32 %v1882_v42, %v1881_v40  ;;  %v1474_v15 = vadd.f32 %v1908_v9, %v1426_v3 }
 0x12f   :  { %v1884_v44 = vpop.f32.mrf.mxu0  ;;  %v1911_v18 = vadd.f32 %v1910_v45, %v1909_v43 }
 0x130   :  { %v1912_v47 = vpop.f32.mrf.mxu1  ;;  %v1431_v17 = vadd.f32 %v1883_v7, %v1383_v5 }
 0x131   :  { %v1885_v46 = vpop.f32.mrf.mxu0 }
 0x132   :  { %v1913_v48 = vpop.f32.mrf.mxu1  ;;  %v1479_v26 = vadd.f32 %v1911_v18, %v1431_v17 }
 0x143   :  { %v1931_v62 = vpop.f32.mrf.mxu0 }
 0x144   :  { %v1959_v2 = vpop.f32.mrf.mxu1 }
 0x145   :  { %v1932_v4 = vpop.f32.mrf.mxu0 }
 0x146   :  { %v1933_v8 = vadd.f32 %v1932_v4, %v1931_v62  ;;  %v1960_v0 = vpop.f32.mrf.mxu1 }
 0x147   :  { %v1934_v10 = vpop.f32.mrf.mxu0  ;;  %v1961_v12 = vadd.f32 %v1960_v0, %v1959_v2 }
 0x148   :  { %v1519_v11 = vadd.f32 %v1933_v8, %v1471_v6  ;;  %v1962_v13 = vpop.f32.mrf.mxu1 }
 0x149   :  { %v1935_v16 = vpop.f32.mrf.mxu0 }
 0x14a   :  { %v1567_v19 = vadd.f32 %v1961_v12, %v1519_v11  ;;  %v1936_v14 = vadd.f32 %v1935_v16, %v1934_v10  ;;  %v1963_v20 = vpop.f32.mrf.mxu1 }
 0x14b   :  { %v1937_v21 = vpop.f32.mrf.mxu0  ;;  %v1964_v23 = vadd.f32 %v1963_v20, %v1962_v13 }
 0x14c   :  { %1580 = vst [vmem:[%s2597_s2] sm:$0xff] %v1567_v19  ;;  %v1522_v22 = vadd.f32 %v1936_v14, %v1474_v15  ;;  %v1965_v24 = vpop.f32.mrf.mxu1 }
 0x14d   :  { %v1938_v25 = vpop.f32.mrf.mxu0 }
 0x14e   :  { %v1570_v27 = vadd.f32 %v1964_v23, %v1522_v22  ;;  %v1939_v28 = vadd.f32 %v1938_v25, %v1937_v21  ;;  %v1966_v29 = vpop.f32.mrf.mxu1 }
 0x14f   :  { %v1940_v30 = vpop.f32.mrf.mxu0  ;;  %v1967_v32 = vadd.f32 %v1966_v29, %v1965_v24 }
 0x150   :  { %1581 = vst [vmem:[%s2597_s2 + $0x8] sm:$0xff] %v1570_v27  ;;  %v1527_v31 = vadd.f32 %v1939_v28, %v1479_v26  ;;  %v1968_v33 = vpop.f32.mrf.mxu1 }
 0x151   :  { %v1941_v34 = vpop.f32.mrf.mxu0 }
 0x152   :  { %v1575_v35 = vadd.f32 %v1967_v32, %v1527_v31  ;;  %v1969_v36 = vpop.f32.mrf.mxu1 }
 0x154   :  { %1582 = vst [vmem:[%s2597_s2 + $0x10] sm:$0xff] %v1575_v35 }

</bundles_post_ra>
